<compile_context>
chip_gen: v5e
topology: v5e:2x2
jax: 0.10.0
libtpu: 0.0.40
codegen_flags: <defaults>
</compile_context>

<pallas_src>
import functools

import jax
import jax.numpy as jnp
import numpy as np
from jax.experimental import pallas as pl
from jax.experimental.pallas import tpu as pltpu

jax.config.update("jax_default_matmul_precision", "highest")

LANE = 128  # lane width of the packed weight / bias / output slabs


# --------------------------------------------------------------------------- #
# Pallas kernel: full A3TGCN (all periods) + ReLU + Linear(out_channels -> d_d)
# --------------------------------------------------------------------------- #
def _a3tgcn_kernel(probs_ref, a_ref, x_ref, h_ref, w_ref, b_ref, out_ref,
                   *, n, fin, fout, periods):
    # Weight-slab row offsets (must match host packing order; all multiples of 8).
    r_gates = 0                 # [Fin , 128] : [Wz@Wz1 | Wr@Wr1 | Wh@Wh1 | 0]
    r_hgate = fin               # [Fout, 128] : [Wz2 | Wr2 | 0]
    r_wh2 = fin + fout          # [Fout, 128] : [Wh2 | 0]
    r_lin = fin + 2 * fout      # [Fout, 128] : [0 | W_lin | 0]  (readout @ cols F:F+d_d)

    a = a_ref[...]              # [N, N]
    h0 = h_ref[...]             # [N, Fout]

    # H0-dependent gate terms + fused gate biases: identical for every period
    # (A3TGCN feeds the same H0 into each TGCN step) -> computed once, kept in vregs.
    hw = (jnp.dot(h0, w_ref[r_hgate:r_hgate + fout, :],
                  preferred_element_type=jnp.float32)
          + b_ref[0:1, :])                                            # [N, 128]

    # Reassociated feature matmul: (A@X_p)@W == A@(X_p@W).  One lane-dense
    # [P*N, Fin] x [Fin, 128] matmul covers every period.
    xw = jnp.dot(x_ref[...], w_ref[r_gates:r_gates + fin, :],
                 preferred_element_type=jnp.float32)                  # [P*N, 128]

    acc = jnp.zeros((n, fout), jnp.float32)
    for p in range(periods):    # static unrolled in-kernel loop (no grid overhead)
        # Fused gate pre-activations: cols [0:F)=z, [F:2F)=r, [2F:3F)=candidate.
        pre = (jnp.dot(a, xw[p * n:(p + 1) * n, :],
                       preferred_element_type=jnp.float32)
               + hw)                                                  # [N, 128]
        zr = jax.nn.sigmoid(pre[:, 0:2 * fout])      # one EUP call for z and r
        z = zr[:, 0:fout]
        r = zr[:, fout:2 * fout]
        h_tilde = jnp.tanh(pre[:, 2 * fout:3 * fout]
                           + jnp.dot(h0 * r, w_ref[r_wh2:r_wh2 + fout, 0:fout],
                                     preferred_element_type=jnp.float32))
        h_p = z * h0 + (1.0 - z) * h_tilde                            # one TGCN step
        acc = acc + probs_ref[p] * h_p                # attention-weighted sum (vregs)

    # Readout.  One lane-dense [N, 128] result:
    #   cols [0:F)       = H_accum
    #   cols [F:F+d_d)   = Linear(relu(H_accum))
    y_slab = (jnp.dot(jnp.maximum(acc, 0.0), w_ref[r_lin:r_lin + fout, :],
                      preferred_element_type=jnp.float32)
              + b_ref[1:2, :])                        # zero outside cols [F, F+d_d)
    out_ref[...] = y_slab
    out_ref[:, 0:fout] = acc                          # no identity matmul needed


def t_a3tgcn_forward(a_norm, x, h0, params):
    """x: [N, Fin, periods] (PyTorch layout). Returns (H_accum [N,Fout], y [N,d_d])."""
    n, fin, periods = x.shape
    fout = h0.shape[1]
    d_d = params["wl"].shape[1]
    assert 3 * fout <= LANE and fout + d_d <= LANE
    # Keep the weight-slab section offsets sublane-aligned so the static Ref
    # slices in the kernel remain zero-cost views.
    assert fin % 8 == 0 and fout % 8 == 0
    f32 = jnp.float32

    # ---- host-side algebraic pre-composition of the per-gate weight chains ----
    wz_eff = params["wz"] @ params["wz1"]
    wr_eff = params["wr"] @ params["wr1"]
    wh_eff = params["wh"] @ params["wh1"]
    bz_eff = params["bzc"] @ params["wz1"] + params["bz"]
    br_eff = params["brc"] @ params["wr1"] + params["br"]
    bh_eff = params["bhc"] @ params["wh1"] + params["bh"]

    def pad_lanes(m):
        return jnp.pad(m.astype(f32), ((0, 0), (0, LANE - m.shape[1])))

    w_gates = pad_lanes(jnp.concatenate([wz_eff, wr_eff, wh_eff], axis=1))        # [Fin ,128]
    w_hgate = pad_lanes(jnp.concatenate([params["wz2"], params["wr2"]], axis=1))  # [Fout,128]
    w_wh2 = pad_lanes(params["wh2"])                                              # [Fout,128]
    w_lin = jnp.zeros((fout, LANE), f32).at[:, fout:fout + d_d].set(params["wl"])
    w_slab = jnp.concatenate([w_gates, w_hgate, w_wh2, w_lin], axis=0)            # [Fin+3F,128]

    b_gates = pad_lanes(jnp.concatenate([bz_eff, br_eff, bh_eff], axis=1))        # [1,128]
    b_out = jnp.zeros((1, LANE), f32).at[:, fout:fout + d_d].set(params["bl"])
    b_slab = jnp.concatenate([b_gates, b_out], axis=0)                            # [2,128]

    probs = jax.nn.softmax(params["attention"].astype(f32))                       # [P]
    # Period-major row-stack [P*N, Fin] so the kernel does ONE X@W_gates matmul.
    x_rows = jnp.transpose(x, (2, 0, 1)).reshape(periods * n, fin).astype(f32)

    flops = int(2 * periods * n * fin * LANE              # X @ W_gates (all periods)
                + 2 * n * fout * LANE                     # H0-gate precompute
                + periods * 2 * (n * n * LANE + n * fout * fout)
                + 2 * n * fout * LANE)                    # packed readout
    transcendentals = int(periods * 3 * n * fout)
    bytes_accessed = int(4 * (probs.size + a_norm.size + x_rows.size + h0.size
                              + w_slab.size + b_slab.size + n * LANE))

    kernel = functools.partial(_a3tgcn_kernel, n=int(n), fin=int(fin),
                               fout=int(fout), periods=int(periods))

    out = pl.pallas_call(
        kernel,
        out_shape=jax.ShapeDtypeStruct((n, LANE), f32),
        in_specs=[
            pl.BlockSpec(memory_space=pltpu.MemorySpace.SMEM),   # attention probs
            pl.BlockSpec(memory_space=pltpu.MemorySpace.VMEM),   # A_norm (resident)
            pl.BlockSpec(memory_space=pltpu.MemorySpace.VMEM),   # X rows (all periods)
            pl.BlockSpec(memory_space=pltpu.MemorySpace.VMEM),   # H0
            pl.BlockSpec(memory_space=pltpu.MemorySpace.VMEM),   # fused weight slab
            pl.BlockSpec(memory_space=pltpu.MemorySpace.VMEM),   # fused bias slab
        ],
        out_specs=pl.BlockSpec(memory_space=pltpu.MemorySpace.VMEM),
        compiler_params=pltpu.CompilerParams(vmem_limit_bytes=32 * 1024 * 1024),
        cost_estimate=pl.CostEstimate(flops=flops,
                                      transcendentals=transcendentals,
                                      bytes_accessed=bytes_accessed),
    )(probs, a_norm.astype(f32), x_rows, h0.astype(f32), w_slab, b_slab)

    return out[:, :fout], out[:, fout:fout + d_d]


# --------------------------------------------------------------------------- #
# Glue: dense "improved" GCN normalization (A + 2I, symmetric D^-1/2 norm)
# --------------------------------------------------------------------------- #
def gcn_norm_dense(edge_index, edge_weight, num_nodes, improved=True):
    fill = 2.0 if improved else 1.0
    row, col = edge_index[0], edge_index[1]
    loop = jnp.arange(num_nodes, dtype=row.dtype)
    row = jnp.concatenate([row, loop])
    col = jnp.concatenate([col, loop])
    ew = jnp.concatenate([edge_weight, jnp.full((num_nodes,), fill, jnp.float32)])
    deg = jnp.zeros((num_nodes,), jnp.float32).at[col].add(ew)
    dinv = jnp.where(deg > 0, 1.0 / jnp.sqrt(deg), 0.0)
    norm = dinv[row] * ew * dinv[col]
    a = jnp.zeros((num_nodes, num_nodes), jnp.float32).at[col, row].add(norm)
    return a


# Pure-JAX reference (unfused math, same as torch_geometric_temporal A3TGCN).
def reference_forward(a_norm, x, h0, p):
    probs = jax.nn.softmax(p["attention"])
    h_accum = jnp.zeros_like(h0)
    for t in range(x.shape[2]):
        xt = x[:, :, t]
        ax = a_norm @ xt
        cz = ax @ p["wz"] + p["bzc"]
        cr = ax @ p["wr"] + p["brc"]
        ch = ax @ p["wh"] + p["bhc"]
        z = jax.nn.sigmoid(cz @ p["wz1"] + h0 @ p["wz2"] + p["bz"])
        r = jax.nn.sigmoid(cr @ p["wr1"] + h0 @ p["wr2"] + p["br"])
        h_t = jnp.tanh(ch @ p["wh1"] + (h0 * r) @ p["wh2"] + p["bh"])
        h_new = z * h0 + (1.0 - z) * h_t
        h_accum = h_accum + probs[t] * h_new
    y = jnp.maximum(h_accum, 0.0) @ p["wl"] + p["bl"]
    return h_accum, y


if __name__ == "__main__":
    N, F_IN, F_OUT, D_D = 16, 8, 32, 7
    P = D_D  # A3TGCN(periods=d_d) in the PyTorch module

    key = jax.random.PRNGKey(0)
    keys = jax.random.split(key, 32)

    # Node features over periods and initial hidden state.
    x = jax.random.normal(keys[0], (N, F_IN, P), jnp.float32)
    h0 = jax.random.normal(keys[1], (N, F_OUT), jnp.float32) * 0.1

    # Ring graph, both directions.
    src = np.arange(N)
    dst = (src + 1) % N
    edge_index = jnp.asarray(
        np.stack([np.concatenate([src, dst]), np.concatenate([dst, src])]),
        dtype=jnp.int32)
    edge_weight = jax.random.uniform(keys[2], (edge_index.shape[1],),
                                     jnp.float32, 0.5, 1.5)
    a_norm = gcn_norm_dense(edge_index, edge_weight, N, improved=True)

    def w(k, shape, scale=0.1):
        return jax.random.normal(k, shape, jnp.float32) * scale

    params = {
        # GCNConv weights/biases (weight stored as [Fin, Fout], applied X @ W)
        "wz": w(keys[3], (F_IN, F_OUT)), "wr": w(keys[4], (F_IN, F_OUT)),
        "wh": w(keys[5], (F_IN, F_OUT)),
        "bzc": w(keys[6], (1, F_OUT)), "brc": w(keys[7], (1, F_OUT)),
        "bhc": w(keys[8], (1, F_OUT)),
        # torch.nn.Linear(2*F_OUT, F_OUT) split into [conv-part | hidden-part]
        "wz1": w(keys[9], (F_OUT, F_OUT)), "wz2": w(keys[10], (F_OUT, F_OUT)),
        "bz": w(keys[11], (1, F_OUT)),
        "wr1": w(keys[12], (F_OUT, F_OUT)), "wr2": w(keys[13], (F_OUT, F_OUT)),
        "br": w(keys[14], (1, F_OUT)),
        "wh1": w(keys[15], (F_OUT, F_OUT)), "wh2": w(keys[16], (F_OUT, F_OUT)),
        "bh": w(keys[17], (1, F_OUT)),
        # final torch.nn.Linear(F_OUT, d_d)
        "wl": w(keys[18], (F_OUT, D_D)), "bl": w(keys[19], (1, D_D)),
        # A3TGCN attention parameter (softmax-ed over periods)
        "attention": jax.random.uniform(keys[20], (P,), jnp.float32),
    }

    h_acc, y = t_a3tgcn_forward(a_norm, x, h0, params)
    jax.block_until_ready((h_acc, y))

    # TODO(synk): h0.detach() has no autodiff meaning here; we simply return H_accum.
    h_ref, y_ref = reference_forward(a_norm, x, h0, params)
    assert np.allclose(np.asarray(h_acc), np.asarray(h_ref), atol=5e-5, rtol=5e-5)
    assert np.allclose(np.asarray(y), np.asarray(y_ref), atol=5e-5, rtol=5e-5)
    assert h_acc.shape == (N, F_OUT) and y.shape == (N, D_D)

    print("KERNEL_OK")
</pallas_src>

<mosaic_0001>
module attributes {stable_mosaic.version = 11 : i64} {
  func.func @_a3tgcn_kernel(%arg0: memref<7xf32, #tpu.memory_space<smem>>, %arg1: memref<16x16xf32, #tpu.memory_space<vmem>>, %arg2: memref<112x8xf32, #tpu.memory_space<vmem>>, %arg3: memref<16x32xf32, #tpu.memory_space<vmem>>, %arg4: memref<104x128xf32, #tpu.memory_space<vmem>>, %arg5: memref<2x128xf32, #tpu.memory_space<vmem>>, %arg6: memref<16x128xf32, #tpu.memory_space<vmem>>) attributes {dimension_semantics = [], scalar_prefetch = 0 : i64, scratch_operands = 0 : i64, tpu.core_type = #tpu.core_type<tc>} {
    %c0 = arith.constant 0 : index
    %c0_0 = arith.constant 0 : index
    %0 = vector.load %arg1[%c0, %c0_0] : memref<16x16xf32, #tpu.memory_space<vmem>>, vector<16x16xf32>
    %c0_1 = arith.constant 0 : index
    %c0_2 = arith.constant 0 : index
    %1 = vector.load %arg3[%c0_1, %c0_2] : memref<16x32xf32, #tpu.memory_space<vmem>>, vector<16x32xf32>
    %c8 = arith.constant 8 : index
    %c0_3 = arith.constant 0 : index
    %2 = vector.load %arg4[%c8, %c0_3] : memref<104x128xf32, #tpu.memory_space<vmem>>, vector<32x128xf32>
    %cst = arith.constant dense<0.000000e+00> : vector<16x128xf32>
    %3 = tpu.matmul %1, %2, %cst {dimension_numbers = #tpu.dot_dimension_numbers<[1], [0], [0], [1], [0, 0, 1, 1], [], []>, precision = #tpu.contract_precision<fp32>} : vector<16x32xf32>, vector<32x128xf32>, vector<16x128xf32> -> vector<16x128xf32>
    %c0_4 = arith.constant 0 : index
    %c0_5 = arith.constant 0 : index
    %4 = vector.load %arg5[%c0_4, %c0_5] : memref<2x128xf32, #tpu.memory_space<vmem>>, vector<1x128xf32>
    %5 = vector.broadcast %4 : vector<1x128xf32> to vector<16x128xf32>
    %6 = arith.addf %3, %5 : vector<16x128xf32>
    %c0_6 = arith.constant 0 : index
    %c0_7 = arith.constant 0 : index
    %7 = vector.load %arg2[%c0_6, %c0_7] : memref<112x8xf32, #tpu.memory_space<vmem>>, vector<112x8xf32>
    %c0_8 = arith.constant 0 : index
    %c0_9 = arith.constant 0 : index
    %8 = vector.load %arg4[%c0_8, %c0_9] : memref<104x128xf32, #tpu.memory_space<vmem>>, vector<8x128xf32>
    %cst_10 = arith.constant dense<0.000000e+00> : vector<112x128xf32>
    %9 = tpu.matmul %7, %8, %cst_10 {dimension_numbers = #tpu.dot_dimension_numbers<[1], [0], [0], [1], [0, 0, 1, 1], [], []>, precision = #tpu.contract_precision<fp32>} : vector<112x8xf32>, vector<8x128xf32>, vector<112x128xf32> -> vector<112x128xf32>
    %cst_11 = arith.constant 0.000000e+00 : f32
    %10 = vector.broadcast %cst_11 : f32 to vector<16x32xf32>
    %11 = vector.extract_strided_slice %9 {offsets = [0, 0], sizes = [16, 128], strides = [1, 1]} : vector<112x128xf32> to vector<16x128xf32>
    %cst_12 = arith.constant dense<0.000000e+00> : vector<16x128xf32>
    %12 = tpu.matmul %0, %11, %cst_12 {dimension_numbers = #tpu.dot_dimension_numbers<[1], [0], [0], [1], [0, 0, 1, 1], [], []>, precision = #tpu.contract_precision<fp32>} : vector<16x16xf32>, vector<16x128xf32>, vector<16x128xf32> -> vector<16x128xf32>
    %13 = arith.addf %12, %6 : vector<16x128xf32>
    %14 = vector.extract_strided_slice %13 {offsets = [0, 0], sizes = [16, 64], strides = [1, 1]} : vector<16x128xf32> to vector<16x64xf32>
    %15 = arith.negf %14 : vector<16x64xf32>
    %16 = math.exp %15 : vector<16x64xf32>
    %cst_13 = arith.constant 1.000000e+00 : f32
    %17 = vector.broadcast %cst_13 : f32 to vector<16x64xf32>
    %18 = arith.addf %17, %16 : vector<16x64xf32>
    %19 = arith.divf %17, %18 : vector<16x64xf32>
    %20 = vector.extract_strided_slice %19 {offsets = [0, 0], sizes = [16, 32], strides = [1, 1]} : vector<16x64xf32> to vector<16x32xf32>
    %21 = vector.extract_strided_slice %19 {offsets = [0, 32], sizes = [16, 32], strides = [1, 1]} : vector<16x64xf32> to vector<16x32xf32>
    %22 = vector.extract_strided_slice %13 {offsets = [0, 64], sizes = [16, 32], strides = [1, 1]} : vector<16x128xf32> to vector<16x32xf32>
    %23 = arith.mulf %1, %21 : vector<16x32xf32>
    %c40 = arith.constant 40 : index
    %c0_14 = arith.constant 0 : index
    %24 = vector.load %arg4[%c40, %c0_14] : memref<104x128xf32, #tpu.memory_space<vmem>>, vector<32x32xf32>
    %cst_15 = arith.constant dense<0.000000e+00> : vector<16x32xf32>
    %25 = tpu.matmul %23, %24, %cst_15 {dimension_numbers = #tpu.dot_dimension_numbers<[1], [0], [0], [1], [0, 0, 1, 1], [], []>, precision = #tpu.contract_precision<fp32>} : vector<16x32xf32>, vector<32x32xf32>, vector<16x32xf32> -> vector<16x32xf32>
    %26 = arith.addf %22, %25 : vector<16x32xf32>
    %27 = math.tanh %26 : vector<16x32xf32>
    %28 = arith.mulf %20, %1 : vector<16x32xf32>
    %cst_16 = arith.constant 1.000000e+00 : f32
    %29 = vector.broadcast %cst_16 : f32 to vector<16x32xf32>
    %30 = arith.subf %29, %20 : vector<16x32xf32>
    %31 = arith.mulf %30, %27 : vector<16x32xf32>
    %32 = arith.addf %28, %31 : vector<16x32xf32>
    %c0_17 = arith.constant 0 : index
    %33 = memref.load %arg0[%c0_17] : memref<7xf32, #tpu.memory_space<smem>>
    %34 = vector.broadcast %33 : f32 to vector<16x32xf32>
    %35 = arith.mulf %34, %32 : vector<16x32xf32>
    %36 = arith.addf %10, %35 : vector<16x32xf32>
    %37 = vector.extract_strided_slice %9 {offsets = [16, 0], sizes = [16, 128], strides = [1, 1]} : vector<112x128xf32> to vector<16x128xf32>
    %cst_18 = arith.constant dense<0.000000e+00> : vector<16x128xf32>
    %38 = tpu.matmul %0, %37, %cst_18 {dimension_numbers = #tpu.dot_dimension_numbers<[1], [0], [0], [1], [0, 0, 1, 1], [], []>, precision = #tpu.contract_precision<fp32>} : vector<16x16xf32>, vector<16x128xf32>, vector<16x128xf32> -> vector<16x128xf32>
    %39 = arith.addf %38, %6 : vector<16x128xf32>
    %40 = vector.extract_strided_slice %39 {offsets = [0, 0], sizes = [16, 64], strides = [1, 1]} : vector<16x128xf32> to vector<16x64xf32>
    %41 = arith.negf %40 : vector<16x64xf32>
    %42 = math.exp %41 : vector<16x64xf32>
    %cst_19 = arith.constant 1.000000e+00 : f32
    %43 = vector.broadcast %cst_19 : f32 to vector<16x64xf32>
    %44 = arith.addf %43, %42 : vector<16x64xf32>
    %45 = arith.divf %43, %44 : vector<16x64xf32>
    %46 = vector.extract_strided_slice %45 {offsets = [0, 0], sizes = [16, 32], strides = [1, 1]} : vector<16x64xf32> to vector<16x32xf32>
    %47 = vector.extract_strided_slice %45 {offsets = [0, 32], sizes = [16, 32], strides = [1, 1]} : vector<16x64xf32> to vector<16x32xf32>
    %48 = vector.extract_strided_slice %39 {offsets = [0, 64], sizes = [16, 32], strides = [1, 1]} : vector<16x128xf32> to vector<16x32xf32>
    %49 = arith.mulf %1, %47 : vector<16x32xf32>
    %c40_20 = arith.constant 40 : index
    %c0_21 = arith.constant 0 : index
    %50 = vector.load %arg4[%c40_20, %c0_21] : memref<104x128xf32, #tpu.memory_space<vmem>>, vector<32x32xf32>
    %cst_22 = arith.constant dense<0.000000e+00> : vector<16x32xf32>
    %51 = tpu.matmul %49, %50, %cst_22 {dimension_numbers = #tpu.dot_dimension_numbers<[1], [0], [0], [1], [0, 0, 1, 1], [], []>, precision = #tpu.contract_precision<fp32>} : vector<16x32xf32>, vector<32x32xf32>, vector<16x32xf32> -> vector<16x32xf32>
    %52 = arith.addf %48, %51 : vector<16x32xf32>
    %53 = math.tanh %52 : vector<16x32xf32>
    %54 = arith.mulf %46, %1 : vector<16x32xf32>
    %cst_23 = arith.constant 1.000000e+00 : f32
    %55 = vector.broadcast %cst_23 : f32 to vector<16x32xf32>
    %56 = arith.subf %55, %46 : vector<16x32xf32>
    %57 = arith.mulf %56, %53 : vector<16x32xf32>
    %58 = arith.addf %54, %57 : vector<16x32xf32>
    %c1 = arith.constant 1 : index
    %59 = memref.load %arg0[%c1] : memref<7xf32, #tpu.memory_space<smem>>
    %60 = vector.broadcast %59 : f32 to vector<16x32xf32>
    %61 = arith.mulf %60, %58 : vector<16x32xf32>
    %62 = arith.addf %36, %61 : vector<16x32xf32>
    %63 = vector.extract_strided_slice %9 {offsets = [32, 0], sizes = [16, 128], strides = [1, 1]} : vector<112x128xf32> to vector<16x128xf32>
    %cst_24 = arith.constant dense<0.000000e+00> : vector<16x128xf32>
    %64 = tpu.matmul %0, %63, %cst_24 {dimension_numbers = #tpu.dot_dimension_numbers<[1], [0], [0], [1], [0, 0, 1, 1], [], []>, precision = #tpu.contract_precision<fp32>} : vector<16x16xf32>, vector<16x128xf32>, vector<16x128xf32> -> vector<16x128xf32>
    %65 = arith.addf %64, %6 : vector<16x128xf32>
    %66 = vector.extract_strided_slice %65 {offsets = [0, 0], sizes = [16, 64], strides = [1, 1]} : vector<16x128xf32> to vector<16x64xf32>
    %67 = arith.negf %66 : vector<16x64xf32>
    %68 = math.exp %67 : vector<16x64xf32>
    %cst_25 = arith.constant 1.000000e+00 : f32
    %69 = vector.broadcast %cst_25 : f32 to vector<16x64xf32>
    %70 = arith.addf %69, %68 : vector<16x64xf32>
    %71 = arith.divf %69, %70 : vector<16x64xf32>
    %72 = vector.extract_strided_slice %71 {offsets = [0, 0], sizes = [16, 32], strides = [1, 1]} : vector<16x64xf32> to vector<16x32xf32>
    %73 = vector.extract_strided_slice %71 {offsets = [0, 32], sizes = [16, 32], strides = [1, 1]} : vector<16x64xf32> to vector<16x32xf32>
    %74 = vector.extract_strided_slice %65 {offsets = [0, 64], sizes = [16, 32], strides = [1, 1]} : vector<16x128xf32> to vector<16x32xf32>
    %75 = arith.mulf %1, %73 : vector<16x32xf32>
    %c40_26 = arith.constant 40 : index
    %c0_27 = arith.constant 0 : index
    %76 = vector.load %arg4[%c40_26, %c0_27] : memref<104x128xf32, #tpu.memory_space<vmem>>, vector<32x32xf32>
    %cst_28 = arith.constant dense<0.000000e+00> : vector<16x32xf32>
    %77 = tpu.matmul %75, %76, %cst_28 {dimension_numbers = #tpu.dot_dimension_numbers<[1], [0], [0], [1], [0, 0, 1, 1], [], []>, precision = #tpu.contract_precision<fp32>} : vector<16x32xf32>, vector<32x32xf32>, vector<16x32xf32> -> vector<16x32xf32>
    %78 = arith.addf %74, %77 : vector<16x32xf32>
    %79 = math.tanh %78 : vector<16x32xf32>
    %80 = arith.mulf %72, %1 : vector<16x32xf32>
    %cst_29 = arith.constant 1.000000e+00 : f32
    %81 = vector.broadcast %cst_29 : f32 to vector<16x32xf32>
    %82 = arith.subf %81, %72 : vector<16x32xf32>
    %83 = arith.mulf %82, %79 : vector<16x32xf32>
    %84 = arith.addf %80, %83 : vector<16x32xf32>
    %c2 = arith.constant 2 : index
    %85 = memref.load %arg0[%c2] : memref<7xf32, #tpu.memory_space<smem>>
    %86 = vector.broadcast %85 : f32 to vector<16x32xf32>
    %87 = arith.mulf %86, %84 : vector<16x32xf32>
    %88 = arith.addf %62, %87 : vector<16x32xf32>
    %89 = vector.extract_strided_slice %9 {offsets = [48, 0], sizes = [16, 128], strides = [1, 1]} : vector<112x128xf32> to vector<16x128xf32>
    %cst_30 = arith.constant dense<0.000000e+00> : vector<16x128xf32>
    %90 = tpu.matmul %0, %89, %cst_30 {dimension_numbers = #tpu.dot_dimension_numbers<[1], [0], [0], [1], [0, 0, 1, 1], [], []>, precision = #tpu.contract_precision<fp32>} : vector<16x16xf32>, vector<16x128xf32>, vector<16x128xf32> -> vector<16x128xf32>
    %91 = arith.addf %90, %6 : vector<16x128xf32>
    %92 = vector.extract_strided_slice %91 {offsets = [0, 0], sizes = [16, 64], strides = [1, 1]} : vector<16x128xf32> to vector<16x64xf32>
    %93 = arith.negf %92 : vector<16x64xf32>
    %94 = math.exp %93 : vector<16x64xf32>
    %cst_31 = arith.constant 1.000000e+00 : f32
    %95 = vector.broadcast %cst_31 : f32 to vector<16x64xf32>
    %96 = arith.addf %95, %94 : vector<16x64xf32>
    %97 = arith.divf %95, %96 : vector<16x64xf32>
    %98 = vector.extract_strided_slice %97 {offsets = [0, 0], sizes = [16, 32], strides = [1, 1]} : vector<16x64xf32> to vector<16x32xf32>
    %99 = vector.extract_strided_slice %97 {offsets = [0, 32], sizes = [16, 32], strides = [1, 1]} : vector<16x64xf32> to vector<16x32xf32>
    %100 = vector.extract_strided_slice %91 {offsets = [0, 64], sizes = [16, 32], strides = [1, 1]} : vector<16x128xf32> to vector<16x32xf32>
    %101 = arith.mulf %1, %99 : vector<16x32xf32>
    %c40_32 = arith.constant 40 : index
    %c0_33 = arith.constant 0 : index
    %102 = vector.load %arg4[%c40_32, %c0_33] : memref<104x128xf32, #tpu.memory_space<vmem>>, vector<32x32xf32>
    %cst_34 = arith.constant dense<0.000000e+00> : vector<16x32xf32>
    %103 = tpu.matmul %101, %102, %cst_34 {dimension_numbers = #tpu.dot_dimension_numbers<[1], [0], [0], [1], [0, 0, 1, 1], [], []>, precision = #tpu.contract_precision<fp32>} : vector<16x32xf32>, vector<32x32xf32>, vector<16x32xf32> -> vector<16x32xf32>
    %104 = arith.addf %100, %103 : vector<16x32xf32>
    %105 = math.tanh %104 : vector<16x32xf32>
    %106 = arith.mulf %98, %1 : vector<16x32xf32>
    %cst_35 = arith.constant 1.000000e+00 : f32
    %107 = vector.broadcast %cst_35 : f32 to vector<16x32xf32>
    %108 = arith.subf %107, %98 : vector<16x32xf32>
    %109 = arith.mulf %108, %105 : vector<16x32xf32>
    %110 = arith.addf %106, %109 : vector<16x32xf32>
    %c3 = arith.constant 3 : index
    %111 = memref.load %arg0[%c3] : memref<7xf32, #tpu.memory_space<smem>>
    %112 = vector.broadcast %111 : f32 to vector<16x32xf32>
    %113 = arith.mulf %112, %110 : vector<16x32xf32>
    %114 = arith.addf %88, %113 : vector<16x32xf32>
    %115 = vector.extract_strided_slice %9 {offsets = [64, 0], sizes = [16, 128], strides = [1, 1]} : vector<112x128xf32> to vector<16x128xf32>
    %cst_36 = arith.constant dense<0.000000e+00> : vector<16x128xf32>
    %116 = tpu.matmul %0, %115, %cst_36 {dimension_numbers = #tpu.dot_dimension_numbers<[1], [0], [0], [1], [0, 0, 1, 1], [], []>, precision = #tpu.contract_precision<fp32>} : vector<16x16xf32>, vector<16x128xf32>, vector<16x128xf32> -> vector<16x128xf32>
    %117 = arith.addf %116, %6 : vector<16x128xf32>
    %118 = vector.extract_strided_slice %117 {offsets = [0, 0], sizes = [16, 64], strides = [1, 1]} : vector<16x128xf32> to vector<16x64xf32>
    %119 = arith.negf %118 : vector<16x64xf32>
    %120 = math.exp %119 : vector<16x64xf32>
    %cst_37 = arith.constant 1.000000e+00 : f32
    %121 = vector.broadcast %cst_37 : f32 to vector<16x64xf32>
    %122 = arith.addf %121, %120 : vector<16x64xf32>
    %123 = arith.divf %121, %122 : vector<16x64xf32>
    %124 = vector.extract_strided_slice %123 {offsets = [0, 0], sizes = [16, 32], strides = [1, 1]} : vector<16x64xf32> to vector<16x32xf32>
    %125 = vector.extract_strided_slice %123 {offsets = [0, 32], sizes = [16, 32], strides = [1, 1]} : vector<16x64xf32> to vector<16x32xf32>
    %126 = vector.extract_strided_slice %117 {offsets = [0, 64], sizes = [16, 32], strides = [1, 1]} : vector<16x128xf32> to vector<16x32xf32>
    %127 = arith.mulf %1, %125 : vector<16x32xf32>
    %c40_38 = arith.constant 40 : index
    %c0_39 = arith.constant 0 : index
    %128 = vector.load %arg4[%c40_38, %c0_39] : memref<104x128xf32, #tpu.memory_space<vmem>>, vector<32x32xf32>
    %cst_40 = arith.constant dense<0.000000e+00> : vector<16x32xf32>
    %129 = tpu.matmul %127, %128, %cst_40 {dimension_numbers = #tpu.dot_dimension_numbers<[1], [0], [0], [1], [0, 0, 1, 1], [], []>, precision = #tpu.contract_precision<fp32>} : vector<16x32xf32>, vector<32x32xf32>, vector<16x32xf32> -> vector<16x32xf32>
    %130 = arith.addf %126, %129 : vector<16x32xf32>
    %131 = math.tanh %130 : vector<16x32xf32>
    %132 = arith.mulf %124, %1 : vector<16x32xf32>
    %cst_41 = arith.constant 1.000000e+00 : f32
    %133 = vector.broadcast %cst_41 : f32 to vector<16x32xf32>
    %134 = arith.subf %133, %124 : vector<16x32xf32>
    %135 = arith.mulf %134, %131 : vector<16x32xf32>
    %136 = arith.addf %132, %135 : vector<16x32xf32>
    %c4 = arith.constant 4 : index
    %137 = memref.load %arg0[%c4] : memref<7xf32, #tpu.memory_space<smem>>
    %138 = vector.broadcast %137 : f32 to vector<16x32xf32>
    %139 = arith.mulf %138, %136 : vector<16x32xf32>
    %140 = arith.addf %114, %139 : vector<16x32xf32>
    %141 = vector.extract_strided_slice %9 {offsets = [80, 0], sizes = [16, 128], strides = [1, 1]} : vector<112x128xf32> to vector<16x128xf32>
    %cst_42 = arith.constant dense<0.000000e+00> : vector<16x128xf32>
    %142 = tpu.matmul %0, %141, %cst_42 {dimension_numbers = #tpu.dot_dimension_numbers<[1], [0], [0], [1], [0, 0, 1, 1], [], []>, precision = #tpu.contract_precision<fp32>} : vector<16x16xf32>, vector<16x128xf32>, vector<16x128xf32> -> vector<16x128xf32>
    %143 = arith.addf %142, %6 : vector<16x128xf32>
    %144 = vector.extract_strided_slice %143 {offsets = [0, 0], sizes = [16, 64], strides = [1, 1]} : vector<16x128xf32> to vector<16x64xf32>
    %145 = arith.negf %144 : vector<16x64xf32>
    %146 = math.exp %145 : vector<16x64xf32>
    %cst_43 = arith.constant 1.000000e+00 : f32
    %147 = vector.broadcast %cst_43 : f32 to vector<16x64xf32>
    %148 = arith.addf %147, %146 : vector<16x64xf32>
    %149 = arith.divf %147, %148 : vector<16x64xf32>
    %150 = vector.extract_strided_slice %149 {offsets = [0, 0], sizes = [16, 32], strides = [1, 1]} : vector<16x64xf32> to vector<16x32xf32>
    %151 = vector.extract_strided_slice %149 {offsets = [0, 32], sizes = [16, 32], strides = [1, 1]} : vector<16x64xf32> to vector<16x32xf32>
    %152 = vector.extract_strided_slice %143 {offsets = [0, 64], sizes = [16, 32], strides = [1, 1]} : vector<16x128xf32> to vector<16x32xf32>
    %153 = arith.mulf %1, %151 : vector<16x32xf32>
    %c40_44 = arith.constant 40 : index
    %c0_45 = arith.constant 0 : index
    %154 = vector.load %arg4[%c40_44, %c0_45] : memref<104x128xf32, #tpu.memory_space<vmem>>, vector<32x32xf32>
    %cst_46 = arith.constant dense<0.000000e+00> : vector<16x32xf32>
    %155 = tpu.matmul %153, %154, %cst_46 {dimension_numbers = #tpu.dot_dimension_numbers<[1], [0], [0], [1], [0, 0, 1, 1], [], []>, precision = #tpu.contract_precision<fp32>} : vector<16x32xf32>, vector<32x32xf32>, vector<16x32xf32> -> vector<16x32xf32>
    %156 = arith.addf %152, %155 : vector<16x32xf32>
    %157 = math.tanh %156 : vector<16x32xf32>
    %158 = arith.mulf %150, %1 : vector<16x32xf32>
    %cst_47 = arith.constant 1.000000e+00 : f32
    %159 = vector.broadcast %cst_47 : f32 to vector<16x32xf32>
    %160 = arith.subf %159, %150 : vector<16x32xf32>
    %161 = arith.mulf %160, %157 : vector<16x32xf32>
    %162 = arith.addf %158, %161 : vector<16x32xf32>
    %c5 = arith.constant 5 : index
    %163 = memref.load %arg0[%c5] : memref<7xf32, #tpu.memory_space<smem>>
    %164 = vector.broadcast %163 : f32 to vector<16x32xf32>
    %165 = arith.mulf %164, %162 : vector<16x32xf32>
    %166 = arith.addf %140, %165 : vector<16x32xf32>
    %167 = vector.extract_strided_slice %9 {offsets = [96, 0], sizes = [16, 128], strides = [1, 1]} : vector<112x128xf32> to vector<16x128xf32>
    %cst_48 = arith.constant dense<0.000000e+00> : vector<16x128xf32>
    %168 = tpu.matmul %0, %167, %cst_48 {dimension_numbers = #tpu.dot_dimension_numbers<[1], [0], [0], [1], [0, 0, 1, 1], [], []>, precision = #tpu.contract_precision<fp32>} : vector<16x16xf32>, vector<16x128xf32>, vector<16x128xf32> -> vector<16x128xf32>
    %169 = arith.addf %168, %6 : vector<16x128xf32>
    %170 = vector.extract_strided_slice %169 {offsets = [0, 0], sizes = [16, 64], strides = [1, 1]} : vector<16x128xf32> to vector<16x64xf32>
    %171 = arith.negf %170 : vector<16x64xf32>
    %172 = math.exp %171 : vector<16x64xf32>
    %cst_49 = arith.constant 1.000000e+00 : f32
    %173 = vector.broadcast %cst_49 : f32 to vector<16x64xf32>
    %174 = arith.addf %173, %172 : vector<16x64xf32>
    %175 = arith.divf %173, %174 : vector<16x64xf32>
    %176 = vector.extract_strided_slice %175 {offsets = [0, 0], sizes = [16, 32], strides = [1, 1]} : vector<16x64xf32> to vector<16x32xf32>
    %177 = vector.extract_strided_slice %175 {offsets = [0, 32], sizes = [16, 32], strides = [1, 1]} : vector<16x64xf32> to vector<16x32xf32>
    %178 = vector.extract_strided_slice %169 {offsets = [0, 64], sizes = [16, 32], strides = [1, 1]} : vector<16x128xf32> to vector<16x32xf32>
    %179 = arith.mulf %1, %177 : vector<16x32xf32>
    %c40_50 = arith.constant 40 : index
    %c0_51 = arith.constant 0 : index
    %180 = vector.load %arg4[%c40_50, %c0_51] : memref<104x128xf32, #tpu.memory_space<vmem>>, vector<32x32xf32>
    %cst_52 = arith.constant dense<0.000000e+00> : vector<16x32xf32>
    %181 = tpu.matmul %179, %180, %cst_52 {dimension_numbers = #tpu.dot_dimension_numbers<[1], [0], [0], [1], [0, 0, 1, 1], [], []>, precision = #tpu.contract_precision<fp32>} : vector<16x32xf32>, vector<32x32xf32>, vector<16x32xf32> -> vector<16x32xf32>
    %182 = arith.addf %178, %181 : vector<16x32xf32>
    %183 = math.tanh %182 : vector<16x32xf32>
    %184 = arith.mulf %176, %1 : vector<16x32xf32>
    %cst_53 = arith.constant 1.000000e+00 : f32
    %185 = vector.broadcast %cst_53 : f32 to vector<16x32xf32>
    %186 = arith.subf %185, %176 : vector<16x32xf32>
    %187 = arith.mulf %186, %183 : vector<16x32xf32>
    %188 = arith.addf %184, %187 : vector<16x32xf32>
    %c6 = arith.constant 6 : index
    %189 = memref.load %arg0[%c6] : memref<7xf32, #tpu.memory_space<smem>>
    %190 = vector.broadcast %189 : f32 to vector<16x32xf32>
    %191 = arith.mulf %190, %188 : vector<16x32xf32>
    %192 = arith.addf %166, %191 : vector<16x32xf32>
    %cst_54 = arith.constant 0.000000e+00 : f32
    %193 = vector.broadcast %cst_54 : f32 to vector<16x32xf32>
    %194 = arith.maximumf %192, %193 : vector<16x32xf32>
    %c72 = arith.constant 72 : index
    %c0_55 = arith.constant 0 : index
    %195 = vector.load %arg4[%c72, %c0_55] : memref<104x128xf32, #tpu.memory_space<vmem>>, vector<32x128xf32>
    %cst_56 = arith.constant dense<0.000000e+00> : vector<16x128xf32>
    %196 = tpu.matmul %194, %195, %cst_56 {dimension_numbers = #tpu.dot_dimension_numbers<[1], [0], [0], [1], [0, 0, 1, 1], [], []>, precision = #tpu.contract_precision<fp32>} : vector<16x32xf32>, vector<32x128xf32>, vector<16x128xf32> -> vector<16x128xf32>
    %c1_57 = arith.constant 1 : index
    %c0_58 = arith.constant 0 : index
    %197 = vector.load %arg5[%c1_57, %c0_58] : memref<2x128xf32, #tpu.memory_space<vmem>>, vector<1x128xf32>
    %198 = vector.broadcast %197 : vector<1x128xf32> to vector<16x128xf32>
    %199 = arith.addf %196, %198 : vector<16x128xf32>
    %c0_59 = arith.constant 0 : index
    %c0_60 = arith.constant 0 : index
    %200 = vector.load %arg6[%c0_59, %c0_60] : memref<16x128xf32, #tpu.memory_space<vmem>>, vector<16x128xf32>
    tpu.vector_store %arg6[%c0_59, %c0_60], %199 {strides = array<i32>} : memref<16x128xf32, #tpu.memory_space<vmem>>, vector<16x128xf32>,
    %c0_61 = arith.constant 0 : index
    %c0_62 = arith.constant 0 : index
    %201 = vector.load %arg6[%c0_61, %c0_62] : memref<16x128xf32, #tpu.memory_space<vmem>>, vector<16x32xf32>
    tpu.vector_store %arg6[%c0_61, %c0_62], %192 {strides = array<i32>} : memref<16x128xf32, #tpu.memory_space<vmem>>, vector<16x32xf32>,
    return
  }
}

</mosaic_0001>

<bundles_post_ra>
// kernel: tpu_custom_call.1
= control target key start
LH: loop header
LB: loop body
LE: loop exit
PB: predicated region body
PF: predicated region fallthrough
CT: control target
= control target key end

     0   :  { %11 = vsyncpa [#allocation5], 0  ;;  %s6208_s0 = inlined_call_operand.vmem [shape: f32[7], index: 0, kind: input, shape index: {}]   ;;  %s6209_s1 = inlined_call_operand.vmem [shape: f32[16,16], index: 1, kind: input, shape index: {}]   ;;  %s6210_s2 = inlined_call_operand.vmem [shape: f32[112,8], index: 2, kind: input, shape index: {}]   ;;  %s6211_s3 = inlined_call_operand.hbm [shape: f32[16,32], index: 3, kind: input, shape index: {}]   ;;  %s6212_s4 = inlined_call_operand.vmem [shape: f32[104,128], index: 4, kind: input, shape index: {}]   ;;  %s6213_s5 = inlined_call_operand.vmem [shape: f32[2,128], index: 5, kind: input, shape index: {}]   ;;  %s6214_s6 = inlined_call_operand.hbm [shape: f32[16,128], index: 6, kind: output, shape index: {}]  }
   0x1   :  { %12 = vsyncpa [#allocation3], 0 }
   0x2   :  { %13 = vsyncpa [#allocation4], 0  ;;  %s19_s23 = sshll.u32 %s6208_s0, 4  ;;  %s31_s26 = sshll.u32 %s6211_s3, 4  ;;  %s20_s23 = int_to_ptr.vmem [resolvable:$true] %s19_s23  ;;  %s32_s26 = int_to_ptr.hbm [resolvable:$true] %s31_s26 }
   0x3   :  { %s4809_s27 = smov [#allocation2]   ;;  %s4810_s28 = smov [#allocation6]  }
   0x4   :  { %22 = dma.vmem_to_smem %s20_s23, 16, %s4809_s27, [#allocation5]  }
   0x5   :  { %s33_s29 = sshll.u32 %s4810_s28, 4  ;;  %s4811_s30 = smov 128   ;;  %s34_s29 = int_to_ptr.vmem [resolvable:$true] %s33_s29 }
   0x6   :  { %s4812_s7 = smov 8  }
   0x7   :  { %39 = dma.hbm_to_vmem [thread:$0]  %s32_s26, 256, %s34_s29, [#allocation3], %s4811_s30, %s4811_s30, %s4812_s7  }
   0x8   :  { %4803 = dma.done.wait [#allocation5], 16  }
   0x9   :  { %4804 = vsyncadd [#allocation5], 4294967280 }
   0xa   :  { %4805 = dma.done.wait [#allocation3], 256  }
   0xb   :  { %4806 = vsyncadd [#allocation3], 4294967040 }
   0xc   :  { %52 = sfence }
   0xd   :  { %v60_v0 = vld [vmem:[%s6212_s4 + $0x20] sm:$0xff]  ;;  %v59_v1 = vld [vmem:[%s6212_s4 + $0x18] sm:$0xff]  ;;  %v58_v2 = vld [vmem:[%s6212_s4 + $0x10] sm:$0xff]  ;;  %vm63_vm0 = vcmask 261120   ;;  %vm301_vm1 = vcmask 64512   ;;  %vm893_vm2 = vcmask 130048  }
   0xe   :  { %v4869_v3 = vand.u32 4294901760, %v60_v0  ;;  %v4871_v4 = vand.u32 4294901760, %v59_v1  ;;  %v4873_v5 = vand.u32 4294901760, %v58_v2  ;;  %v57_v6 = vld [vmem:[%s6212_s4 + $0x8] sm:$0xff]  ;;  %v55_v8 = vld [vmem:[#allocation6] sm:$0xff]  ;;  %v288_v52 = vld [vmem:[%s6210_s2 + $0x10] sm:$0xff] }
   0xf   :  { %v56_v7 = vld [vmem:[#allocation6 + $0x8] sm:$0xff]  ;;  %v4878_v9 = vand.u32 4294901760, %v57_v6  ;;  %v65_v11 = vsel %vm63_vm0, %v55_v8, 0  ;;  %v300_v16 = vld [vmem:[%s6212_s4] sm:$0xff]  ;;  %v309_v55 = vsel %vm301_vm1, %v288_v52, 0  ;;  %v289_v59 = vld [vmem:[%s6210_s2 + $0x18] sm:$0xff] }
  0x10   :  { %v68_v10 = vsel %vm63_vm0, %v56_v7, 0  ;;  %4636 = vmatpush.msra.mxu2 %v4869_v3  ;;  %v120_v12 = vsub.f32 %v60_v0, %v4869_v3  ;;  %v126_v14 = vsub.f32 %v59_v1, %v4871_v4  ;;  %v132_v15 = vsub.f32 %v58_v2, %v4873_v5  ;;  %83 = vmatpush.msra.mxu0 %v4869_v3  ;;  %v286_v39 = vld [vmem:[%s6210_s2] sm:$0xff]  ;;  %v287_v46 = vld [vmem:[%s6210_s2 + $0x8] sm:$0xff]  ;;  %s4813_s26 = smov 96   ;;  %s4814_s9 = smov 64  }
  0x11   :  { %v4884_v13 = vand.u32 4294901760, %v68_v10  ;;  %v138_v17 = vsub.f32 %v57_v6, %v4878_v9  ;;  %v4893_v18 = vand.u32 4294901760, %v65_v11  ;;  %v4903_v25 = vand.u32 4294901760, %v300_v16  ;;  %v290_v2 = vld [vmem:[%s6210_s2 + $0x20] sm:$0xff]  ;;  %s6109_s10 = sld [smem:[#allocation2]]  ;;  %s4602_s27 = sshll.u32 %s6214_s6, 4  ;;  %s4603_s27 = int_to_ptr.hbm [resolvable:$true] %s4602_s27 }
  0x12   :  { %4637 = vmatpush.msra.mxu2 %v4871_v4  ;;  %v121_v19 = vand.u32 4294901760, %v120_v12  ;;  %v127_v21 = vand.u32 4294901760, %v126_v14  ;;  %v133_v22 = vand.u32 4294901760, %v132_v15  ;;  %85 = vmatpush.msra.mxu0 %v4871_v4  ;;  %v303_v42 = vsel %vm301_vm1, %v286_v39, 0  ;;  %s6113_s11 = sld [smem:[#allocation2 + $0x1]] }
  0x13   :  { %v4897_v20 = vsub.f32 %v68_v10, %v4884_v13  ;;  %v139_v23 = vand.u32 4294901760, %v138_v17  ;;  %v4901_v24 = vsub.f32 %v65_v11, %v4893_v18  ;;  %v490_v38 = vsub.f32 %v300_v16, %v4903_v25  ;;  %v292_v16 = vld [vmem:[%s6210_s2 + $0x30] sm:$0xff]  ;;  %s6124_s12 = sld [smem:[#allocation2 + $0x2]] }
  0x14   :  { %4638 = vmatpush.msra.mxu2 %v4873_v5  ;;  %v122_v26 = vsub.f32 %v120_v12, %v121_v19  ;;  %v128_v28 = vsub.f32 %v126_v14, %v127_v21  ;;  %v134_v29 = vsub.f32 %v132_v15, %v133_v22  ;;  %87 = vmatpush.msra.mxu0 %v4873_v5  ;;  %v4920_v44 = vand.u32 4294901760, %v303_v42  ;;  %s6126_s13 = sld [smem:[#allocation2 + $0x3]] }
  0x15   :  { %v100_v27 = vand.u32 4294901760, %v4897_v20  ;;  %v92_v30 = vand.u32 4294901760, %v4901_v24  ;;  %v140_v34 = vsub.f32 %v138_v17, %v139_v23  ;;  %v491_v43 = vand.u32 4294901760, %v490_v38  ;;  %s6129_s14 = sld [smem:[#allocation2 + $0x4]] }
  0x16   :  { %4639 = vmatpush.msra.mxu2 %v4878_v9  ;;  %v123_v31 = vand.u32 4294901760, %v122_v26  ;;  %v129_v33 = vand.u32 4294901760, %v128_v28  ;;  %89 = vmatpush.msra.mxu0 %v4878_v9  ;;  %v135_v37 = vand.u32 4294901760, %v134_v29  ;;  %v362_v47 = vsub.f32 %v303_v42, %v4920_v44  ;;  %s6135_s15 = sld [smem:[#allocation2 + $0x5]] }
  0x17   :  { %v101_v32 = vsub.f32 %v4897_v20, %v100_v27  ;;  %v93_v35 = vsub.f32 %v4901_v24, %v92_v30  ;;  %v141_v41 = vand.u32 4294901760, %v140_v34  ;;  %v492_v45 = vsub.f32 %v490_v38, %v491_v43 }
  0x18   :  { %166 = vmatpush.msrb.mxu2 %v120_v12  ;;  %235 = vmatpush.msrb.mxu0 %v121_v19  ;;  %v306_v48 = vsel %vm301_vm1, %v287_v46, 0  ;;  %v363_v50 = vand.u32 4294901760, %v362_v47  ;;  %v4952_v58 = vand.u32 4294901760, %v309_v55  ;;  %v312_v62 = vsel %vm301_vm1, %v289_v59, 0 }
  0x19   :  { %4640 = vmatpush.msra.mxu3 %v123_v31  ;;  %v102_v36 = vand.u32 4294901760, %v101_v32  ;;  %124 = vmatpush.msra.mxu1 %v123_v31  ;;  %v94_v40 = vand.u32 4294901760, %v93_v35  ;;  %v493_v49 = vand.u32 4294901760, %v492_v45  ;;  %v4939_v51 = vand.u32 4294901760, %v306_v48  ;;  %v296_v45 = vld [vmem:[%s6210_s2 + $0x50] sm:$0xff] }
  0x1a   :  { %169 = vmatpush.msrb.mxu2 %v126_v14  ;;  %239 = vmatpush.msrb.mxu0 %v127_v21  ;;  %v364_v53 = vsub.f32 %v362_v47, %v363_v50  ;;  %v378_v61 = vsub.f32 %v309_v55, %v4952_v58  ;;  %v4962_v1 = vand.u32 4294901760, %v312_v62  ;;  %v321_v19 = vsel %vm301_vm1, %v292_v16, 0 }
  0x1b   :  { %103 = vmatmul.f32.vlgmr.msra.gmra.mxu2 %v102_v36  ;;  %4641 = vmatpush.msra.mxu3 %v129_v33  ;;  %v370_v54 = vsub.f32 %v306_v48, %v4939_v51  ;;  %v333_v48 = vsel %vm301_vm1, %v296_v45, 0 }
  0x1c   :  { %172 = vmatpush.msrb.mxu2 %v132_v15  ;;  %130 = vmatpush.msra.mxu1 %v129_v33  ;;  %v365_v56 = vand.u32 4294901760, %v364_v53  ;;  %v379_v0 = vand.u32 4294901760, %v378_v61  ;;  %v5018_v52 = vand.u32 4294901760, %v333_v48  ;;  %v297_v53 = vld [vmem:[%s6210_s2 + $0x58] sm:$0xff] }
  0x1d   :  { %4642 = vmatpush.msra.mxu3 %v135_v37  ;;  %95 = vmatmul.f32.vlgmr.msra.gmra.mxu0 %v94_v40  ;;  %v371_v57 = vand.u32 4294901760, %v370_v54 }
  0x1e   :  { %175 = vmatpush.msrb.mxu2 %v138_v17  ;;  %136 = vmatpush.msra.mxu1 %v135_v37  ;;  %v295_v37 = vld [vmem:[%s6210_s2 + $0x48] sm:$0xff]  ;;  %v442_v55 = vsub.f32 %v333_v48, %v5018_v52 }
  0x1f   :  { %4643 = vmatpush.msra.mxu3 %v141_v41  ;;  %243 = vmatpush.msrb.mxu0 %v133_v22  ;;  %v372_v60 = vsub.f32 %v370_v54, %v371_v57  ;;  %v4986_v22 = vand.u32 4294901760, %v321_v19  ;;  %v330_v40 = vsel %vm301_vm1, %v295_v37, 0 }
  0x20   :  { %148 = vmatmul.f32.vlgmr.msra.gmra.mxu3 %v4884_v13  ;;  %142 = vmatpush.msra.mxu1 %v141_v41  ;;  %v443_v59 = vand.u32 4294901760, %v442_v55 }
  0x21   :  { %200 = vmatpush.msrb.mxu3 %v4869_v3  ;;  %144 = vmatmul.f32.vlgmr.msra.gmra.mxu1 %v4893_v18  ;;  %v373_v63 = vand.u32 4294901760, %v372_v60 }
  0x22   :  { %270 = vmatpush.msrb.mxu1 %v4869_v3  ;;  %247 = vmatpush.msrb.mxu0 %v139_v23  ;;  %v380_v3 = vsub.f32 %v378_v61, %v379_v0  ;;  %v293_v23 = vld [vmem:[%s6210_s2 + $0x38] sm:$0xff] }
  0x23   :  { %178 = vmatmul.f32.vlgmr.msrb.gmra.mxu2 %v4901_v24  ;;  %202 = vmatpush.msrb.mxu3 %v4871_v4  ;;  %v324_v26 = vsel %vm301_vm1, %v293_v23, 0 }
  0x24   :  { %272 = vmatpush.msrb.mxu1 %v4871_v4  ;;  %360 = vmatpush.msra.mxu2 %v4903_v25  ;;  %v386_v4 = vsub.f32 %v312_v62, %v4962_v1  ;;  %v381_v6 = vand.u32 4294901760, %v380_v3  ;;  %v4994_v29 = vand.u32 4294901760, %v324_v26  ;;  %v444_v62 = vsub.f32 %v442_v55, %v443_v59 }
  0x25   :  { %204 = vmatpush.msrb.mxu3 %v4873_v5  ;;  %249 = vmatmul.f32.vlgmr.msrb.gmra.mxu0 %v4893_v18 }
  0x26   :  { %274 = vmatpush.msrb.mxu1 %v4873_v5  ;;  %569 = vmatpush.msra.mxu0 %v490_v38  ;;  %v315_v5 = vsel %vm301_vm1, %v290_v2, 0  ;;  %v387_v7 = vand.u32 4294901760, %v386_v4  ;;  %v418_v32 = vsub.f32 %v324_v26, %v4994_v29  ;;  %v445_v2 = vand.u32 4294901760, %v444_v62 }
  0x27   :  { %206 = vmatpush.msrb.mxu3 %v4878_v9  ;;  %761 = vmatpush.msrb.mxu2 %v491_v43  ;;  %v4970_v8 = vand.u32 4294901760, %v315_v5  ;;  %v5010_v43 = vand.u32 4294901760, %v330_v40 }
  0x28   :  { %210 = vmatmul.f32.vlgmr.msrb.gmra.mxu3 %v92_v30  ;;  %276 = vmatpush.msrb.mxu1 %v4878_v9  ;;  %v291_v9 = vld [vmem:[%s6210_s2 + $0x28] sm:$0xff]  ;;  %v388_v10 = vsub.f32 %v386_v4, %v387_v7  ;;  %v294_v30 = vld [vmem:[%s6210_s2 + $0x40] sm:$0xff]  ;;  %v419_v35 = vand.u32 4294901760, %v418_v32 }
  0x29   :  { %278 = vmatmul.f32.vlgmr.msrb.gmra.mxu1 %v4893_v18  ;;  %494 = vmatpush.msra.mxu3 %v493_v49  ;;  %v394_v11 = vsub.f32 %v315_v5, %v4970_v8  ;;  %v318_v12 = vsel %vm301_vm1, %v291_v9, 0  ;;  %v327_v33 = vsel %vm301_vm1, %v294_v30, 0  ;;  %v299_v5 = vld [vmem:[%s6210_s2 + $0x68] sm:$0xff] }
  0x2a   :  { %657 = vmatpush.msra.mxu1 %v4903_v25  ;;  %v4978_v15 = vand.u32 4294901760, %v318_v12  ;;  %v5002_v36 = vand.u32 4294901760, %v327_v33  ;;  %v420_v38 = vsub.f32 %v418_v32, %v419_v35  ;;  %v342_v9 = vsel %vm301_vm1, %v299_v5, 0 }
  0x2b   :  { %835 = vmatpush.msrb.mxu3 %v4903_v25  ;;  %183 = vmatmul.f32.gmra.mxu2 %v4897_v20  ;;  %v395_v14 = vand.u32 4294901760, %v394_v11  ;;  %v410_v25 = vsub.f32 %v321_v19, %v4986_v22 }
  0x2c   :  { %v402_v18 = vsub.f32 %v318_v12, %v4978_v15  ;;  %v426_v39 = vsub.f32 %v327_v33, %v5002_v36  ;;  %v421_v41 = vand.u32 4294901760, %v420_v38  ;;  %v5042_v12 = vand.u32 4294901760, %v342_v9 }
  0x2d   :  { %253 = vmatmul.f32.gmra.mxu0 %v4884_v13  ;;  %v396_v17 = vsub.f32 %v394_v11, %v395_v14  ;;  %v411_v28 = vand.u32 4294901760, %v410_v25 }
  0x2e   :  { %v403_v21 = vand.u32 4294901760, %v402_v18  ;;  %v427_v42 = vand.u32 4294901760, %v426_v39 }
  0x2f   :  { %v397_v20 = vand.u32 4294901760, %v396_v17  ;;  %v412_v31 = vsub.f32 %v410_v25, %v411_v28 }
  0x30   :  { %216 = vmatmul.f32.gmra.mxu3 %v100_v27  ;;  %v404_v24 = vsub.f32 %v402_v18, %v403_v21  ;;  %v428_v46 = vsub.f32 %v426_v39, %v427_v42 }
  0x31   :  { %282 = vmatmul.f32.gmra.mxu1 %v4884_v13  ;;  %v389_v13 = vand.u32 4294901760, %v388_v10  ;;  %v413_v34 = vand.u32 4294901760, %v412_v31 }
  0x32   :  { %v405_v27 = vand.u32 4294901760, %v404_v24  ;;  %v429_v49 = vand.u32 4294901760, %v428_v46 }
  0x33   :  { %366 = vmatmul.f32.vlgmr.msra.gmra.mxu2 %v365_v56  ;;  %v336_v56 = vsel %vm301_vm1, %v297_v53, 0 }
  0x34   :  { %v5026_v60 = vand.u32 4294901760, %v336_v56 }
  0x35   :  { %572 = vmatmul.f32.vlgmr.msra.gmra.mxu0 %v362_v47  ;;  %v434_v47 = vsub.f32 %v330_v40, %v5010_v43 }
  0x38   :  { %496 = vmatmul.f32.vlgmr.msra.gmra.mxu3 %v4920_v44 }
  0x39   :  { %661 = vmatmul.f32.vlgmr.msra.gmra.mxu1 %v363_v50  ;;  %v435_v50 = vand.u32 4294901760, %v434_v47 }
  0x3b   :  { %374 = vmatmul.f32.gmra.mxu2 %v373_v63  ;;  %v450_v63 = vsub.f32 %v336_v56, %v5026_v60 }
  0x3d   :  { %577 = vmatmul.f32.gmra.mxu0 %v370_v54  ;;  %v436_v54 = vsub.f32 %v434_v47, %v435_v50  ;;  %v451_v3 = vand.u32 4294901760, %v450_v63 }
  0x40   :  { %500 = vmatmul.f32.gmra.mxu3 %v4939_v51 }
  0x41   :  { %667 = vmatmul.f32.gmra.mxu1 %v371_v57  ;;  %v437_v57 = vand.u32 4294901760, %v436_v54 }
  0x43   :  { %382 = vmatmul.f32.gmra.mxu2 %v381_v6  ;;  %v452_v6 = vsub.f32 %v450_v63, %v451_v3 }
  0x45   :  { %582 = vmatmul.f32.gmra.mxu0 %v378_v61  ;;  %v298_v61 = vld [vmem:[%s6210_s2 + $0x60] sm:$0xff]  ;;  %v453_v10 = vand.u32 4294901760, %v452_v6 }
  0x48   :  { %504 = vmatmul.f32.gmra.mxu3 %v4952_v58 }
  0x49   :  { %673 = vmatmul.f32.gmra.mxu1 %v379_v0  ;;  %v339_v0 = vsel %vm301_vm1, %v298_v61, 0 }
  0x4b   :  { %390 = vmatmul.f32.gmra.mxu2 %v389_v13 }
  0x4d   :  { %587 = vmatmul.f32.gmra.mxu0 %v386_v4  ;;  %v5034_v4 = vand.u32 4294901760, %v339_v0 }
  0x50   :  { %508 = vmatmul.f32.gmra.mxu3 %v4962_v1 }
  0x51   :  { %679 = vmatmul.f32.gmra.mxu1 %v387_v7  ;;  %v458_v7 = vsub.f32 %v339_v0, %v5034_v4 }
  0x53   :  { %398 = vmatmul.f32.gmra.mxu2 %v397_v20  ;;  %v4651_v20 = vld [vmem:[%s6213_s5] ss:$0 sm:$0xff] }
  0x55   :  { %592 = vmatmul.f32.gmra.mxu0 %v394_v11  ;;  %v459_v11 = vand.u32 4294901760, %v458_v7 }
  0x57   :  { %v460_v13 = vsub.f32 %v458_v7, %v459_v11 }
  0x58   :  { %512 = vmatmul.f32.gmra.mxu3 %v4970_v8 }
  0x59   :  { %685 = vmatmul.f32.gmra.mxu1 %v395_v14  ;;  %v466_v14 = vsub.f32 %v342_v9, %v5042_v12  ;;  %v461_v16 = vand.u32 4294901760, %v460_v13  ;;  %v53_v9 = vld [vmem:[%s6209_s1] sm:$0xff] }
  0x5b   :  { %406 = vmatmul.f32.gmra.mxu2 %v405_v27  ;;  %v467_v17 = vand.u32 4294901760, %v466_v14 }
  0x5d   :  { %597 = vmatmul.f32.gmra.mxu0 %v402_v18  ;;  %v468_v18 = vsub.f32 %v466_v14, %v467_v17 }
  0x5f   :  { %v469_v19 = vand.u32 4294901760, %v468_v18 }
  0x60   :  { %516 = vmatmul.f32.gmra.mxu3 %v4978_v15 }
  0x61   :  { %691 = vmatmul.f32.gmra.mxu1 %v403_v21 }
  0x63   :  { %414 = vmatmul.f32.gmra.mxu2 %v413_v34 }
  0x65   :  { %602 = vmatmul.f32.gmra.mxu0 %v410_v25 }
  0x68   :  { %520 = vmatmul.f32.gmra.mxu3 %v4986_v22 }
  0x69   :  { %697 = vmatmul.f32.gmra.mxu1 %v411_v28 }
  0x6b   :  { %422 = vmatmul.f32.gmra.mxu2 %v421_v41 }
  0x6d   :  { %607 = vmatmul.f32.gmra.mxu0 %v418_v32 }
  0x70   :  { %524 = vmatmul.f32.gmra.mxu3 %v4994_v29 }
  0x71   :  { %703 = vmatmul.f32.gmra.mxu1 %v419_v35 }
  0x73   :  { %430 = vmatmul.f32.gmra.mxu2 %v429_v49 }
  0x75   :  { %612 = vmatmul.f32.gmra.mxu0 %v426_v39 }
  0x78   :  { %528 = vmatmul.f32.gmra.mxu3 %v5002_v36 }
  0x79   :  { %709 = vmatmul.f32.gmra.mxu1 %v427_v42 }
  0x7b   :  { %438 = vmatmul.f32.gmra.mxu2 %v437_v57 }
  0x7d   :  { %617 = vmatmul.f32.gmra.mxu0 %v434_v47 }
  0x80   :  { %532 = vmatmul.f32.gmra.mxu3 %v5010_v43 }
  0x81   :  { %715 = vmatmul.f32.gmra.mxu1 %v435_v50 }
  0x83   :  { %446 = vmatmul.f32.gmra.mxu2 %v445_v2 }
  0x85   :  { %622 = vmatmul.f32.gmra.mxu0 %v442_v55 }
  0x88   :  { %536 = vmatmul.f32.gmra.mxu3 %v5018_v52 }
  0x89   :  { %721 = vmatmul.f32.gmra.mxu1 %v443_v59 }
  0x8b   :  { %454 = vmatmul.f32.gmra.mxu2 %v453_v10 }
  0x8d   :  { %627 = vmatmul.f32.gmra.mxu0 %v450_v63 }
  0x90   :  { %540 = vmatmul.f32.gmra.mxu3 %v5026_v60 }
  0x91   :  { %727 = vmatmul.f32.gmra.mxu1 %v451_v3 }
  0x93   :  { %462 = vmatmul.f32.gmra.mxu2 %v461_v16 }
  0x95   :  { %632 = vmatmul.f32.gmra.mxu0 %v458_v7 }
  0x98   :  { %544 = vmatmul.f32.gmra.mxu3 %v5034_v4 }
  0x99   :  { %733 = vmatmul.f32.gmra.mxu1 %v459_v11 }
  0x9a   :  { %v96_v21 = vpop.f32.mrf.mxu0 }
  0x9b   :  { %470 = vmatmul.f32.gmra.mxu2 %v469_v19  ;;  %v97_v25 = vadd.f32 %v4651_v20, %v96_v21  ;;  %v54_v19 = vld [vmem:[%s6209_s1 + $0x8] sm:$0xff] }
  0x9d   :  { %637 = vmatmul.f32.gmra.mxu0 %v466_v14 }
  0x9e   :  { %v104_v23 = vpop.f32.mrf.mxu2  ;;  %v145_v26 = vpop.f32.mrf.mxu1 }
  0x9f   :  { %v105_v24 = vadd.f32 %v4651_v20, %v104_v23  ;;  %v146_v30 = vadd.f32 %v145_v26, %v97_v25  ;;  %v898_v26 = vsel %vm893_vm2, %v54_v19, 0 }
  0xa0   :  { %548 = vmatmul.f32.gmra.mxu3 %v5042_v12 }
  0xa1   :  { %739 = vmatmul.f32.gmra.mxu1 %v467_v17 }
  0xa2   :  { %v5113_v61 = vpop.f32.mrf.mxu0 }
  0xa3   :  { %763 = vmatmul.f32.vlgmr.msrb.gmra.mxu2 %v4920_v44  ;;  %v149_v27 = vpop.f32.mrf.mxu3 }
  0xa4   :  { %v150_v28 = vadd.f32 %v149_v27, %v105_v24 }
  0xa6   :  { %v179_v31 = vpop.f32.mrf.mxu2  ;;  %v5116_v62 = vpop.f32.mrf.mxu1 }
  0xa7   :  { %v180_v32 = vadd.f32 %v179_v31, %v146_v30  ;;  %v5153_v31 = vand.u32 4294901760, %v898_v26 }
  0xa8   :  { %837 = vmatmul.f32.vlgmr.msrb.gmra.mxu3 %v4920_v44 }
  0xab   :  { %767 = vmatmul.f32.gmra.mxu2 %v4939_v51  ;;  %v211_v33 = vpop.f32.mrf.mxu3 }
  0xac   :  { %v5055_v34 = vadd.f32 %v211_v33, %v180_v32 }
  0xae   :  { %v184_v35 = vpop.f32.mrf.mxu2  ;;  %v5128_v2 = vpop.f32.mrf.mxu1 }
  0xaf   :  { %v185_v37 = vadd.f32 %v184_v35, %v150_v28 }
  0xb0   :  { %841 = vmatmul.f32.gmra.mxu3 %v4939_v51 }
  0xb3   :  { %771 = vmatmul.f32.gmra.mxu2 %v4952_v58  ;;  %v217_v38 = vpop.f32.mrf.mxu3 }
  0xb4   :  { %v5059_v39 = vadd.f32 %v217_v38, %v185_v37 }
  0xb6   :  { %v367_v40 = vpop.f32.mrf.mxu2  ;;  %v662_v7 = vpop.f32.mrf.mxu1 }
  0xb8   :  { %845 = vmatmul.f32.gmra.mxu3 %v4952_v58 }
  0xbb   :  { %775 = vmatmul.f32.gmra.mxu2 %v4962_v1  ;;  %v497_v44 = vpop.f32.mrf.mxu3 }
  0xbc   :  { %v498_v41 = vadd.f32 %v497_v44, %v367_v40  ;;  %v5158_v44 = vsub.f32 %v898_v26, %v5153_v31 }
  0xbe   :  { %v375_v42 = vpop.f32.mrf.mxu2  ;;  %v668_v18 = vpop.f32.mrf.mxu1 }
  0xc0   :  { %849 = vmatmul.f32.gmra.mxu3 %v4962_v1 }
  0xc3   :  { %779 = vmatmul.f32.gmra.mxu2 %v4970_v8  ;;  %v501_v45 = vpop.f32.mrf.mxu3 }
  0xc4   :  { %v5065_v46 = vadd.f32 %v501_v45, %v375_v42 }
  0xc6   :  { %v383_v51 = vpop.f32.mrf.mxu2  ;;  %v674_v37 = vpop.f32.mrf.mxu1 }
  0xc8   :  { %853 = vmatmul.f32.gmra.mxu3 %v4970_v8 }
  0xcb   :  { %783 = vmatmul.f32.gmra.mxu2 %v4978_v15  ;;  %v505_v47 = vpop.f32.mrf.mxu3 }
  0xcc   :  { %v5069_v48 = vadd.f32 %v505_v47, %v383_v51  ;;  %v5163_v47 = vand.u32 4294901760, %v5158_v44 }
  0xce   :  { %v391_v58 = vpop.f32.mrf.mxu2 }
  0xd0   :  { %857 = vmatmul.f32.gmra.mxu3 %v4978_v15 }
  0xd3   :  { %787 = vmatmul.f32.gmra.mxu2 %v4986_v22  ;;  %v509_v49 = vpop.f32.mrf.mxu3 }
  0xd4   :  { %v5073_v1 = vadd.f32 %v509_v49, %v391_v58 }
  0xd6   :  { %v5075_v50 = vpop.f32.mrf.mxu2 }
  0xd8   :  { %861 = vmatmul.f32.gmra.mxu3 %v4986_v22 }
  0xdb   :  { %791 = vmatmul.f32.gmra.mxu2 %v4994_v29  ;;  %v5079_v8 = vpop.f32.mrf.mxu3 }
  0xde   :  { %v5081_v53 = vpop.f32.mrf.mxu2 }
  0xe0   :  { %865 = vmatmul.f32.gmra.mxu3 %v4994_v29 }
  0xe3   :  { %795 = vmatmul.f32.gmra.mxu2 %v5002_v36  ;;  %v5085_v15 = vpop.f32.mrf.mxu3 }
  0xe6   :  { %v5087_v54 = vpop.f32.mrf.mxu2 }
  0xe8   :  { %869 = vmatmul.f32.gmra.mxu3 %v5002_v36 }
  0xeb   :  { %799 = vmatmul.f32.gmra.mxu2 %v5010_v43  ;;  %v5091_v55 = vpop.f32.mrf.mxu3 }
  0xee   :  { %v5093_v22 = vpop.f32.mrf.mxu2 }
  0xf0   :  { %873 = vmatmul.f32.gmra.mxu3 %v5010_v43 }
  0xf3   :  { %803 = vmatmul.f32.gmra.mxu2 %v5018_v52  ;;  %v5097_v56 = vpop.f32.mrf.mxu3 }
  0xf6   :  { %v5099_v29 = vpop.f32.mrf.mxu2 }
  0xf7   :  { %6257 = vst [vmem:[#allocation11_spill] sm:$0xff] %v5099_v29 }
  0xf8   :  { %877 = vmatmul.f32.gmra.mxu3 %v5018_v52 }
  0xfb   :  { %807 = vmatmul.f32.gmra.mxu2 %v5026_v60  ;;  %v5103_v57 = vpop.f32.mrf.mxu3 }
  0xfc   :  { %6258 = vst [vmem:[#allocation12_spill] sm:$0xff] %v5103_v57 }
  0xfe   :  { %v5105_v36 = vpop.f32.mrf.mxu2 }
  0xff   :  { %6259 = vst [vmem:[#allocation13_spill] sm:$0xff] %v5105_v36 }
 0x100   :  { %881 = vmatmul.f32.gmra.mxu3 %v5026_v60  ;;  %v5124_v60 = vpop.f32.mrf.mxu0 }
 0x103   :  { %811 = vmatmul.f32.gmra.mxu2 %v5034_v4  ;;  %v5109_v59 = vpop.f32.mrf.mxu3 }
 0x104   :  { %6260 = vst [vmem:[#allocation14_spill] sm:$0xff] %v5109_v59 }
 0x106   :  { %v5111_v43 = vpop.f32.mrf.mxu2 }
 0x107   :  { %6261 = vst [vmem:[#allocation15_spill] sm:$0xff] %v5111_v43 }
 0x108   :  { %885 = vmatmul.f32.gmra.mxu3 %v5034_v4  ;;  %v573_v5 = vpop.f32.mrf.mxu0 }
 0x109   :  { %v574_v11 = vadd.f32 %v573_v5, %v498_v41 }
 0x10b   :  { %815 = vmatmul.f32.gmra.mxu2 %v5042_v12  ;;  %v5119_v52 = vpop.f32.mrf.mxu3  ;;  %v663_v17 = vadd.f32 %v662_v7, %v574_v11 }
 0x10c   :  { %6262 = vst [vmem:[#allocation16_spill] sm:$0xff] %v5119_v52 }
 0x10e   :  { %v5121_v63 = vpop.f32.mrf.mxu2 }
 0x10f   :  { %6263 = vst [vmem:[#allocation17_spill] sm:$0xff] %v5121_v63 }
 0x110   :  { %889 = vmatmul.f32.gmra.mxu3 %v5042_v12  ;;  %v895_v12 = vsel %vm893_vm2, %v53_v9, 0  ;;  %v578_v13 = vpop.f32.mrf.mxu0 }
 0x111   :  { %v5141_v16 = vand.u32 4294901760, %v895_v12  ;;  %v579_v24 = vadd.f32 %v578_v13, %v5065_v46 }
 0x113   :  { %v5126_v0 = vpop.f32.mrf.mxu3  ;;  %v5147_v23 = vsub.f32 %v895_v12, %v5141_v16  ;;  %v669_v32 = vadd.f32 %v668_v18, %v579_v24  ;;  %v929_v12 = vsub.f32 %v5158_v44, %v5163_v47  ;;  %v680_v18 = vpop.f32.mrf.mxu1 }
 0x114   :  { %6264 = vst [vmem:[#allocation18_spill] sm:$0xff] %v5126_v0 }
 0x115   :  { %v5151_v30 = vand.u32 4294901760, %v5147_v23 }
 0x116   :  { %v5130_v3 = vpop.f32.mrf.mxu2 }
 0x117   :  { %6265 = vst [vmem:[#allocation19_spill] sm:$0xff] %v5130_v3  ;;  %v921_v40 = vsub.f32 %v5147_v23, %v5151_v30  ;;  %v251_v3 = vadd.f32 %v5113_v61, %v5055_v34 }
 0x118   :  { %v583_v28 = vpop.f32.mrf.mxu0 }
 0x119   :  { %v5160_v51 = vand.u32 4294901760, %v921_v40  ;;  %v584_v7 = vadd.f32 %v583_v28, %v5069_v48  ;;  %v5170_v48 = vand.u32 4294901760, %v929_v12 }
 0x11b   :  { %v5132_v4 = vpop.f32.mrf.mxu3  ;;  %v675_v19 = vadd.f32 %v674_v37, %v584_v7 }
 0x11c   :  { %6266 = vst [vmem:[#allocation20_spill] sm:$0xff] %v5132_v4 }
 0x11e   :  { %v5134_v6 = vpop.f32.mrf.mxu2 }
 0x11f   :  { %6267 = vst [vmem:[#allocation21_spill] sm:$0xff] %v5134_v6 }
 0x120   :  { %v588_v5 = vpop.f32.mrf.mxu0 }
 0x121   :  { %v589_v13 = vadd.f32 %v588_v5, %v5073_v1 }
 0x123   :  { %v5139_v10 = vpop.f32.mrf.mxu3  ;;  %v681_v24 = vadd.f32 %v680_v18, %v589_v13 }
 0x124   :  { %6268 = vst [vmem:[#allocation22_spill] sm:$0xff] %v5139_v10  ;;  %v5244_v10 = vadd.f32 %v5116_v62, %v251_v3 }
 0x126   :  { %v764_v14 = vpop.f32.mrf.mxu2  ;;  %6281 = vst [vmem:[#allocation35_spill] sm:$0xff] %v5244_v10 }
 0x127   :  { %v765_v20 = vadd.f32 %v764_v14, %v663_v17 }
 0x12b   :  { %v838_v21 = vpop.f32.mrf.mxu3 }
 0x12c   :  { %v839_v25 = vadd.f32 %v838_v21, %v765_v20 }
 0x12e   :  { %v768_v27 = vpop.f32.mrf.mxu2  ;;  %v916_v33 = vand.u32 4294901760, %v839_v25 }
 0x12f   :  { %v769_v35 = vadd.f32 %v768_v27, %v669_v32 }
 0x130   :  { %v956_v41 = vsub.f32 %v839_v25, %v916_v33 }
 0x132   :  { %v957_v49 = vand.u32 4294901760, %v956_v41 }
 0x133   :  { %v842_v38 = vpop.f32.mrf.mxu3 }
 0x134   :  { %v843_v42 = vadd.f32 %v842_v38, %v769_v35  ;;  %v958_v17 = vsub.f32 %v956_v41, %v957_v49 }
 0x136   :  { %v914_v45 = vand.u32 4294901760, %v843_v42  ;;  %v772_v46 = vpop.f32.mrf.mxu2  ;;  %v959_v26 = vand.u32 4294901760, %v958_v17 }
 0x137   :  { %v773_v25 = vadd.f32 %v772_v46, %v675_v19 }
 0x138   :  { %v950_v58 = vsub.f32 %v843_v42, %v914_v45  ;;  %915 = vmatpush.msrb.mxu0 %v914_v45 }
 0x13a   :  { %917 = vmatpush.msrb.mxu0 %v916_v33  ;;  %v951_v9 = vand.u32 4294901760, %v950_v58 }
 0x13b   :  { %v846_v11 = vpop.f32.mrf.mxu3  ;;  %923 = vmatmul.f32.vlgmr.msrb.gmra.mxu0 %v5160_v51 }
 0x13c   :  { %986 = vmatpush.msra.mxu0 %v950_v58  ;;  %v952_v14 = vsub.f32 %v950_v58, %v951_v9  ;;  %v847_v27 = vadd.f32 %v846_v11, %v773_v25 }
 0x13e   :  { %989 = vmatpush.msra.mxu0 %v956_v41  ;;  %v953_v20 = vand.u32 4294901760, %v952_v14  ;;  %v776_v21 = vpop.f32.mrf.mxu2  ;;  %v5174_v35 = vand.u32 4294901760, %v847_v27  ;;  %v5200_v41 = vpop.f32.mrf.mxu1 }
 0x13f   :  { %v777_v28 = vadd.f32 %v776_v21, %v681_v24 }
 0x140   :  { %1049 = vmatpush.msrb.mxu0 %v951_v9  ;;  %954 = vmatpush.msrb.mxu1 %v953_v20  ;;  %v5183_v40 = vsub.f32 %v847_v27, %v5174_v35 }
 0x142   :  { %1053 = vmatpush.msrb.mxu0 %v957_v49  ;;  %960 = vmatpush.msrb.mxu1 %v959_v26 }
 0x143   :  { %v850_v1 = vpop.f32.mrf.mxu3  ;;  %931 = vmatmul.f32.gmra.mxu0 %v5170_v48  ;;  %962 = vmatmul.f32.vlgmr.msrb.gmra.mxu1 %v5141_v16 }
 0x144   :  { %v851_v32 = vadd.f32 %v850_v1, %v777_v28  ;;  %1016 = vmatpush.msra.mxu1 %v914_v45 }
 0x146   :  { %v5176_v37 = vand.u32 4294901760, %v851_v32  ;;  %1018 = vmatpush.msra.mxu1 %v916_v33 }
 0x148   :  { %1078 = vmatpush.msrb.mxu1 %v914_v45  ;;  %v5179_v38 = vsub.f32 %v851_v32, %v5176_v37  ;;  %1514 = vmatpush.msra.mxu3 %v5176_v37  ;;  %v5206_v45 = vpop.f32.mrf.mxu1 }
 0x14a   :  { %1080 = vmatpush.msrb.mxu1 %v916_v33  ;;  %1484 = vmatpush.msra.mxu2 %v5179_v38  ;;  %v5196_v33 = vpop.f32.mrf.mxu0 }
 0x14b   :  { %1516 = vmatpush.msra.mxu3 %v5174_v35  ;;  %966 = vmatmul.f32.gmra.mxu1 %v5153_v31 }
 0x14c   :  { %992 = vmatmul.f32.vlgmr.msra.gmra.mxu0 %v5147_v23  ;;  %1487 = vmatpush.msra.mxu2 %v5183_v40 }
 0x14d   :  { %1520 = vmatmul.f32.vlgmr.msra.gmra.mxu3 %v5151_v30  ;;  %1490 = vmatmul.f32.vlgmr.msra.gmra.mxu2 %v5147_v23 }
 0x150   :  { %v5211_v58 = vpop.f32.mrf.mxu1 }
 0x152   :  { %v5202_v42 = vpop.f32.mrf.mxu0 }
 0x153   :  { %1022 = vmatmul.f32.vlgmr.msra.gmra.mxu1 %v5151_v30 }
 0x154   :  { %997 = vmatmul.f32.gmra.mxu0 %v5158_v44 }
 0x155   :  { %1526 = vmatmul.f32.gmra.mxu3 %v5163_v47  ;;  %1495 = vmatmul.f32.gmra.mxu2 %v5158_v44 }
 0x158   :  { %v5215_v5 = vpop.f32.mrf.mxu1 }
 0x15a   :  { %v5208_v46 = vpop.f32.mrf.mxu0 }
 0x15b   :  { %1028 = vmatmul.f32.gmra.mxu1 %v5163_v47 }
 0x15c   :  { %1055 = vmatmul.f32.vlgmr.msrb.gmra.mxu0 %v5141_v16 }
 0x160   :  { %v5219_v9 = vpop.f32.mrf.mxu1 }
 0x161   :  { %6270 = vst [vmem:[#allocation24_spill] sm:$0xff] %v5219_v9 }
 0x162   :  { %v5213_v49 = vpop.f32.mrf.mxu0 }
 0x163   :  { %1082 = vmatmul.f32.vlgmr.msrb.gmra.mxu1 %v5141_v16 }
 0x164   :  { %1059 = vmatmul.f32.gmra.mxu0 %v5153_v31 }
 0x168   :  { %v5223_v12 = vpop.f32.mrf.mxu1 }
 0x169   :  { %6272 = vst [vmem:[#allocation26_spill] sm:$0xff] %v5223_v12 }
 0x16a   :  { %v5217_v7 = vpop.f32.mrf.mxu0 }
 0x16b   :  { %1086 = vmatmul.f32.gmra.mxu1 %v5153_v31  ;;  %6269 = vst [vmem:[#allocation23_spill] sm:$0xff] %v5217_v7 }
 0x170   :  { %v5227_v14 = vpop.f32.mrf.mxu1 }
 0x171   :  { %6274 = vst [vmem:[#allocation28_spill] sm:$0xff] %v5227_v14 }
 0x172   :  { %v5221_v11 = vpop.f32.mrf.mxu0 }
 0x173   :  { %6271 = vst [vmem:[#allocation25_spill] sm:$0xff] %v5221_v11 }
 0x178   :  { %v5231_v18 = vpop.f32.mrf.mxu1 }
 0x179   :  { %6276 = vst [vmem:[#allocation30_spill] sm:$0xff] %v5231_v18 }
 0x17a   :  { %v5225_v13 = vpop.f32.mrf.mxu0 }
 0x17b   :  { %6273 = vst [vmem:[#allocation27_spill] sm:$0xff] %v5225_v13 }
 0x180   :  { %v5235_v20 = vpop.f32.mrf.mxu1 }
 0x181   :  { %6278 = vst [vmem:[#allocation32_spill] sm:$0xff] %v5235_v20 }
 0x182   :  { %v5229_v17 = vpop.f32.mrf.mxu0 }
 0x183   :  { %6275 = vst [vmem:[#allocation29_spill] sm:$0xff] %v5229_v17 }
 0x188   :  { %v5239_v24 = vpop.f32.mrf.mxu1 }
 0x189   :  { %6280 = vst [vmem:[#allocation34_spill] sm:$0xff] %v5239_v24 }
 0x18a   :  { %v5233_v19 = vpop.f32.mrf.mxu0 }
 0x18b   :  { %6277 = vst [vmem:[#allocation31_spill] sm:$0xff] %v5233_v19 }
 0x192   :  { %v5237_v21 = vpop.f32.mrf.mxu0 }
 0x193   :  { %6279 = vst [vmem:[#allocation33_spill] sm:$0xff] %v5237_v21  ;;  %v255_v21 = vadd.f32 %v5124_v60, %v5059_v39  ;;  %v1141_v60 = vld [vmem:[%s6212_s4 + $0x40] sm:$0xff] }
 0x195   :  { %v5250_v18 = vadd.f32 %v5128_v2, %v255_v21 }
 0x1b8   :  { %v924_v25 = vpop.f32.mrf.mxu0 }
 0x1b9   :  { %v925_v19 = vadd.f32 %v924_v25, %v5244_v10 }
 0x1c0   :  { %v932_v26 = vpop.f32.mrf.mxu0  ;;  %v963_v27 = vpop.f32.mrf.mxu1 }
 0x1c1   :  { %v964_v24 = vadd.f32 %v963_v27, %v925_v19  ;;  %v933_v17 = vadd.f32 %v932_v26, %v5250_v18 }
 0x1c8   :  { %v967_v28 = vpop.f32.mrf.mxu1 }
 0x1c9   :  { %v993_v1 = vpop.f32.mrf.mxu0  ;;  %v968_v61 = vadd.f32 %v967_v28, %v933_v17 }
 0x1ca   :  { %v994_v14 = vadd.f32 %v993_v1, %v964_v24 }
 0x1d0   :  { %v1023_v4 = vpop.f32.mrf.mxu1 }
 0x1d1   :  { %v998_v32 = vpop.f32.mrf.mxu0  ;;  %v1024_v13 = vadd.f32 %v1023_v4, %v994_v14  ;;  %v5259_v4 = vand.u32 4294901760, %v1141_v60 }
 0x1d2   :  { %v999_v3 = vadd.f32 %v998_v32, %v968_v61 }
 0x1d3   :  { %1161 = vmatpush.msra.mxu0 %v5259_v4  ;;  %1655 = vmatpush.msrb.mxu2 %v5259_v4 }
 0x1d8   :  { %v1029_v20 = vpop.f32.mrf.mxu1 }
 0x1d9   :  { %v1056_v6 = vpop.f32.mrf.mxu0  ;;  %v1030_v0 = vadd.f32 %v1029_v20, %v999_v3 }
 0x1da   :  { %v1057_v52 = vadd.f32 %v1056_v6, %v1024_v13  ;;  %v5264_v6 = vsub.f32 %v1141_v60, %v5259_v4 }
 0x1e0   :  { %v1083_v34 = vpop.f32.mrf.mxu1 }
 0x1e1   :  { %v5253_v62 = vadd.f32 %v1083_v34, %v1057_v52  ;;  %v1060_v43 = vpop.f32.mrf.mxu0 }
 0x1e2   :  { %v1061_v39 = vadd.f32 %v1060_v43, %v1030_v0  ;;  %v5270_v0 = vand.u32 4294901760, %v5264_v6 }
 0x1e3   :  { %6282 = vst [vmem:[#allocation36_spill] sm:$0xff] %v5253_v62  ;;  %v4616_v25 = vmul.f32 -1.442695, %v5253_v62  ;;  %v5364_v62 = vld [vmem:[#allocation6 + $0x8] sm:$0xff] }
 0x1e4   :  { %v1200_v17 = vsub.f32 %v5264_v6, %v5270_v0 }
 0x1e5   :  { %4653 = vpow2.f32 %v4616_v25 }
 0x1e6   :  { %v5274_v19 = vand.u32 4294901760, %v1200_v17 }
 0x1e8   :  { %v1087_v2 = vpop.f32.mrf.mxu1  ;;  %1202 = vmatpush.msra.mxu1 %v5274_v19  ;;  %1696 = vmatpush.msrb.mxu3 %v5274_v19 }
 0x1e9   :  { %v5261_v14 = vadd.f32 %v1087_v2, %v1061_v39 }
 0x1eb   :  { %6283 = vst [vmem:[#allocation37_spill] sm:$0xff] %v5261_v14  ;;  %v4654_v52 = vpop.eup %4653  ;;  %v4617_v13 = vmul.f32 -1.442695, %v5261_v14 }
 0x1ec   :  { %v1096_v43 = vadd.f32 1.0, %v4654_v52 }
 0x1ed   :  { %4655 = vpow2.f32 %v4617_v13 }
 0x1ee   :  { %4657 = vrcp.f32 %v1096_v43  ;;  %v1109_v28 = vand.u32 2147483648, %v1096_v43  ;;  %v1107_v32 = vand.u32 2147483647, %v1096_v43  ;;  %vm1103_vm4 = vweird.f32 %v1096_v43 }
 0x1f0   :  { %v1110_v3 = vor.u32 1.1754944e-38, %v1109_v28  ;;  %vm1108_vm6 = vcmp.eq.f32.partialorder %v1107_v32, 8.507059e+37 }
 0x1f3   :  { %v4656_v20 = vpop.eup %4655 }
 0x1f4   :  { %v4658_v21 = vpop.eup %4657  ;;  %v1097_v24 = vadd.f32 1.0, %v4656_v20 }
 0x1f5   :  { %v1099_v26 = vmul.f32 %v4658_v21, %v1096_v43  ;;  %vm1104_vm3 = vweird.f32 %v4658_v21 }
 0x1f6   :  { %4659 = vrcp.f32 %v1097_v24  ;;  %vm1105_vm5 = vmor %vm1103_vm4, %vm1104_vm3  ;;  %v1124_v52 = vand.u32 2147483648, %v1097_v24  ;;  %v1122_v17 = vand.u32 2147483647, %v1097_v24  ;;  %vm1118_vm8 = vweird.f32 %v1097_v24 }
 0x1f7   :  { %v1100_v27 = vsub.f32 1.0, %v1099_v26 }
 0x1f8   :  { %v1125_v43 = vor.u32 1.1754944e-38, %v1124_v52  ;;  %vm1123_vm10 = vcmp.eq.f32.partialorder %v1122_v17, 8.507059e+37 }
 0x1f9   :  { %v1101_v1 = vmul.f32 %v4658_v21, %v1100_v27  ;;  %v1140_v27 = vld [vmem:[%s6212_s4 + $0x38] sm:$0xff] }
 0x1fa   :  { %v5289_v28 = vand.u32 4294901760, %v1140_v27 }
 0x1fb   :  { %v1102_v34 = vadd.f32 %v4658_v21, %v1101_v1  ;;  %v1139_v1 = vld [vmem:[%s6212_s4 + $0x30] sm:$0xff] }
 0x1fc   :  { %v4660_v61 = vpop.eup %4659  ;;  %v5297_v32 = vand.u32 4294901760, %v1139_v1  ;;  %1163 = vmatpush.msra.mxu0 %v5289_v28  ;;  %1657 = vmatpush.msrb.mxu2 %v5289_v28 }
 0x1fd   :  { %v1106_v25 = vsel %vm1105_vm5, %v4658_v21, %v1102_v34  ;;  %v1114_v39 = vmul.f32 %v4660_v61, %v1097_v24  ;;  %vm1119_vm7 = vweird.f32 %v4660_v61  ;;  %v5295_v24 = vsub.f32 %v1140_v27, %v5289_v28  ;;  %v1138_v34 = vld [vmem:[%s6212_s4 + $0x28] sm:$0xff] }
 0x1fe   :  { %v5278_v60 = vsel %vm1108_vm6, %v1110_v3, %v1106_v25  ;;  %vm1120_vm9 = vmor %vm1118_vm8, %vm1119_vm7  ;;  %v5308_v3 = vsub.f32 %v1139_v1, %v5297_v32  ;;  %v5310_v25 = vand.u32 4294901760, %v1138_v34  ;;  %1165 = vmatpush.msra.mxu0 %v5297_v32  ;;  %1659 = vmatpush.msrb.mxu2 %v5297_v32 }
 0x1ff   :  { %6284 = vst [vmem:[#allocation38_spill] sm:$0xff] %v5278_v60  ;;  %1130 = vrot.lane.b32.xlu0 %v5278_v60, %s4813_s26  ;;  %v1115_v2 = vsub.f32 1.0, %v1114_v39 }
 0x200   :  { %v5320_v52 = vsub.f32 %v1138_v34, %v5310_v25  ;;  %1167 = vmatpush.msra.mxu0 %v5310_v25  ;;  %1661 = vmatpush.msrb.mxu2 %v5310_v25  ;;  %v5359_v34 = vld [vmem:[#allocation6] sm:$0xff] }
 0x201   :  { %v1116_v13 = vmul.f32 %v4660_v61, %v1115_v2  ;;  %v5317_v2 = vand.u32 4294901760, %v5308_v3 }
 0x202   :  { %1244 = vmatpush.msrb.mxu0 %v5264_v6  ;;  %1807 = vmatpush.msra.mxu2 %v5270_v0 }
 0x203   :  { %v1117_v20 = vadd.f32 %v4660_v61, %v1116_v13  ;;  %v1212_v17 = vsub.f32 %v5308_v3, %v5317_v2 }
 0x204   :  { %1247 = vmatpush.msrb.mxu0 %v5295_v24 }
 0x205   :  { %v1121_v26 = vsel %vm1120_vm9, %v4660_v61, %v1117_v20  ;;  %v5305_v61 = vand.u32 4294901760, %v5295_v24  ;;  %v5331_v20 = vand.u32 4294901760, %v5320_v52 }
 0x206   :  { %v5282_v21 = vsel %vm1123_vm10, %v1125_v43, %v1121_v26  ;;  %v5336_v43 = vand.u32 4294901760, %v1212_v17  ;;  %1250 = vmatpush.msrb.mxu0 %v5308_v3 }
 0x207   :  { %6285 = vst [vmem:[#allocation39_spill] sm:$0xff] %v5282_v21  ;;  %1132 = vrot.lane.b32.xlu0 %v5282_v21, %s4813_s26  ;;  %v1206_v39 = vsub.f32 %v5295_v24, %v5305_v61  ;;  %1811 = vmatpush.msra.mxu2 %v5305_v61  ;;  %v1218_v26 = vsub.f32 %v5320_v52, %v5331_v20 }
 0x208   :  { %1253 = vmatpush.msrb.mxu0 %v5320_v52 }
 0x209   :  { %v5326_v13 = vand.u32 4294901760, %v1206_v39  ;;  %1815 = vmatpush.msra.mxu2 %v5317_v2  ;;  %v5344_v27 = vand.u32 4294901760, %v1218_v26 }
 0x20b   :  { %1208 = vmatpush.msra.mxu1 %v5326_v13  ;;  %1702 = vmatpush.msrb.mxu3 %v5326_v13 }
 0x20c   :  { %1819 = vmatpush.msra.mxu2 %v5331_v20 }
 0x20d   :  { %1214 = vmatpush.msra.mxu1 %v5336_v43  ;;  %1708 = vmatpush.msrb.mxu3 %v5336_v43 }
 0x20f   :  { %1220 = vmatpush.msra.mxu1 %v5344_v27  ;;  %1714 = vmatpush.msrb.mxu3 %v5344_v27 }
 0x211   :  { %1278 = vmatpush.msrb.mxu1 %v5259_v4  ;;  %1842 = vmatpush.msra.mxu3 %v5259_v4 }
 0x213   :  { %1280 = vmatpush.msrb.mxu1 %v5289_v28  ;;  %1844 = vmatpush.msra.mxu3 %v5289_v28 }
 0x215   :  { %1282 = vmatpush.msrb.mxu1 %v5297_v32  ;;  %1846 = vmatpush.msra.mxu3 %v5297_v32 }
 0x217   :  { %1284 = vmatpush.msrb.mxu1 %v5310_v25  ;;  %1848 = vmatpush.msra.mxu3 %v5310_v25 }
 0x271   :  { %v1131_v1 = vpop.permute.xlu0 %1130 }
 0x272   :  { %v1136_v39 = vmul.f32 %v5359_v34, %v1131_v1 }
 0x274   :  { %v1143_v17 = vsel %vm63_vm0, %v1136_v39, 0 }
 0x275   :  { %v1168_v26 = vand.u32 4294901760, %v1143_v17 }
 0x277   :  { %v1169_v21 = vsub.f32 %v1143_v17, %v1168_v26  ;;  %1222 = vmatmul.f32.vlgmr.msra.gmra.mxu1 %v1168_v26  ;;  %v1449_v17 = vand.u32 4294901760, %v5179_v38 }
 0x278   :  { %1348 = vmatpush.msra.mxu1 %v5259_v4 }
 0x279   :  { %v1170_v60 = vand.u32 4294901760, %v1169_v21  ;;  %v1133_v14 = vpop.permute.xlu0 %1132  ;;  %v1450_v57 = vsub.f32 %v5179_v38, %v1449_v17  ;;  %v780_v38 = vpop.f32.mrf.mxu2 }
 0x27a   :  { %v1137_v63 = vmul.f32 %v5364_v62, %v1133_v14  ;;  %1350 = vmatpush.msra.mxu1 %v5289_v28  ;;  %v1455_v14 = vand.u32 4294901760, %v5183_v40 }
 0x27b   :  { %v1171_v9 = vsub.f32 %v1169_v21, %v1170_v60  ;;  %v1451_v59 = vand.u32 4294901760, %v1450_v57  ;;  %v514_v57 = vadd.f32 %v5079_v8, %v5075_v50 }
 0x27c   :  { %v1146_v12 = vsel %vm63_vm0, %v1137_v63, 0  ;;  %1352 = vmatpush.msra.mxu1 %v5297_v32  ;;  %v1456_v29 = vsub.f32 %v5183_v40, %v1455_v14  ;;  %v518_v40 = vadd.f32 %v5085_v15, %v5081_v53 }
 0x27d   :  { %v1176_v1 = vand.u32 4294901760, %v1146_v12  ;;  %v1172_v39 = vand.u32 4294901760, %v1171_v9 }
 0x27e   :  { %1354 = vmatpush.msra.mxu1 %v5310_v25 }
 0x27f   :  { %v1177_v7 = vsub.f32 %v1146_v12, %v1176_v1  ;;  %1173 = vmatmul.f32.vlgmr.msra.gmra.mxu0 %v1172_v39  ;;  %1226 = vmatmul.f32.gmra.mxu1 %v1176_v1  ;;  %v1457_v12 = vand.u32 4294901760, %v1456_v29  ;;  %v854_v39 = vpop.f32.mrf.mxu3  ;;  %v599_v29 = vadd.f32 %v5202_v42, %v518_v40 }
 0x280   :  { %1313 = vmatpush.msra.mxu0 %v5270_v0 }
 0x281   :  { %v1178_v11 = vand.u32 4294901760, %v1177_v7 }
 0x282   :  { %1317 = vmatpush.msra.mxu0 %v5305_v61 }
 0x283   :  { %v1179_v63 = vsub.f32 %v1177_v7, %v1178_v11 }
 0x284   :  { %1321 = vmatpush.msra.mxu0 %v5317_v2 }
 0x285   :  { %v1180_v9 = vand.u32 4294901760, %v1179_v63 }
 0x286   :  { %1325 = vmatpush.msra.mxu0 %v5331_v20 }
 0x287   :  { %1181 = vmatmul.f32.gmra.mxu0 %v1180_v9  ;;  %1288 = vmatmul.f32.vlgmr.msrb.gmra.mxu1 %v1170_v60  ;;  %v693_v60 = vadd.f32 %v5206_v45, %v599_v29 }
 0x288   :  { %1452 = vmatpush.msrb.mxu1 %v1451_v59  ;;  %v594_v59 = vadd.f32 %v5196_v33, %v514_v57 }
 0x28a   :  { %1458 = vmatpush.msrb.mxu1 %v1457_v12  ;;  %v687_v53 = vadd.f32 %v5200_v41, %v594_v59 }
 0x28f   :  { %1256 = vmatmul.f32.vlgmr.msrb.gmra.mxu0 %v1169_v21  ;;  %1294 = vmatmul.f32.gmra.mxu1 %v1178_v11  ;;  %v784_v11 = vpop.f32.mrf.mxu2  ;;  %v858_v21 = vpop.f32.mrf.mxu3 }
 0x290   :  { %1413 = vmatpush.msrb.mxu0 %v5176_v37  ;;  %v785_v15 = vadd.f32 %v784_v11, %v693_v60 }
 0x292   :  { %1415 = vmatpush.msrb.mxu0 %v5174_v35  ;;  %v859_v50 = vadd.f32 %v858_v21, %v785_v15 }
 0x297   :  { %1261 = vmatmul.f32.gmra.mxu0 %v1177_v7  ;;  %1356 = vmatmul.f32.vlgmr.msra.gmra.mxu1 %v1168_v26  ;;  %v781_v7 = vadd.f32 %v780_v38, %v687_v53  ;;  %v5427_v63 = vpop.f32.mrf.mxu2  ;;  %v5429_v9 = vpop.f32.mrf.mxu3 }
 0x298   :  { %1576 = vmatpush.msra.mxu1 %v5176_v37  ;;  %v5391_v37 = vand.u32 4294901760, %v859_v50 }
 0x299   :  { %v855_v8 = vadd.f32 %v854_v39, %v781_v7 }
 0x29a   :  { %1578 = vmatpush.msra.mxu1 %v5174_v35  ;;  %v5398_v33 = vsub.f32 %v859_v50, %v5391_v37 }
 0x29b   :  { %v5394_v35 = vand.u32 4294901760, %v855_v8 }
 0x29c   :  { %v6222_v42 = vand.u32 4294901760, %v5398_v33 }
 0x29d   :  { %v5402_v41 = vsub.f32 %v855_v8, %v5394_v35 }
 0x29f   :  { %1327 = vmatmul.f32.vlgmr.msra.gmra.mxu0 %v1168_v26  ;;  %1360 = vmatmul.f32.gmra.mxu1 %v1176_v1  ;;  %v6221_v45 = vand.u32 4294901760, %v5402_v41  ;;  %v1944_v26 = vsub.f32 %v5398_v33, %v6222_v42  ;;  %v5431_v12 = vpop.f32.mrf.mxu2  ;;  %v5433_v38 = vpop.f32.mrf.mxu3 }
 0x2a0   :  { %1547 = vmatpush.msra.mxu0 %v1449_v17 }
 0x2a1   :  { %v1945_v17 = vand.u32 4294901760, %v1944_v26 }
 0x2a2   :  { %1551 = vmatpush.msra.mxu0 %v1455_v14 }
 0x2a7   :  { %1331 = vmatmul.f32.gmra.mxu0 %v1176_v1  ;;  %1460 = vmatmul.f32.vlgmr.msrb.gmra.mxu1 %v5141_v16  ;;  %v1950_v1 = vsub.f32 %v5402_v41, %v6221_v45  ;;  %v5437_v40 = vpop.f32.mrf.mxu2  ;;  %v5439_v57 = vpop.f32.mrf.mxu3 }
 0x2a8   :  { %1772 = vmatpush.msrb.mxu1 %v5259_v4  ;;  %6287 = vst [vmem:[#allocation41_spill] sm:$0xff] %v5437_v40 }
 0x2a9   :  { %v1951_v14 = vand.u32 4294901760, %v1950_v1  ;;  %6288 = vst [vmem:[#allocation42_spill] sm:$0xff] %v5439_v57 }
 0x2aa   :  { %1774 = vmatpush.msrb.mxu1 %v5289_v28 }
 0x2ac   :  { %1776 = vmatpush.msrb.mxu1 %v5297_v32 }
 0x2ae   :  { %1778 = vmatpush.msrb.mxu1 %v5310_v25 }
 0x2af   :  { %1421 = vmatmul.f32.vlgmr.msrb.gmra.mxu0 %v5160_v51  ;;  %1464 = vmatmul.f32.gmra.mxu1 %v5153_v31  ;;  %v5445_v11 = vpop.f32.mrf.mxu2  ;;  %v5451_v53 = vpop.f32.mrf.mxu3 }
 0x2b0   :  { %1738 = vmatpush.msrb.mxu0 %v5264_v6  ;;  %6291 = vst [vmem:[#allocation45_spill] sm:$0xff] %v5445_v11 }
 0x2b1   :  { %6294 = vst [vmem:[#allocation48_spill] sm:$0xff] %v5451_v53 }
 0x2b2   :  { %1741 = vmatpush.msrb.mxu0 %v5295_v24 }
 0x2b4   :  { %1744 = vmatpush.msrb.mxu0 %v5308_v3 }
 0x2b6   :  { %1747 = vmatpush.msrb.mxu0 %v5320_v52 }
 0x2b7   :  { %1429 = vmatmul.f32.gmra.mxu0 %v5170_v48  ;;  %1580 = vmatmul.f32.vlgmr.msra.gmra.mxu1 %v5141_v16  ;;  %v5453_v15 = vpop.f32.mrf.mxu2  ;;  %v5459_v8 = vpop.f32.mrf.mxu3 }
 0x2b8   :  { %1946 = vmatpush.msra.mxu1 %v1945_v17  ;;  %6295 = vst [vmem:[#allocation49_spill] sm:$0xff] %v5453_v15 }
 0x2b9   :  { %6298 = vst [vmem:[#allocation52_spill] sm:$0xff] %v5459_v8 }
 0x2ba   :  { %1952 = vmatpush.msra.mxu1 %v1951_v14 }
 0x2bf   :  { %1553 = vmatmul.f32.vlgmr.msra.gmra.mxu0 %v5141_v16  ;;  %1584 = vmatmul.f32.gmra.mxu1 %v5153_v31  ;;  %v5465_v17 = vpop.f32.mrf.mxu2  ;;  %v5467_v14 = vpop.f32.mrf.mxu3 }
 0x2c0   :  { %1907 = vmatpush.msra.mxu0 %v5391_v37  ;;  %6301 = vst [vmem:[#allocation55_spill] sm:$0xff] %v5465_v17 }
 0x2c1   :  { %6302 = vst [vmem:[#allocation56_spill] sm:$0xff] %v5467_v14 }
 0x2c2   :  { %1909 = vmatpush.msra.mxu0 %v5394_v35 }
 0x2c7   :  { %1557 = vmatmul.f32.gmra.mxu0 %v5153_v31 }
 0x2f4   :  { %v5435_v39 = vpop.f32.mrf.mxu1 }
 0x2f5   :  { %6286 = vst [vmem:[#allocation40_spill] sm:$0xff] %v5435_v39 }
 0x2fc   :  { %v5441_v29 = vpop.f32.mrf.mxu0  ;;  %v5443_v59 = vpop.f32.mrf.mxu1 }
 0x2fd   :  { %6289 = vst [vmem:[#allocation43_spill] sm:$0xff] %v5441_v29 }
 0x2fe   :  { %6290 = vst [vmem:[#allocation44_spill] sm:$0xff] %v5443_v59  ;;  %v5473_v59 = vpop.f32.mrf.mxu2 }
 0x2ff   :  { %6305 = vst [vmem:[#allocation59_spill] sm:$0xff] %v5473_v59 }
 0x304   :  { %v5447_v60 = vpop.f32.mrf.mxu0  ;;  %v5449_v21 = vpop.f32.mrf.mxu1 }
 0x305   :  { %6292 = vst [vmem:[#allocation46_spill] sm:$0xff] %v5447_v60  ;;  %v5475_v60 = vpop.f32.mrf.mxu3 }
 0x306   :  { %6293 = vst [vmem:[#allocation47_spill] sm:$0xff] %v5449_v21 }
 0x307   :  { %6306 = vst [vmem:[#allocation60_spill] sm:$0xff] %v5475_v60 }
 0x30c   :  { %v5455_v7 = vpop.f32.mrf.mxu0  ;;  %v5457_v50 = vpop.f32.mrf.mxu1 }
 0x30d   :  { %6296 = vst [vmem:[#allocation50_spill] sm:$0xff] %v5455_v7  ;;  %v5479_v7 = vpop.f32.mrf.mxu2  ;;  %v5481_v39 = vpop.f32.mrf.mxu3 }
 0x30e   :  { %6297 = vst [vmem:[#allocation51_spill] sm:$0xff] %v5457_v50 }
 0x30f   :  { %6308 = vst [vmem:[#allocation62_spill] sm:$0xff] %v5479_v7 }
 0x310   :  { %6309 = vst [vmem:[#allocation63_spill] sm:$0xff] %v5481_v39 }
 0x314   :  { %v5461_v26 = vpop.f32.mrf.mxu0  ;;  %v5463_v1 = vpop.f32.mrf.mxu1 }
 0x315   :  { %6299 = vst [vmem:[#allocation53_spill] sm:$0xff] %v5461_v26  ;;  %v1491_v8 = vpop.f32.mrf.mxu2  ;;  %v1521_v15 = vpop.f32.mrf.mxu3 }
 0x316   :  { %6300 = vst [vmem:[#allocation54_spill] sm:$0xff] %v5463_v1 }
 0x31c   :  { %v5469_v45 = vpop.f32.mrf.mxu0  ;;  %v5471_v42 = vpop.f32.mrf.mxu1 }
 0x31d   :  { %6303 = vst [vmem:[#allocation57_spill] sm:$0xff] %v5469_v45  ;;  %v1527_v39 = vpop.f32.mrf.mxu3 }
 0x31e   :  { %6304 = vst [vmem:[#allocation58_spill] sm:$0xff] %v5471_v42 }
 0x324   :  { %v5477_v21 = vpop.f32.mrf.mxu0  ;;  %v1461_v50 = vpop.f32.mrf.mxu1 }
 0x325   :  { %6307 = vst [vmem:[#allocation61_spill] sm:$0xff] %v5477_v21  ;;  %v1496_v21 = vpop.f32.mrf.mxu2 }
 0x32c   :  { %v1422_v26 = vpop.f32.mrf.mxu0  ;;  %v1465_v29 = vpop.f32.mrf.mxu1 }
 0x32d   :  { %v1423_v1 = vadd.f32 %v1422_v26, %v5244_v10 }
 0x32f   :  { %v1462_v14 = vadd.f32 %v1461_v50, %v1423_v1 }
 0x331   :  { %v1492_v42 = vadd.f32 %v1491_v8, %v1462_v14 }
 0x333   :  { %v1522_v60 = vadd.f32 %v1521_v15, %v1492_v42 }
 0x334   :  { %v1430_v45 = vpop.f32.mrf.mxu0  ;;  %v1581_v17 = vpop.f32.mrf.mxu1 }
 0x335   :  { %v1431_v59 = vadd.f32 %v1430_v45, %v5250_v18 }
 0x337   :  { %v1466_v57 = vadd.f32 %v1465_v29, %v1431_v59 }
 0x339   :  { %v1497_v7 = vadd.f32 %v1496_v21, %v1466_v57 }
 0x33b   :  { %v1528_v36 = vadd.f32 %v1527_v39, %v1497_v7 }
 0x33c   :  { %v1554_v53 = vpop.f32.mrf.mxu0  ;;  %v1585_v1 = vpop.f32.mrf.mxu1 }
 0x33d   :  { %v1555_v40 = vadd.f32 %v1554_v53, %v1522_v60 }
 0x33f   :  { %v5485_v11 = vadd.f32 %v1581_v17, %v1555_v40 }
 0x341   :  { %6310 = vst [vmem:[#allocation64_spill] sm:$0xff] %v5485_v11  ;;  %v4618_v26 = vmul.f32 -1.442695, %v5485_v11 }
 0x343   :  { %4661 = vpow2.f32 %v4618_v26 }
 0x344   :  { %v1558_v50 = vpop.f32.mrf.mxu0 }
 0x345   :  { %v1559_v10 = vadd.f32 %v1558_v50, %v1528_v36 }
 0x347   :  { %v5488_v8 = vadd.f32 %v1585_v1, %v1559_v10 }
 0x349   :  { %6311 = vst [vmem:[#allocation65_spill] sm:$0xff] %v5488_v8  ;;  %v4662_v45 = vpop.eup %4661  ;;  %v4619_v42 = vmul.f32 -1.442695, %v5488_v8 }
 0x34a   :  { %v1594_v29 = vadd.f32 1.0, %v4662_v45 }
 0x34b   :  { %4663 = vpow2.f32 %v4619_v42 }
 0x34c   :  { %4665 = vrcp.f32 %v1594_v29  ;;  %v1607_v53 = vand.u32 2147483648, %v1594_v29  ;;  %v1605_v15 = vand.u32 2147483647, %v1594_v29  ;;  %vm1601_vm12 = vweird.f32 %v1594_v29 }
 0x34e   :  { %v1608_v10 = vor.u32 1.1754944e-38, %v1607_v53  ;;  %vm1606_vm14 = vcmp.eq.f32.partialorder %v1605_v15, 8.507059e+37 }
 0x351   :  { %v4664_v59 = vpop.eup %4663 }
 0x352   :  { %v4666_v57 = vpop.eup %4665  ;;  %v1595_v40 = vadd.f32 1.0, %v4664_v59 }
 0x353   :  { %v1597_v60 = vmul.f32 %v4666_v57, %v1594_v29  ;;  %vm1602_vm11 = vweird.f32 %v4666_v57 }
 0x354   :  { %4667 = vrcp.f32 %v1595_v40  ;;  %vm1603_vm13 = vmor %vm1601_vm12, %vm1602_vm11  ;;  %v1622_v1 = vand.u32 2147483648, %v1595_v40  ;;  %v1620_v42 = vand.u32 2147483647, %v1595_v40  ;;  %vm1616_vm1 = vweird.f32 %v1595_v40 }
 0x355   :  { %v1598_v21 = vsub.f32 1.0, %v1597_v60 }
 0x356   :  { %v1623_v29 = vor.u32 1.1754944e-38, %v1622_v1  ;;  %vm1621_vm3 = vcmp.eq.f32.partialorder %v1620_v42, 8.507059e+37  ;;  %v522_v1 = vadd.f32 %v5091_v55, %v5087_v54  ;;  %v6315_v42 = vand.u32 4294901760, %v5402_v41 }
 0x357   :  { %v1599_v39 = vmul.f32 %v4666_v57, %v1598_v21 }
 0x359   :  { %v1600_v7 = vadd.f32 %v4666_v57, %v1599_v39 }
 0x35a   :  { %v4668_v36 = vpop.eup %4667 }
 0x35b   :  { %v1604_v17 = vsel %vm1603_vm13, %v4666_v57, %v1600_v7  ;;  %v1612_v14 = vmul.f32 %v4668_v36, %v1595_v40  ;;  %vm1617_vm15 = vweird.f32 %v4668_v36 }
 0x35c   :  { %v5491_v26 = vsel %vm1606_vm14, %v1608_v10, %v1604_v17  ;;  %vm1618_vm2 = vmor %vm1616_vm1, %vm1617_vm15  ;;  %v6314_v17 = vand.u32 4294901760, %v5398_v33 }
 0x35d   :  { %6312 = vst [vmem:[#allocation66_spill] sm:$0xff] %v5491_v26  ;;  %1628 = vrot.lane.b32.xlu1 %v5491_v26, %s4813_s26  ;;  %v1613_v50 = vsub.f32 1.0, %v1612_v14 }
 0x35f   :  { %v1614_v45 = vmul.f32 %v4668_v36, %v1613_v50 }
 0x361   :  { %v1615_v59 = vadd.f32 %v4668_v36, %v1614_v45 }
 0x363   :  { %v1619_v60 = vsel %vm1618_vm2, %v4668_v36, %v1615_v59  ;;  %v526_v36 = vadd.f32 %v5097_v56, %v5093_v22 }
 0x364   :  { %v5495_v21 = vsel %vm1621_vm3, %v1623_v29, %v1619_v60  ;;  %v604_v60 = vadd.f32 %v5208_v46, %v522_v1 }
 0x365   :  { %6313 = vst [vmem:[#allocation67_spill] sm:$0xff] %v5495_v21  ;;  %1630 = vrot.lane.b32.xlu1 %v5495_v21, %s4813_s26  ;;  %v609_v59 = vadd.f32 %v5213_v49, %v526_v36 }
 0x367   :  { %v705_v55 = vadd.f32 %v5215_v5, %v609_v59 }
 0x369   :  { %v793_v49 = vadd.f32 %v5431_v12, %v705_v55 }
 0x3cf   :  { %v1629_v57 = vpop.permute.xlu1 %1628 }
 0x3d0   :  { %v1634_v53 = vmul.f32 %v5359_v34, %v1629_v57  ;;  %v699_v57 = vadd.f32 %v5211_v58, %v604_v60 }
 0x3d2   :  { %v1637_v39 = vsel %vm63_vm0, %v1634_v53, 0  ;;  %v789_v53 = vadd.f32 %v5427_v63, %v699_v57 }
 0x3d3   :  { %v1662_v15 = vand.u32 4294901760, %v1637_v39 }
 0x3d4   :  { %v863_v46 = vadd.f32 %v5429_v9, %v789_v53 }
 0x3d5   :  { %v1663_v7 = vsub.f32 %v1637_v39, %v1662_v15  ;;  %1716 = vmatmul.f32.vlgmr.msrb.gmra.mxu3 %v1662_v15  ;;  %v867_v39 = vadd.f32 %v5433_v38, %v793_v49 }
 0x3d6   :  { %2008 = vmatpush.msrb.mxu3 %v5391_v37  ;;  %v5532_v58 = vand.u32 4294901760, %v863_v46 }
 0x3d7   :  { %v1664_v40 = vand.u32 4294901760, %v1663_v7  ;;  %1750 = vmatmul.f32.vlgmr.msrb.gmra.mxu0 %v1663_v7  ;;  %v1631_v10 = vpop.permute.xlu1 %1630  ;;  %v5527_v5 = vand.u32 4294901760, %v867_v39 }
 0x3d8   :  { %2010 = vmatpush.msrb.mxu3 %v5394_v35  ;;  %2041 = vmatpush.msrb.mxu0 %v6314_v17  ;;  %v1635_v14 = vmul.f32 %v5364_v62, %v1631_v10 }
 0x3d9   :  { %v1665_v50 = vsub.f32 %v1663_v7, %v1664_v40  ;;  %1782 = vmatmul.f32.vlgmr.msrb.gmra.mxu1 %v1664_v40 }
 0x3da   :  { %v1640_v45 = vsel %vm63_vm0, %v1635_v14, 0  ;;  %2045 = vmatpush.msrb.mxu0 %v6315_v42  ;;  %2070 = vmatpush.msrb.mxu1 %v5391_v37 }
 0x3db   :  { %v1666_v22 = vand.u32 4294901760, %v1665_v50  ;;  %v1670_v56 = vand.u32 4294901760, %v1640_v45 }
 0x3dc   :  { %2072 = vmatpush.msrb.mxu1 %v5394_v35 }
 0x3dd   :  { %v1671_v29 = vsub.f32 %v1640_v45, %v1670_v56  ;;  %1667 = vmatmul.f32.vlgmr.msrb.gmra.mxu2 %v1666_v22  ;;  %1720 = vmatmul.f32.gmra.mxu3 %v1670_v56 }
 0x3de   :  { %1978 = vmatpush.msrb.mxu2 %v5398_v33  ;;  %v5538_v33 = vsub.f32 %v867_v39, %v5527_v5 }
 0x3df   :  { %1755 = vmatmul.f32.gmra.mxu0 %v1671_v29  ;;  %v1672_v54 = vand.u32 4294901760, %v1671_v29 }
 0x3e0   :  { %1981 = vmatpush.msrb.mxu2 %v5402_v41  ;;  %v5543_v41 = vsub.f32 %v863_v46, %v5532_v58  ;;  %v6226_v63 = vand.u32 4294901760, %v5538_v33 }
 0x3e1   :  { %1788 = vmatmul.f32.gmra.mxu1 %v1672_v54  ;;  %v1673_v37 = vsub.f32 %v1671_v29, %v1672_v54 }
 0x3e2   :  { %v6225_v9 = vand.u32 4294901760, %v5543_v41  ;;  %v2438_v12 = vsub.f32 %v5538_v33, %v6226_v63 }
 0x3e3   :  { %v1674_v35 = vand.u32 4294901760, %v1673_v37  ;;  %v6319_v37 = vld [vmem:[#allocation35_spill] sm:$0xff] }
 0x3e4   :  { %v2444_v38 = vsub.f32 %v5543_v41, %v6225_v9 }
 0x3e5   :  { %1675 = vmatmul.f32.gmra.mxu2 %v1674_v35  ;;  %1850 = vmatmul.f32.vlgmr.msra.gmra.mxu3 %v1662_v15 }
 0x3e6   :  { %2190 = vmatpush.msra.mxu3 %v5274_v19  ;;  %v2445_v7 = vand.u32 4294901760, %v2444_v38 }
 0x3e7   :  { %1915 = vmatmul.f32.vlgmr.msra.gmra.mxu0 %v5160_v51 }
 0x3e8   :  { %2232 = vmatpush.msra.mxu0 %v5264_v6  ;;  %2196 = vmatpush.msra.mxu3 %v5326_v13 }
 0x3e9   :  { %1954 = vmatmul.f32.vlgmr.msra.gmra.mxu1 %v5141_v16 }
 0x3ea   :  { %2235 = vmatpush.msra.mxu0 %v5295_v24  ;;  %2266 = vmatpush.msra.mxu1 %v5259_v4 }
 0x3eb   :  { %2202 = vmatpush.msra.mxu3 %v5336_v43 }
 0x3ec   :  { %2238 = vmatpush.msra.mxu0 %v5308_v3  ;;  %2268 = vmatpush.msra.mxu1 %v5289_v28 }
 0x3ed   :  { %1821 = vmatmul.f32.vlgmr.msra.gmra.mxu2 %v1662_v15  ;;  %1854 = vmatmul.f32.gmra.mxu3 %v1670_v56  ;;  %v2439_v15 = vand.u32 4294901760, %v2438_v12 }
 0x3ee   :  { %2241 = vmatpush.msra.mxu0 %v5320_v52  ;;  %2270 = vmatpush.msra.mxu1 %v5297_v32 }
 0x3ef   :  { %1923 = vmatmul.f32.gmra.mxu0 %v5170_v48  ;;  %2208 = vmatpush.msra.mxu3 %v5344_v27 }
 0x3f0   :  { %2272 = vmatpush.msra.mxu1 %v5310_v25  ;;  %2149 = vmatpush.msra.mxu2 %v5259_v4 }
 0x3f1   :  { %1958 = vmatmul.f32.gmra.mxu1 %v5153_v31 }
 0x3f2   :  { %2151 = vmatpush.msra.mxu2 %v5289_v28 }
 0x3f4   :  { %2153 = vmatpush.msra.mxu2 %v5297_v32 }
 0x3f5   :  { %1825 = vmatmul.f32.gmra.mxu2 %v1670_v56  ;;  %2014 = vmatmul.f32.vlgmr.msrb.gmra.mxu3 %v5151_v30 }
 0x3f6   :  { %2336 = vmatpush.msrb.mxu3 %v5259_v4  ;;  %2155 = vmatpush.msra.mxu2 %v5310_v25 }
 0x3f7   :  { %2047 = vmatmul.f32.vlgmr.msrb.gmra.mxu0 %v5141_v16 }
 0x3f8   :  { %2401 = vmatpush.msrb.mxu0 %v5527_v5  ;;  %2338 = vmatpush.msrb.mxu3 %v5289_v28 }
 0x3f9   :  { %2074 = vmatmul.f32.vlgmr.msrb.gmra.mxu1 %v5141_v16 }
 0x3fa   :  { %2403 = vmatpush.msrb.mxu0 %v5532_v58  ;;  %2440 = vmatpush.msrb.mxu1 %v2439_v15 }
 0x3fb   :  { %2340 = vmatpush.msrb.mxu3 %v5297_v32 }
 0x3fc   :  { %2446 = vmatpush.msrb.mxu1 %v2445_v7 }
 0x3fd   :  { %1984 = vmatmul.f32.vlgmr.msrb.gmra.mxu2 %v5147_v23  ;;  %2020 = vmatmul.f32.gmra.mxu3 %v5163_v47 }
 0x3fe   :  { %2342 = vmatpush.msrb.mxu3 %v5310_v25  ;;  %2301 = vmatpush.msrb.mxu2 %v5270_v0 }
 0x3ff   :  { %2051 = vmatmul.f32.gmra.mxu0 %v5153_v31 }
 0x400   :  { %2305 = vmatpush.msrb.mxu2 %v5305_v61 }
 0x401   :  { %2078 = vmatmul.f32.gmra.mxu1 %v5153_v31 }
 0x402   :  { %2309 = vmatpush.msrb.mxu2 %v5317_v2 }
 0x404   :  { %2313 = vmatpush.msrb.mxu2 %v5331_v20 }
 0x405   :  { %1989 = vmatmul.f32.gmra.mxu2 %v5158_v44 }
 0x454   :  { %v5583_v10 = vpop.f32.mrf.mxu0 }
 0x456   :  { %v5585_v36 = vpop.f32.mrf.mxu1 }
 0x457   :  { %6316 = vst [vmem:[#allocation68_spill] sm:$0xff] %v5585_v36 }
 0x458   :  { %v5581_v40 = vpop.f32.mrf.mxu3 }
 0x45c   :  { %v5591_v50 = vpop.f32.mrf.mxu0 }
 0x45e   :  { %v5593_v1 = vpop.f32.mrf.mxu1 }
 0x460   :  { %v5587_v17 = vpop.f32.mrf.mxu2  ;;  %v5589_v14 = vpop.f32.mrf.mxu3 }
 0x464   :  { %v1916_v22 = vpop.f32.mrf.mxu0 }
 0x465   :  { %v1917_v57 = vadd.f32 %v1916_v22, %v6319_v37 }
 0x466   :  { %v1955_v56 = vpop.f32.mrf.mxu1 }
 0x467   :  { %v1956_v35 = vadd.f32 %v1955_v56, %v1917_v57 }
 0x468   :  { %v5595_v45 = vpop.f32.mrf.mxu2  ;;  %v5597_v42 = vpop.f32.mrf.mxu3 }
 0x469   :  { %6317 = vst [vmem:[#allocation69_spill] sm:$0xff] %v5597_v42 }
 0x46c   :  { %v1924_v60 = vpop.f32.mrf.mxu0 }
 0x46d   :  { %v1925_v38 = vadd.f32 %v1924_v60, %v5250_v18 }
 0x46e   :  { %v1959_v55 = vpop.f32.mrf.mxu1 }
 0x46f   :  { %v1960_v9 = vadd.f32 %v1959_v55, %v1925_v38 }
 0x470   :  { %v5599_v59 = vpop.f32.mrf.mxu2  ;;  %v5601_v29 = vpop.f32.mrf.mxu3 }
 0x471   :  { %6318 = vst [vmem:[#allocation70_spill] sm:$0xff] %v5599_v59 }
 0x474   :  { %v2048_v39 = vpop.f32.mrf.mxu0 }
 0x476   :  { %v2075_v12 = vpop.f32.mrf.mxu1 }
 0x478   :  { %v5603_v54 = vpop.f32.mrf.mxu2  ;;  %v2015_v49 = vpop.f32.mrf.mxu3 }
 0x47c   :  { %v2052_v42 = vpop.f32.mrf.mxu0 }
 0x47e   :  { %v2079_v56 = vpop.f32.mrf.mxu1 }
 0x480   :  { %v1985_v53 = vpop.f32.mrf.mxu2  ;;  %v2021_v26 = vpop.f32.mrf.mxu3 }
 0x481   :  { %v1986_v46 = vadd.f32 %v1985_v53, %v1956_v35 }
 0x483   :  { %v2016_v15 = vadd.f32 %v2015_v49, %v1986_v46 }
 0x485   :  { %v2049_v7 = vadd.f32 %v2048_v39, %v2016_v15 }
 0x487   :  { %v5607_v63 = vadd.f32 %v2075_v12, %v2049_v7 }
 0x488   :  { %v1990_v21 = vpop.f32.mrf.mxu2 }
 0x489   :  { %6320 = vst [vmem:[#allocation35_spill] sm:$0xff] %v5607_v63  ;;  %v4621_v11 = vmul.f32 -1.442695, %v5607_v63  ;;  %v1991_v8 = vadd.f32 %v1990_v21, %v1960_v9 }
 0x48b   :  { %4669 = vpow2.f32 %v4621_v11  ;;  %v2022_v22 = vadd.f32 %v2021_v26, %v1991_v8 }
 0x48d   :  { %v2053_v57 = vadd.f32 %v2052_v42, %v2022_v22 }
 0x48f   :  { %v5610_v59 = vadd.f32 %v2079_v56, %v2053_v57 }
 0x491   :  { %6321 = vst [vmem:[#allocation71_spill] sm:$0xff] %v5610_v59  ;;  %v4670_v35 = vpop.eup %4669  ;;  %v4622_v60 = vmul.f32 -1.442695, %v5610_v59 }
 0x492   :  { %v2088_v49 = vadd.f32 1.0, %v4670_v35 }
 0x493   :  { %4671 = vpow2.f32 %v4622_v60 }
 0x494   :  { %4673 = vrcp.f32 %v2088_v49  ;;  %v2101_v21 = vand.u32 2147483648, %v2088_v49  ;;  %v2099_v11 = vand.u32 2147483647, %v2088_v49  ;;  %vm2095_vm5 = vweird.f32 %v2088_v49 }
 0x496   :  { %v2102_v42 = vor.u32 1.1754944e-38, %v2101_v21  ;;  %vm2100_vm7 = vcmp.eq.f32.partialorder %v2099_v11, 8.507059e+37 }
 0x499   :  { %v4672_v55 = vpop.eup %4671 }
 0x49a   :  { %v4674_v53 = vpop.eup %4673  ;;  %v2089_v39 = vadd.f32 1.0, %v4672_v55 }
 0x49b   :  { %v2091_v46 = vmul.f32 %v4674_v53, %v2088_v49  ;;  %vm2096_vm4 = vweird.f32 %v4674_v53 }
 0x49c   :  { %4675 = vrcp.f32 %v2089_v39  ;;  %vm2097_vm6 = vmor %vm2095_vm5, %vm2096_vm4  ;;  %v2116_v56 = vand.u32 2147483648, %v2089_v39  ;;  %v2114_v35 = vand.u32 2147483647, %v2089_v39  ;;  %vm2110_vm9 = vweird.f32 %v2089_v39 }
 0x49d   :  { %v2092_v12 = vsub.f32 1.0, %v2091_v46 }
 0x49e   :  { %v2117_v49 = vor.u32 1.1754944e-38, %v2116_v56  ;;  %vm2115_vm11 = vcmp.eq.f32.partialorder %v2114_v35, 8.507059e+37  ;;  %v6327_v56 = vld [vmem:[#allocation11_spill] sm:$0xff] }
 0x49f   :  { %v2093_v9 = vmul.f32 %v4674_v53, %v2092_v12 }
 0x4a1   :  { %v2094_v8 = vadd.f32 %v4674_v53, %v2093_v9 }
 0x4a2   :  { %v4676_v26 = vpop.eup %4675 }
 0x4a3   :  { %v2098_v38 = vsel %vm2097_vm6, %v4674_v53, %v2094_v8  ;;  %v2106_v15 = vmul.f32 %v4676_v26, %v2089_v39  ;;  %vm2111_vm8 = vweird.f32 %v4676_v26 }
 0x4a4   :  { %v5613_v7 = vsel %vm2100_vm7, %v2102_v42, %v2098_v38  ;;  %vm2112_vm10 = vmor %vm2110_vm9, %vm2111_vm8  ;;  %v6325_v42 = vld [vmem:[#allocation14_spill] sm:$0xff] }
 0x4a5   :  { %6322 = vst [vmem:[#allocation72_spill] sm:$0xff] %v5613_v7  ;;  %2122 = vrot.lane.b32.xlu2 %v5613_v7, %s4813_s26  ;;  %v2107_v22 = vsub.f32 1.0, %v2106_v15  ;;  %v6326_v15 = vand.u32 4294901760, %v5538_v33 }
 0x4a7   :  { %v2108_v57 = vmul.f32 %v4676_v26, %v2107_v22 }
 0x4a9   :  { %v2109_v60 = vadd.f32 %v4676_v26, %v2108_v57  ;;  %v6328_v57 = vld [vmem:[#allocation12_spill] sm:$0xff] }
 0x4aa   :  { %v530_v35 = vadd.f32 %v6328_v57, %v6327_v56  ;;  %v6335_v56 = vld [vmem:[#allocation41_spill] sm:$0xff] }
 0x4ab   :  { %v2113_v55 = vsel %vm2112_vm10, %v4676_v26, %v2109_v60  ;;  %v6324_v26 = vld [vmem:[#allocation13_spill] sm:$0xff] }
 0x4ac   :  { %v5617_v46 = vsel %vm2115_vm11, %v2117_v49, %v2113_v55  ;;  %v534_v38 = vadd.f32 %v6325_v42, %v6324_v26  ;;  %v6329_v49 = vand.u32 4294901760, %v5543_v41 }
 0x4ad   :  { %6323 = vst [vmem:[#allocation73_spill] sm:$0xff] %v5617_v46  ;;  %2124 = vrot.lane.b32.xlu2 %v5617_v46, %s4813_s26 }
 0x4ff   :  { %v2123_v53 = vpop.permute.xlu2 %2122 }
 0x500   :  { %v2128_v12 = vmul.f32 %v5359_v34, %v2123_v53 }
 0x502   :  { %v2131_v21 = vsel %vm63_vm0, %v2128_v12, 0  ;;  %v6330_v12 = vld [vmem:[#allocation25_spill] sm:$0xff] }
 0x503   :  { %v2156_v9 = vand.u32 4294901760, %v2131_v21 }
 0x505   :  { %v2157_v11 = vsub.f32 %v2131_v21, %v2156_v9  ;;  %2210 = vmatmul.f32.vlgmr.msra.gmra.mxu3 %v2156_v9  ;;  %v619_v21 = vadd.f32 %v6330_v12, %v534_v38  ;;  %v6334_v38 = vld [vmem:[#allocation45_spill] sm:$0xff] }
 0x506   :  { %2502 = vmatpush.msra.mxu3 %v5527_v5 }
 0x507   :  { %v2158_v39 = vand.u32 4294901760, %v2157_v11  ;;  %2244 = vmatmul.f32.vlgmr.msra.gmra.mxu0 %v2157_v11  ;;  %v2125_v8 = vpop.permute.xlu2 %2124 }
 0x508   :  { %2504 = vmatpush.msra.mxu3 %v5532_v58  ;;  %2535 = vmatpush.msra.mxu0 %v6326_v15  ;;  %v2129_v34 = vmul.f32 %v5364_v62, %v2125_v8  ;;  %v6331_v62 = vld [vmem:[#allocation23_spill] sm:$0xff]  ;;  %v6332_v8 = vld [vmem:[#allocation26_spill] sm:$0xff]  ;;  %v6333_v15 = vld [vmem:[#allocation24_spill] sm:$0xff] }
 0x509   :  { %v2159_v22 = vsub.f32 %v2157_v11, %v2158_v39  ;;  %2276 = vmatmul.f32.vlgmr.msra.gmra.mxu1 %v2158_v39  ;;  %v614_v11 = vadd.f32 %v6331_v62, %v530_v35  ;;  %v717_v42 = vadd.f32 %v6332_v8, %v619_v21 }
 0x50a   :  { %v2134_v60 = vsel %vm63_vm0, %v2129_v34, 0  ;;  %2539 = vmatpush.msra.mxu0 %v6329_v49  ;;  %2564 = vmatpush.msra.mxu1 %v5527_v5 }
 0x50b   :  { %v2160_v55 = vand.u32 4294901760, %v2159_v22  ;;  %v2164_v53 = vand.u32 4294901760, %v2134_v60  ;;  %v711_v34 = vadd.f32 %v6333_v15, %v614_v11  ;;  %v801_v22 = vadd.f32 %v6334_v38, %v717_v42 }
 0x50c   :  { %2566 = vmatpush.msra.mxu1 %v5532_v58 }
 0x50d   :  { %v2165_v26 = vsub.f32 %v2134_v60, %v2164_v53  ;;  %2161 = vmatmul.f32.vlgmr.msra.gmra.mxu2 %v2160_v55  ;;  %2214 = vmatmul.f32.gmra.mxu3 %v2164_v53  ;;  %v797_v57 = vadd.f32 %v6335_v56, %v711_v34  ;;  %v6336_v60 = vld [vmem:[#allocation48_spill] sm:$0xff] }
 0x50e   :  { %2472 = vmatpush.msra.mxu2 %v5538_v33  ;;  %v875_v49 = vadd.f32 %v6336_v60, %v801_v22  ;;  %v6337_v33 = vld [vmem:[#allocation42_spill] sm:$0xff] }
 0x50f   :  { %2249 = vmatmul.f32.gmra.mxu0 %v2165_v26  ;;  %v2166_v39 = vand.u32 4294901760, %v2165_v26  ;;  %v871_v35 = vadd.f32 %v6337_v33, %v797_v57 }
 0x510   :  { %2475 = vmatpush.msra.mxu2 %v5543_v41  ;;  %v5649_v41 = vand.u32 4294901760, %v875_v49 }
 0x511   :  { %2282 = vmatmul.f32.gmra.mxu1 %v2166_v39  ;;  %v2167_v5 = vsub.f32 %v2165_v26, %v2166_v39  ;;  %v5654_v55 = vand.u32 4294901760, %v871_v35 }
 0x512   :  { %v5660_v12 = vsub.f32 %v875_v49, %v5649_v41 }
 0x513   :  { %v2168_v58 = vand.u32 4294901760, %v2167_v5  ;;  %v5665_v21 = vsub.f32 %v871_v35, %v5654_v55 }
 0x514   :  { %v6234_v26 = vand.u32 4294901760, %v5660_v12 }
 0x515   :  { %2169 = vmatmul.f32.gmra.mxu2 %v2168_v58  ;;  %2344 = vmatmul.f32.vlgmr.msrb.gmra.mxu3 %v2156_v9 }
 0x516   :  { %2684 = vmatpush.msrb.mxu3 %v5274_v19  ;;  %v2932_v62 = vsub.f32 %v5660_v12, %v6234_v26 }
 0x517   :  { %2409 = vmatmul.f32.vlgmr.msrb.gmra.mxu0 %v5160_v51 }
 0x518   :  { %2726 = vmatpush.msrb.mxu0 %v5264_v6  ;;  %2690 = vmatpush.msrb.mxu3 %v5326_v13  ;;  %v2933_v39 = vand.u32 4294901760, %v2932_v62 }
 0x519   :  { %2448 = vmatmul.f32.vlgmr.msrb.gmra.mxu1 %v5141_v16 }
 0x51a   :  { %2729 = vmatpush.msrb.mxu0 %v5295_v24  ;;  %2760 = vmatpush.msrb.mxu1 %v5259_v4 }
 0x51b   :  { %2696 = vmatpush.msrb.mxu3 %v5336_v43 }
 0x51c   :  { %2732 = vmatpush.msrb.mxu0 %v5308_v3  ;;  %2762 = vmatpush.msrb.mxu1 %v5289_v28 }
 0x51d   :  { %2315 = vmatmul.f32.vlgmr.msrb.gmra.mxu2 %v2156_v9  ;;  %2348 = vmatmul.f32.gmra.mxu3 %v2164_v53  ;;  %v6233_v9 = vand.u32 4294901760, %v5665_v21 }
 0x51e   :  { %2735 = vmatpush.msrb.mxu0 %v5320_v52  ;;  %2764 = vmatpush.msrb.mxu1 %v5297_v32 }
 0x51f   :  { %2417 = vmatmul.f32.gmra.mxu0 %v5170_v48  ;;  %2702 = vmatpush.msrb.mxu3 %v5344_v27  ;;  %v2938_v11 = vsub.f32 %v5665_v21, %v6233_v9 }
 0x520   :  { %2766 = vmatpush.msrb.mxu1 %v5310_v25  ;;  %2643 = vmatpush.msrb.mxu2 %v5259_v4 }
 0x521   :  { %2452 = vmatmul.f32.gmra.mxu1 %v5153_v31 }
 0x522   :  { %2645 = vmatpush.msrb.mxu2 %v5289_v28 }
 0x524   :  { %2647 = vmatpush.msrb.mxu2 %v5297_v32 }
 0x525   :  { %2319 = vmatmul.f32.gmra.mxu2 %v2164_v53  ;;  %2508 = vmatmul.f32.vlgmr.msra.gmra.mxu3 %v5151_v30  ;;  %v2939_v53 = vand.u32 4294901760, %v2938_v11 }
 0x526   :  { %2830 = vmatpush.msra.mxu3 %v5259_v4  ;;  %2649 = vmatpush.msrb.mxu2 %v5310_v25 }
 0x527   :  { %2541 = vmatmul.f32.vlgmr.msra.gmra.mxu0 %v5141_v16 }
 0x528   :  { %2895 = vmatpush.msra.mxu0 %v5649_v41  ;;  %2832 = vmatpush.msra.mxu3 %v5289_v28 }
 0x529   :  { %2568 = vmatmul.f32.vlgmr.msra.gmra.mxu1 %v5141_v16 }
 0x52a   :  { %2897 = vmatpush.msra.mxu0 %v5654_v55  ;;  %2934 = vmatpush.msra.mxu1 %v2933_v39 }
 0x52b   :  { %2834 = vmatpush.msra.mxu3 %v5297_v32 }
 0x52c   :  { %2940 = vmatpush.msra.mxu1 %v2939_v53 }
 0x52d   :  { %2478 = vmatmul.f32.vlgmr.msra.gmra.mxu2 %v5147_v23  ;;  %2514 = vmatmul.f32.gmra.mxu3 %v5163_v47 }
 0x52e   :  { %2836 = vmatpush.msra.mxu3 %v5310_v25  ;;  %2795 = vmatpush.msra.mxu2 %v5270_v0 }
 0x52f   :  { %2545 = vmatmul.f32.gmra.mxu0 %v5153_v31 }
 0x530   :  { %2799 = vmatpush.msra.mxu2 %v5305_v61 }
 0x531   :  { %2572 = vmatmul.f32.gmra.mxu1 %v5153_v31 }
 0x532   :  { %2803 = vmatpush.msra.mxu2 %v5317_v2 }
 0x534   :  { %2807 = vmatpush.msra.mxu2 %v5331_v20 }
 0x535   :  { %2483 = vmatmul.f32.gmra.mxu2 %v5158_v44 }
 0x584   :  { %v5705_v42 = vpop.f32.mrf.mxu0 }
 0x585   :  { %6339 = vst [vmem:[#allocation14_spill] sm:$0xff] %v5705_v42 }
 0x586   :  { %v5707_v5 = vpop.f32.mrf.mxu1 }
 0x587   :  { %6340 = vst [vmem:[#allocation11_spill] sm:$0xff] %v5707_v5 }
 0x588   :  { %v5703_v8 = vpop.f32.mrf.mxu3 }
 0x589   :  { %6338 = vst [vmem:[#allocation13_spill] sm:$0xff] %v5703_v8 }
 0x58c   :  { %v5713_v38 = vpop.f32.mrf.mxu0 }
 0x58d   :  { %6343 = vst [vmem:[#allocation23_spill] sm:$0xff] %v5713_v38 }
 0x58e   :  { %v5715_v22 = vpop.f32.mrf.mxu1 }
 0x58f   :  { %6344 = vst [vmem:[#allocation26_spill] sm:$0xff] %v5715_v22 }
 0x590   :  { %v5709_v15 = vpop.f32.mrf.mxu2  ;;  %v5711_v34 = vpop.f32.mrf.mxu3 }
 0x591   :  { %6341 = vst [vmem:[#allocation12_spill] sm:$0xff] %v5709_v15 }
 0x592   :  { %6342 = vst [vmem:[#allocation25_spill] sm:$0xff] %v5711_v34 }
 0x594   :  { %v2410_v57 = vpop.f32.mrf.mxu0 }
 0x595   :  { %v2411_v39 = vadd.f32 %v2410_v57, %v6319_v37 }
 0x596   :  { %v2449_v60 = vpop.f32.mrf.mxu1 }
 0x597   :  { %v2450_v9 = vadd.f32 %v2449_v60, %v2411_v39 }
 0x598   :  { %v5717_v58 = vpop.f32.mrf.mxu2  ;;  %v5719_v56 = vpop.f32.mrf.mxu3 }
 0x599   :  { %6345 = vst [vmem:[#allocation24_spill] sm:$0xff] %v5717_v58 }
 0x59a   :  { %6346 = vst [vmem:[#allocation45_spill] sm:$0xff] %v5719_v56 }
 0x59c   :  { %v2418_v35 = vpop.f32.mrf.mxu0 }
 0x59d   :  { %v2419_v63 = vadd.f32 %v2418_v35, %v5250_v18 }
 0x59e   :  { %v2453_v11 = vpop.f32.mrf.mxu1 }
 0x59f   :  { %v2454_v34 = vadd.f32 %v2453_v11, %v2419_v63 }
 0x5a0   :  { %v5721_v49 = vpop.f32.mrf.mxu2  ;;  %v5723_v33 = vpop.f32.mrf.mxu3 }
 0x5a1   :  { %6347 = vst [vmem:[#allocation41_spill] sm:$0xff] %v5721_v49 }
 0x5a2   :  { %6348 = vst [vmem:[#allocation48_spill] sm:$0xff] %v5723_v33 }
 0x5a4   :  { %v2542_v46 = vpop.f32.mrf.mxu0 }
 0x5a6   :  { %v2569_v59 = vpop.f32.mrf.mxu1 }
 0x5a8   :  { %v5725_v62 = vpop.f32.mrf.mxu2  ;;  %v2509_v53 = vpop.f32.mrf.mxu3 }
 0x5a9   :  { %6349 = vst [vmem:[#allocation42_spill] sm:$0xff] %v5725_v62 }
 0x5ac   :  { %v2546_v5 = vpop.f32.mrf.mxu0 }
 0x5ae   :  { %v2573_v60 = vpop.f32.mrf.mxu1 }
 0x5b0   :  { %v2479_v26 = vpop.f32.mrf.mxu2  ;;  %v2515_v56 = vpop.f32.mrf.mxu3 }
 0x5b1   :  { %v2480_v7 = vadd.f32 %v2479_v26, %v2450_v9 }
 0x5b3   :  { %v2510_v22 = vadd.f32 %v2509_v53, %v2480_v7 }
 0x5b5   :  { %v2543_v38 = vadd.f32 %v2542_v46, %v2510_v22 }
 0x5b7   :  { %v5729_v58 = vadd.f32 %v2569_v59, %v2543_v38 }
 0x5b8   :  { %v2484_v33 = vpop.f32.mrf.mxu2 }
 0x5b9   :  { %6350 = vst [vmem:[#allocation74_spill] sm:$0xff] %v5729_v58  ;;  %v4624_v62 = vmul.f32 -1.442695, %v5729_v58  ;;  %v2485_v49 = vadd.f32 %v2484_v33, %v2454_v34 }
 0x5bb   :  { %4677 = vpow2.f32 %v4624_v62  ;;  %v2516_v57 = vadd.f32 %v2515_v56, %v2485_v49 }
 0x5bd   :  { %v2547_v39 = vadd.f32 %v2546_v5, %v2516_v57 }
 0x5bf   :  { %v5732_v42 = vadd.f32 %v2573_v60, %v2547_v39 }
 0x5c1   :  { %6351 = vst [vmem:[#allocation75_spill] sm:$0xff] %v5732_v42  ;;  %v4678_v26 = vpop.eup %4677  ;;  %v4625_v9 = vmul.f32 -1.442695, %v5732_v42 }
 0x5c2   :  { %v2582_v7 = vadd.f32 1.0, %v4678_v26 }
 0x5c3   :  { %4679 = vpow2.f32 %v4625_v9 }
 0x5c4   :  { %4681 = vrcp.f32 %v2582_v7  ;;  %v2595_v34 = vand.u32 2147483648, %v2582_v7  ;;  %v2593_v56 = vand.u32 2147483647, %v2582_v7  ;;  %vm2589_vm13 = vweird.f32 %v2582_v7 }
 0x5c6   :  { %v2596_v35 = vor.u32 1.1754944e-38, %v2595_v34  ;;  %vm2594_vm15 = vcmp.eq.f32.partialorder %v2593_v56, 8.507059e+37 }
 0x5c9   :  { %v4680_v63 = vpop.eup %4679 }
 0x5ca   :  { %v4682_v59 = vpop.eup %4681  ;;  %v2583_v46 = vadd.f32 1.0, %v4680_v63 }
 0x5cb   :  { %v2585_v38 = vmul.f32 %v4682_v59, %v2582_v7  ;;  %vm2590_vm12 = vweird.f32 %v4682_v59 }
 0x5cc   :  { %4683 = vrcp.f32 %v2583_v46  ;;  %vm2591_vm14 = vmor %vm2589_vm13, %vm2590_vm12  ;;  %v2610_v60 = vand.u32 2147483648, %v2583_v46  ;;  %v2608_v26 = vand.u32 2147483647, %v2583_v46  ;;  %vm2604_vm2 = vweird.f32 %v2583_v46 }
 0x5cd   :  { %v2586_v22 = vsub.f32 1.0, %v2585_v38 }
 0x5ce   :  { %v2611_v7 = vor.u32 1.1754944e-38, %v2610_v60  ;;  %vm2609_vm4 = vcmp.eq.f32.partialorder %v2608_v26, 8.507059e+37 }
 0x5cf   :  { %v2587_v33 = vmul.f32 %v4682_v59, %v2586_v22  ;;  %v5743_v22 = vld [vmem:[#allocation6] sm:$0xff] }
 0x5d1   :  { %v2588_v49 = vadd.f32 %v4682_v59, %v2587_v33 }
 0x5d2   :  { %v4684_v5 = vpop.eup %4683 }
 0x5d3   :  { %v2592_v62 = vsel %vm2591_vm14, %v4682_v59, %v2588_v49  ;;  %v2600_v11 = vmul.f32 %v4684_v5, %v2583_v46  ;;  %vm2605_vm1 = vweird.f32 %v4684_v5 }
 0x5d4   :  { %v5735_v53 = vsel %vm2594_vm15, %v2596_v35, %v2592_v62  ;;  %vm2606_vm3 = vmor %vm2604_vm2, %vm2605_vm1  ;;  %v6354_v35 = vld [vmem:[#allocation17_spill] sm:$0xff]  ;;  %v6355_v62 = vld [vmem:[#allocation18_spill] sm:$0xff] }
 0x5d5   :  { %6352 = vst [vmem:[#allocation76_spill] sm:$0xff] %v5735_v53  ;;  %2616 = vrot.lane.b32.xlu0 %v5735_v53, %s4813_s26  ;;  %v2601_v57 = vsub.f32 1.0, %v2600_v11  ;;  %v542_v11 = vadd.f32 %v6355_v62, %v6354_v35 }
 0x5d7   :  { %v2602_v39 = vmul.f32 %v4684_v5, %v2601_v57  ;;  %v5750_v57 = vld [vmem:[#allocation6 + $0x8] sm:$0xff] }
 0x5d9   :  { %v2603_v9 = vadd.f32 %v4684_v5, %v2602_v39  ;;  %v6356_v39 = vand.u32 4294901760, %v5660_v12 }
 0x5db   :  { %v2607_v63 = vsel %vm2606_vm3, %v4684_v5, %v2603_v9  ;;  %v6357_v9 = vld [vmem:[#allocation15_spill] sm:$0xff] }
 0x5dc   :  { %v5739_v38 = vsel %vm2609_vm4, %v2611_v7, %v2607_v63  ;;  %v6358_v7 = vld [vmem:[#allocation16_spill] sm:$0xff] }
 0x5dd   :  { %6353 = vst [vmem:[#allocation77_spill] sm:$0xff] %v5739_v38  ;;  %2618 = vrot.lane.b32.xlu1 %v5739_v38, %s4813_s26  ;;  %v538_v63 = vadd.f32 %v6358_v7, %v6357_v9 }
 0x647   :  { %v2617_v59 = vpop.permute.xlu0 %2616 }
 0x648   :  { %v2622_v34 = vmul.f32 %v5743_v22, %v2617_v59 }
 0x64a   :  { %v2625_v33 = vsel %vm63_vm0, %v2622_v34, 0  ;;  %v6359_v34 = vand.u32 4294901760, %v5665_v21 }
 0x64b   :  { %v2650_v56 = vand.u32 4294901760, %v2625_v33 }
 0x64d   :  { %v2651_v49 = vsub.f32 %v2625_v33, %v2650_v56  ;;  %2704 = vmatmul.f32.vlgmr.msrb.gmra.mxu3 %v2650_v56 }
 0x64e   :  { %2996 = vmatpush.msrb.mxu3 %v5649_v41 }
 0x64f   :  { %v2652_v46 = vand.u32 4294901760, %v2651_v49  ;;  %v2619_v5 = vpop.permute.xlu1 %2618  ;;  %2738 = vmatmul.f32.vlgmr.msrb.gmra.mxu0 %v2651_v49 }
 0x650   :  { %v2623_v60 = vmul.f32 %v5750_v57, %v2619_v5  ;;  %2998 = vmatpush.msrb.mxu3 %v5654_v55  ;;  %3029 = vmatpush.msrb.mxu0 %v6356_v39  ;;  %v6360_v5 = vld [vmem:[#allocation29_spill] sm:$0xff]  ;;  %v6362_v39 = vld [vmem:[#allocation30_spill] sm:$0xff] }
 0x651   :  { %v2653_v26 = vsub.f32 %v2651_v49, %v2652_v46  ;;  %2770 = vmatmul.f32.vlgmr.msrb.gmra.mxu1 %v2652_v46  ;;  %v629_v62 = vadd.f32 %v6360_v5, %v542_v11  ;;  %v6361_v49 = vld [vmem:[#allocation27_spill] sm:$0xff]  ;;  %v6366_v5 = vld [vmem:[#allocation56_spill] sm:$0xff] }
 0x652   :  { %v2628_v59 = vsel %vm63_vm0, %v2623_v60, 0  ;;  %3033 = vmatpush.msrb.mxu0 %v6359_v34  ;;  %3058 = vmatpush.msrb.mxu1 %v5649_v41  ;;  %v624_v46 = vadd.f32 %v6361_v49, %v538_v63  ;;  %v6364_v11 = vld [vmem:[#allocation55_spill] sm:$0xff] }
 0x653   :  { %v2654_v33 = vand.u32 4294901760, %v2653_v26  ;;  %v2658_v35 = vand.u32 4294901760, %v2628_v59  ;;  %v729_v9 = vadd.f32 %v6362_v39, %v629_v62  ;;  %v6363_v26 = vld [vmem:[#allocation28_spill] sm:$0xff] }
 0x654   :  { %3060 = vmatpush.msrb.mxu1 %v5654_v55  ;;  %v723_v7 = vadd.f32 %v6363_v26, %v624_v46 }
 0x655   :  { %v2659_v38 = vsub.f32 %v2628_v59, %v2658_v35  ;;  %2655 = vmatmul.f32.vlgmr.msrb.gmra.mxu2 %v2654_v33  ;;  %2708 = vmatmul.f32.gmra.mxu3 %v2658_v35  ;;  %v809_v34 = vadd.f32 %v6364_v11, %v729_v9  ;;  %v6365_v59 = vld [vmem:[#allocation49_spill] sm:$0xff] }
 0x656   :  { %2966 = vmatpush.msrb.mxu2 %v5660_v12  ;;  %v805_v33 = vadd.f32 %v6365_v59, %v723_v7  ;;  %v6367_v12 = vld [vmem:[#allocation52_spill] sm:$0xff] }
 0x657   :  { %2743 = vmatmul.f32.gmra.mxu0 %v2659_v38  ;;  %v2660_v60 = vand.u32 4294901760, %v2659_v38  ;;  %v883_v53 = vadd.f32 %v6366_v5, %v809_v34 }
 0x658   :  { %2969 = vmatpush.msrb.mxu2 %v5665_v21  ;;  %v879_v63 = vadd.f32 %v6367_v12, %v805_v33 }
 0x659   :  { %2776 = vmatmul.f32.gmra.mxu1 %v2660_v60  ;;  %v2661_v41 = vsub.f32 %v2659_v38, %v2660_v60  ;;  %v5775_v21 = vand.u32 4294901760, %v883_v53 }
 0x65a   :  { %v5780_v38 = vand.u32 4294901760, %v879_v63 }
 0x65b   :  { %v2662_v55 = vand.u32 4294901760, %v2661_v41  ;;  %v5786_v62 = vsub.f32 %v883_v53, %v5775_v21 }
 0x65c   :  { %v5791_v49 = vsub.f32 %v879_v63, %v5780_v38 }
 0x65d   :  { %2663 = vmatmul.f32.gmra.mxu2 %v2662_v55  ;;  %2838 = vmatmul.f32.vlgmr.msra.gmra.mxu3 %v2650_v56  ;;  %v6246_v53 = vand.u32 4294901760, %v5786_v62 }
 0x65e   :  { %3178 = vmatpush.msra.mxu3 %v5274_v19 }
 0x65f   :  { %2903 = vmatmul.f32.vlgmr.msra.gmra.mxu0 %v5160_v51  ;;  %v3426_v46 = vsub.f32 %v5786_v62, %v6246_v53 }
 0x660   :  { %3220 = vmatpush.msra.mxu0 %v5264_v6  ;;  %3184 = vmatpush.msra.mxu3 %v5326_v13 }
 0x661   :  { %2942 = vmatmul.f32.vlgmr.msra.gmra.mxu1 %v5141_v16  ;;  %v3427_v39 = vand.u32 4294901760, %v3426_v46 }
 0x662   :  { %3223 = vmatpush.msra.mxu0 %v5295_v24  ;;  %3254 = vmatpush.msra.mxu1 %v5259_v4 }
 0x663   :  { %3190 = vmatpush.msra.mxu3 %v5336_v43 }
 0x664   :  { %3226 = vmatpush.msra.mxu0 %v5308_v3  ;;  %3256 = vmatpush.msra.mxu1 %v5289_v28 }
 0x665   :  { %2809 = vmatmul.f32.vlgmr.msra.gmra.mxu2 %v2650_v56  ;;  %2842 = vmatmul.f32.gmra.mxu3 %v2658_v35  ;;  %v6245_v56 = vand.u32 4294901760, %v5791_v49 }
 0x666   :  { %3229 = vmatpush.msra.mxu0 %v5320_v52  ;;  %3258 = vmatpush.msra.mxu1 %v5297_v32 }
 0x667   :  { %2911 = vmatmul.f32.gmra.mxu0 %v5170_v48  ;;  %3196 = vmatpush.msra.mxu3 %v5344_v27  ;;  %v3432_v60 = vsub.f32 %v5791_v49, %v6245_v56 }
 0x668   :  { %3260 = vmatpush.msra.mxu1 %v5310_v25  ;;  %3137 = vmatpush.msra.mxu2 %v5259_v4 }
 0x669   :  { %2946 = vmatmul.f32.gmra.mxu1 %v5153_v31 }
 0x66a   :  { %3139 = vmatpush.msra.mxu2 %v5289_v28 }
 0x66c   :  { %3141 = vmatpush.msra.mxu2 %v5297_v32 }
 0x66d   :  { %2813 = vmatmul.f32.gmra.mxu2 %v2658_v35  ;;  %3002 = vmatmul.f32.vlgmr.msrb.gmra.mxu3 %v5151_v30  ;;  %v3433_v35 = vand.u32 4294901760, %v3432_v60 }
 0x66e   :  { %3324 = vmatpush.msrb.mxu3 %v5259_v4  ;;  %3143 = vmatpush.msra.mxu2 %v5310_v25 }
 0x66f   :  { %3035 = vmatmul.f32.vlgmr.msrb.gmra.mxu0 %v5141_v16 }
 0x670   :  { %3389 = vmatpush.msrb.mxu0 %v5775_v21  ;;  %3326 = vmatpush.msrb.mxu3 %v5289_v28 }
 0x671   :  { %3062 = vmatmul.f32.vlgmr.msrb.gmra.mxu1 %v5141_v16 }
 0x672   :  { %3391 = vmatpush.msrb.mxu0 %v5780_v38  ;;  %3428 = vmatpush.msrb.mxu1 %v3427_v39 }
 0x673   :  { %3328 = vmatpush.msrb.mxu3 %v5297_v32 }
 0x674   :  { %3434 = vmatpush.msrb.mxu1 %v3433_v35 }
 0x675   :  { %2972 = vmatmul.f32.vlgmr.msrb.gmra.mxu2 %v5147_v23  ;;  %3008 = vmatmul.f32.gmra.mxu3 %v5163_v47 }
 0x676   :  { %3330 = vmatpush.msrb.mxu3 %v5310_v25  ;;  %3289 = vmatpush.msrb.mxu2 %v5270_v0 }
 0x677   :  { %3039 = vmatmul.f32.gmra.mxu0 %v5153_v31 }
 0x678   :  { %3293 = vmatpush.msrb.mxu2 %v5305_v61 }
 0x679   :  { %3066 = vmatmul.f32.gmra.mxu1 %v5153_v31 }
 0x67a   :  { %3297 = vmatpush.msrb.mxu2 %v5317_v2 }
 0x67c   :  { %3301 = vmatpush.msrb.mxu2 %v5331_v20 }
 0x67d   :  { %2977 = vmatmul.f32.gmra.mxu2 %v5158_v44 }
 0x6cc   :  { %v2739_v41 = vpop.f32.mrf.mxu0 }
 0x6ce   :  { %v2771_v26 = vpop.f32.mrf.mxu1 }
 0x6d0   :  { %v2705_v9 = vpop.f32.mrf.mxu3 }
 0x6d4   :  { %v2744_v59 = vpop.f32.mrf.mxu0 }
 0x6d6   :  { %v2777_v5 = vpop.f32.mrf.mxu1 }
 0x6d8   :  { %v2656_v7 = vpop.f32.mrf.mxu2  ;;  %v2709_v34 = vpop.f32.mrf.mxu3 }
 0x6d9   :  { %v2706_v11 = vadd.f32 %v2705_v9, %v2656_v7 }
 0x6db   :  { %v2740_v55 = vadd.f32 %v2739_v41, %v2706_v11 }
 0x6dc   :  { %v2904_v35 = vpop.f32.mrf.mxu0 }
 0x6dd   :  { %v2772_v33 = vadd.f32 %v2771_v26, %v2740_v55  ;;  %v2905_v41 = vadd.f32 %v2904_v35, %v6319_v37 }
 0x6de   :  { %v2943_v56 = vpop.f32.mrf.mxu1 }
 0x6e0   :  { %v2664_v12 = vpop.f32.mrf.mxu2  ;;  %v2839_v60 = vpop.f32.mrf.mxu3 }
 0x6e1   :  { %v2710_v63 = vadd.f32 %v2709_v34, %v2664_v12  ;;  %v2944_v34 = vadd.f32 %v2943_v56, %v2905_v41 }
 0x6e3   :  { %v2745_v46 = vadd.f32 %v2744_v59, %v2710_v63 }
 0x6e4   :  { %v2912_v15 = vpop.f32.mrf.mxu0 }
 0x6e5   :  { %v2778_v39 = vadd.f32 %v2777_v5, %v2745_v46  ;;  %v2913_v63 = vadd.f32 %v2912_v15, %v5250_v18 }
 0x6e6   :  { %v2947_v7 = vpop.f32.mrf.mxu1 }
 0x6e8   :  { %v2810_v53 = vpop.f32.mrf.mxu2  ;;  %v2843_v8 = vpop.f32.mrf.mxu3 }
 0x6e9   :  { %v2811_v42 = vadd.f32 %v2810_v53, %v2772_v33  ;;  %v2948_v33 = vadd.f32 %v2947_v7, %v2913_v63 }
 0x6eb   :  { %v5829_v58 = vadd.f32 %v2839_v60, %v2811_v42 }
 0x6ec   :  { %v3036_v59 = vpop.f32.mrf.mxu0 }
 0x6ee   :  { %v3063_v12 = vpop.f32.mrf.mxu1 }
 0x6f0   :  { %v2814_v36 = vpop.f32.mrf.mxu2  ;;  %v3003_v11 = vpop.f32.mrf.mxu3 }
 0x6f1   :  { %v2815_v9 = vadd.f32 %v2814_v36, %v2778_v39 }
 0x6f3   :  { %v5832_v26 = vadd.f32 %v2843_v8, %v2815_v9 }
 0x6f4   :  { %v3040_v8 = vpop.f32.mrf.mxu0 }
 0x6f5   :  { %6368 = vst [vmem:[#allocation17_spill] sm:$0xff] %v5832_v26 }
 0x6f6   :  { %v3067_v56 = vpop.f32.mrf.mxu1 }
 0x6f8   :  { %v2973_v55 = vpop.f32.mrf.mxu2  ;;  %v3009_v36 = vpop.f32.mrf.mxu3 }
 0x6f9   :  { %v2974_v5 = vadd.f32 %v2973_v55, %v2944_v34 }
 0x6fb   :  { %v3004_v53 = vadd.f32 %v3003_v11, %v2974_v5 }
 0x6fd   :  { %v3037_v42 = vadd.f32 %v3036_v59, %v3004_v53 }
 0x6ff   :  { %v5835_v46 = vadd.f32 %v3063_v12, %v3037_v42 }
 0x700   :  { %v2978_v60 = vpop.f32.mrf.mxu2 }
 0x701   :  { %6369 = vst [vmem:[#allocation18_spill] sm:$0xff] %v5835_v46  ;;  %v4627_v39 = vmul.f32 -1.442695, %v5835_v46  ;;  %v2979_v35 = vadd.f32 %v2978_v60, %v2948_v33 }
 0x703   :  { %4685 = vpow2.f32 %v4627_v39  ;;  %v3010_v9 = vadd.f32 %v3009_v36, %v2979_v35 }
 0x705   :  { %v3041_v41 = vadd.f32 %v3040_v8, %v3010_v9 }
 0x707   :  { %v5838_v26 = vadd.f32 %v3067_v56, %v3041_v41 }
 0x709   :  { %6370 = vst [vmem:[#allocation15_spill] sm:$0xff] %v5838_v26  ;;  %v4686_v34 = vpop.eup %4685  ;;  %v4628_v15 = vmul.f32 -1.442695, %v5838_v26 }
 0x70a   :  { %v3076_v11 = vadd.f32 1.0, %v4686_v34 }
 0x70b   :  { %4687 = vpow2.f32 %v4628_v15 }
 0x70c   :  { %4689 = vrcp.f32 %v3076_v11  ;;  %v3089_v63 = vand.u32 2147483648, %v3076_v11  ;;  %v3087_v42 = vand.u32 2147483647, %v3076_v11  ;;  %vm3083_vm6 = vweird.f32 %v3076_v11 }
 0x70e   :  { %v3090_v36 = vor.u32 1.1754944e-38, %v3089_v63  ;;  %vm3088_vm8 = vcmp.eq.f32.partialorder %v3087_v42, 8.507059e+37 }
 0x711   :  { %v4688_v7 = vpop.eup %4687 }
 0x712   :  { %v4690_v55 = vpop.eup %4689  ;;  %v3077_v59 = vadd.f32 1.0, %v4688_v7 }
 0x713   :  { %v3079_v5 = vmul.f32 %v4690_v55, %v3076_v11  ;;  %vm3084_vm5 = vweird.f32 %v4690_v55 }
 0x714   :  { %4691 = vrcp.f32 %v3077_v59  ;;  %vm3085_vm7 = vmor %vm3083_vm6, %vm3084_vm5  ;;  %v3104_v56 = vand.u32 2147483648, %v3077_v59  ;;  %v3102_v34 = vand.u32 2147483647, %v3077_v59  ;;  %vm3098_vm10 = vweird.f32 %v3077_v59 }
 0x715   :  { %v3080_v12 = vsub.f32 1.0, %v3079_v5 }
 0x716   :  { %v3105_v11 = vor.u32 1.1754944e-38, %v3104_v56  ;;  %vm3103_vm12 = vcmp.eq.f32.partialorder %v3102_v34, 8.507059e+37  ;;  %v6376_v56 = vld [vmem:[#allocation22_spill] sm:$0xff] }
 0x717   :  { %v3081_v53 = vmul.f32 %v4690_v55, %v3080_v12 }
 0x719   :  { %v3082_v33 = vadd.f32 %v4690_v55, %v3081_v53 }
 0x71a   :  { %v4692_v60 = vpop.eup %4691 }
 0x71b   :  { %v3086_v39 = vsel %vm3085_vm7, %v4690_v55, %v3082_v33  ;;  %v3094_v35 = vmul.f32 %v4692_v60, %v3077_v59  ;;  %vm3099_vm9 = vweird.f32 %v4692_v60  ;;  %v6373_v33 = vand.u32 4294901760, %v5786_v62 }
 0x71c   :  { %v5841_v8 = vsel %vm3088_vm8, %v3090_v36, %v3086_v39  ;;  %vm3100_vm11 = vmor %vm3098_vm10, %vm3099_vm9  ;;  %v6374_v36 = vand.u32 4294901760, %v5791_v49 }
 0x71d   :  { %6371 = vst [vmem:[#allocation16_spill] sm:$0xff] %v5841_v8  ;;  %3110 = vrot.lane.b32.xlu2 %v5841_v8, %s4813_s26  ;;  %v3095_v9 = vsub.f32 1.0, %v3094_v35 }
 0x71f   :  { %v3096_v41 = vmul.f32 %v4692_v60, %v3095_v9  ;;  %v6375_v9 = vld [vmem:[#allocation21_spill] sm:$0xff] }
 0x721   :  { %v3097_v15 = vadd.f32 %v4692_v60, %v3096_v41  ;;  %v550_v41 = vadd.f32 %v6376_v56, %v6375_v9 }
 0x723   :  { %v3101_v7 = vsel %vm3100_vm11, %v4692_v60, %v3097_v15  ;;  %v6377_v15 = vld [vmem:[#allocation19_spill] sm:$0xff] }
 0x724   :  { %v5845_v5 = vsel %vm3103_vm12, %v3105_v11, %v3101_v7  ;;  %v6378_v11 = vld [vmem:[#allocation20_spill] sm:$0xff] }
 0x725   :  { %6372 = vst [vmem:[#allocation29_spill] sm:$0xff] %v5845_v5  ;;  %3112 = vrot.lane.b32.xlu0 %v5845_v5, %s4813_s26  ;;  %v546_v7 = vadd.f32 %v6378_v11, %v6377_v15  ;;  %v6384_v15 = vld [vmem:[#allocation59_spill] sm:$0xff] }
 0x726   :  { %v6385_v11 = vld [vmem:[#allocation63_spill] sm:$0xff] }
 0x777   :  { %v3111_v55 = vpop.permute.xlu2 %3110 }
 0x778   :  { %v3116_v12 = vmul.f32 %v5743_v22, %v3111_v55 }
 0x77a   :  { %v3119_v63 = vsel %vm63_vm0, %v3116_v12, 0  ;;  %v6379_v12 = vld [vmem:[#allocation33_spill] sm:$0xff] }
 0x77b   :  { %v3144_v53 = vand.u32 4294901760, %v3119_v63 }
 0x77d   :  { %v3145_v42 = vsub.f32 %v3119_v63, %v3144_v53  ;;  %3198 = vmatmul.f32.vlgmr.msra.gmra.mxu3 %v3144_v53  ;;  %v639_v63 = vadd.f32 %v6379_v12, %v550_v41  ;;  %v6386_v41 = vld [vmem:[#allocation60_spill] sm:$0xff] }
 0x77e   :  { %3490 = vmatpush.msra.mxu3 %v5775_v21 }
 0x77f   :  { %v3146_v59 = vand.u32 4294901760, %v3145_v42  ;;  %3232 = vmatmul.f32.vlgmr.msra.gmra.mxu0 %v3145_v42 }
 0x780   :  { %3492 = vmatpush.msra.mxu3 %v5780_v38  ;;  %3523 = vmatpush.msra.mxu0 %v6373_v33 }
 0x781   :  { %v3147_v60 = vsub.f32 %v3145_v42, %v3146_v59  ;;  %3264 = vmatmul.f32.vlgmr.msra.gmra.mxu1 %v3146_v59  ;;  %v6380_v42 = vld [vmem:[#allocation31_spill] sm:$0xff]  ;;  %v6381_v59 = vld [vmem:[#allocation34_spill] sm:$0xff] }
 0x782   :  { %3527 = vmatpush.msra.mxu0 %v6374_v36  ;;  %3552 = vmatpush.msra.mxu1 %v5775_v21  ;;  %v741_v33 = vadd.f32 %v6381_v59, %v639_v63  ;;  %v6382_v36 = vld [vmem:[#allocation32_spill] sm:$0xff] }
 0x783   :  { %v3148_v39 = vand.u32 4294901760, %v3147_v60 }
 0x784   :  { %3554 = vmatpush.msra.mxu1 %v5780_v38 }
 0x785   :  { %3149 = vmatmul.f32.vlgmr.msra.gmra.mxu2 %v3148_v39 }
 0x786   :  { %3460 = vmatpush.msra.mxu2 %v5786_v62  ;;  %v634_v62 = vadd.f32 %v6380_v42, %v546_v7 }
 0x788   :  { %3463 = vmatpush.msra.mxu2 %v5791_v49  ;;  %v735_v39 = vadd.f32 %v6382_v36, %v634_v62 }
 0x797   :  { %v3113_v35 = vpop.permute.xlu0 %3112 }
 0x798   :  { %v3117_v34 = vmul.f32 %v5750_v57, %v3113_v35  ;;  %v6383_v35 = vld [vmem:[#allocation62_spill] sm:$0xff] }
 0x799   :  { %v817_v9 = vadd.f32 %v6383_v35, %v741_v33 }
 0x79a   :  { %v3122_v55 = vsel %vm63_vm0, %v3117_v34, 0  ;;  %v813_v34 = vadd.f32 %v6384_v15, %v735_v39 }
 0x79b   :  { %v3152_v21 = vand.u32 4294901760, %v3122_v55  ;;  %v891_v5 = vadd.f32 %v6385_v11, %v817_v9 }
 0x79d   :  { %v3153_v38 = vsub.f32 %v3122_v55, %v3152_v21  ;;  %3202 = vmatmul.f32.gmra.mxu3 %v3152_v21  ;;  %v887_v55 = vadd.f32 %v6386_v41, %v813_v34  ;;  %v5877_v7 = vand.u32 4294901760, %v891_v5 }
 0x79f   :  { %3237 = vmatmul.f32.gmra.mxu0 %v3153_v38  ;;  %v3154_v49 = vand.u32 4294901760, %v3153_v38  ;;  %v5882_v12 = vand.u32 4294901760, %v887_v55  ;;  %v5888_v63 = vsub.f32 %v891_v5, %v5877_v7 }
 0x7a1   :  { %3270 = vmatmul.f32.gmra.mxu1 %v3154_v49  ;;  %v3155_v60 = vsub.f32 %v3153_v38, %v3154_v49  ;;  %v5893_v38 = vsub.f32 %v887_v55, %v5882_v12  ;;  %v6252_v5 = vand.u32 4294901760, %v5888_v63 }
 0x7a3   :  { %v3156_v56 = vand.u32 4294901760, %v3155_v60  ;;  %v3920_v42 = vsub.f32 %v5888_v63, %v6252_v5 }
 0x7a5   :  { %3157 = vmatmul.f32.gmra.mxu2 %v3156_v56  ;;  %3332 = vmatmul.f32.vlgmr.msrb.gmra.mxu3 %v3144_v53  ;;  %v3921_v49 = vand.u32 4294901760, %v3920_v42 }
 0x7a6   :  { %3672 = vmatpush.msrb.mxu3 %v5274_v19 }
 0x7a7   :  { %3397 = vmatmul.f32.vlgmr.msrb.gmra.mxu0 %v5160_v51 }
 0x7a8   :  { %3714 = vmatpush.msrb.mxu0 %v5264_v6  ;;  %3678 = vmatpush.msrb.mxu3 %v5326_v13 }
 0x7a9   :  { %3436 = vmatmul.f32.vlgmr.msrb.gmra.mxu1 %v5141_v16 }
 0x7aa   :  { %3717 = vmatpush.msrb.mxu0 %v5295_v24  ;;  %3748 = vmatpush.msrb.mxu1 %v5259_v4 }
 0x7ab   :  { %3684 = vmatpush.msrb.mxu3 %v5336_v43 }
 0x7ac   :  { %3720 = vmatpush.msrb.mxu0 %v5308_v3  ;;  %3750 = vmatpush.msrb.mxu1 %v5289_v28 }
 0x7ad   :  { %3303 = vmatmul.f32.vlgmr.msrb.gmra.mxu2 %v3144_v53  ;;  %3336 = vmatmul.f32.gmra.mxu3 %v3152_v21  ;;  %v6251_v53 = vand.u32 4294901760, %v5893_v38 }
 0x7ae   :  { %3723 = vmatpush.msrb.mxu0 %v5320_v52  ;;  %3752 = vmatpush.msrb.mxu1 %v5297_v32 }
 0x7af   :  { %3405 = vmatmul.f32.gmra.mxu0 %v5170_v48  ;;  %3690 = vmatpush.msrb.mxu3 %v5344_v27  ;;  %v3926_v62 = vsub.f32 %v5893_v38, %v6251_v53 }
 0x7b0   :  { %3754 = vmatpush.msrb.mxu1 %v5310_v25  ;;  %3631 = vmatpush.msrb.mxu2 %v5259_v4 }
 0x7b1   :  { %3440 = vmatmul.f32.gmra.mxu1 %v5153_v31 }
 0x7b2   :  { %3633 = vmatpush.msrb.mxu2 %v5289_v28 }
 0x7b4   :  { %3635 = vmatpush.msrb.mxu2 %v5297_v32 }
 0x7b5   :  { %3307 = vmatmul.f32.gmra.mxu2 %v3152_v21  ;;  %3496 = vmatmul.f32.vlgmr.msra.gmra.mxu3 %v5151_v30  ;;  %v3927_v21 = vand.u32 4294901760, %v3926_v62 }
 0x7b6   :  { %3818 = vmatpush.msra.mxu3 %v5259_v4  ;;  %3637 = vmatpush.msrb.mxu2 %v5310_v25 }
 0x7b7   :  { %3529 = vmatmul.f32.vlgmr.msra.gmra.mxu0 %v5141_v16 }
 0x7b8   :  { %3883 = vmatpush.msra.mxu0 %v5877_v7  ;;  %3820 = vmatpush.msra.mxu3 %v5289_v28 }
 0x7b9   :  { %3556 = vmatmul.f32.vlgmr.msra.gmra.mxu1 %v5141_v16 }
 0x7ba   :  { %3885 = vmatpush.msra.mxu0 %v5882_v12  ;;  %3922 = vmatpush.msra.mxu1 %v3921_v49 }
 0x7bb   :  { %3822 = vmatpush.msra.mxu3 %v5297_v32 }
 0x7bc   :  { %3928 = vmatpush.msra.mxu1 %v3927_v21 }
 0x7bd   :  { %3466 = vmatmul.f32.vlgmr.msra.gmra.mxu2 %v5147_v23  ;;  %3502 = vmatmul.f32.gmra.mxu3 %v5163_v47 }
 0x7be   :  { %3824 = vmatpush.msra.mxu3 %v5310_v25  ;;  %3783 = vmatpush.msra.mxu2 %v5270_v0 }
 0x7bf   :  { %3533 = vmatmul.f32.gmra.mxu0 %v5153_v31 }
 0x7c0   :  { %3787 = vmatpush.msra.mxu2 %v5305_v61 }
 0x7c1   :  { %3560 = vmatmul.f32.gmra.mxu1 %v5153_v31 }
 0x7c2   :  { %3791 = vmatpush.msra.mxu2 %v5317_v2 }
 0x7c4   :  { %3795 = vmatpush.msra.mxu2 %v5331_v20 }
 0x7c5   :  { %3471 = vmatmul.f32.gmra.mxu2 %v5158_v44 }
 0x7fc   :  { %v3233_v36 = vpop.f32.mrf.mxu0 }
 0x7fe   :  { %v3265_v35 = vpop.f32.mrf.mxu1 }
 0x800   :  { %v3199_v59 = vpop.f32.mrf.mxu3 }
 0x808   :  { %v3150_v33 = vpop.f32.mrf.mxu2 }
 0x809   :  { %v3200_v60 = vadd.f32 %v3199_v59, %v3150_v33 }
 0x80b   :  { %v3234_v39 = vadd.f32 %v3233_v36, %v3200_v60 }
 0x80d   :  { %v3266_v9 = vadd.f32 %v3265_v35, %v3234_v39 }
 0x81c   :  { %v3238_v15 = vpop.f32.mrf.mxu0 }
 0x81e   :  { %v3271_v34 = vpop.f32.mrf.mxu1 }
 0x820   :  { %v3203_v56 = vpop.f32.mrf.mxu3 }
 0x824   :  { %v3398_v49 = vpop.f32.mrf.mxu0 }
 0x825   :  { %v3399_v39 = vadd.f32 %v3398_v49, %v6319_v37 }
 0x826   :  { %v3437_v21 = vpop.f32.mrf.mxu1 }
 0x828   :  { %v3158_v11 = vpop.f32.mrf.mxu2  ;;  %v3333_v42 = vpop.f32.mrf.mxu3 }
 0x829   :  { %v3204_v41 = vadd.f32 %v3203_v56, %v3158_v11  ;;  %v3438_v56 = vadd.f32 %v3437_v21, %v3399_v39 }
 0x82b   :  { %v3239_v55 = vadd.f32 %v3238_v15, %v3204_v41 }
 0x82c   :  { %v3406_v59 = vpop.f32.mrf.mxu0 }
 0x82d   :  { %v3272_v62 = vadd.f32 %v3271_v34, %v3239_v55  ;;  %v3407_v55 = vadd.f32 %v3406_v59, %v5250_v18 }
 0x82e   :  { %v3441_v36 = vpop.f32.mrf.mxu1 }
 0x830   :  { %v3304_v53 = vpop.f32.mrf.mxu2  ;;  %v3337_v26 = vpop.f32.mrf.mxu3 }
 0x831   :  { %v3305_v5 = vadd.f32 %v3304_v53, %v3266_v9  ;;  %v3442_v9 = vadd.f32 %v3441_v36, %v3407_v55 }
 0x833   :  { %v5931_v8 = vadd.f32 %v3333_v42, %v3305_v5 }
 0x834   :  { %v3530_v11 = vpop.f32.mrf.mxu0 }
 0x835   :  { %6387 = vst [vmem:[#allocation27_spill] sm:$0xff] %v5931_v8 }
 0x836   :  { %v3557_v41 = vpop.f32.mrf.mxu1 }
 0x838   :  { %v3308_v33 = vpop.f32.mrf.mxu2  ;;  %v3497_v46 = vpop.f32.mrf.mxu3 }
 0x839   :  { %v3309_v60 = vadd.f32 %v3308_v33, %v3272_v62 }
 0x83b   :  { %v5934_v35 = vadd.f32 %v3337_v26, %v3309_v60 }
 0x83c   :  { %v3534_v26 = vpop.f32.mrf.mxu0 }
 0x83d   :  { %6388 = vst [vmem:[#allocation30_spill] sm:$0xff] %v5934_v35 }
 0x83e   :  { %v3561_v21 = vpop.f32.mrf.mxu1 }
 0x840   :  { %v3467_v15 = vpop.f32.mrf.mxu2  ;;  %v3503_v62 = vpop.f32.mrf.mxu3 }
 0x841   :  { %v3468_v34 = vadd.f32 %v3467_v15, %v3438_v56 }
 0x843   :  { %v3498_v53 = vadd.f32 %v3497_v46, %v3468_v34 }
 0x845   :  { %v3531_v5 = vadd.f32 %v3530_v11, %v3498_v53 }
 0x847   :  { %v5937_v42 = vadd.f32 %v3557_v41, %v3531_v5 }
 0x848   :  { %v3472_v8 = vpop.f32.mrf.mxu2 }
 0x849   :  { %v4630_v33 = vmul.f32 -1.442695, %v5937_v42  ;;  %v3473_v49 = vadd.f32 %v3472_v8, %v3442_v9 }
 0x84b   :  { %4693 = vpow2.f32 %v4630_v33  ;;  %v3504_v60 = vadd.f32 %v3503_v62, %v3473_v49 }
 0x84d   :  { %v3535_v39 = vadd.f32 %v3534_v26, %v3504_v60 }
 0x84f   :  { %v5940_v35 = vadd.f32 %v3561_v21, %v3535_v39  ;;  %v6389_v39 = vld [vmem:[#allocation43_spill] sm:$0xff] }
 0x851   :  { %v4694_v56 = vpop.eup %4693  ;;  %v4631_v59 = vmul.f32 -1.442695, %v5940_v35 }
 0x852   :  { %v3570_v46 = vadd.f32 1.0, %v4694_v56  ;;  %v6390_v56 = vld [vmem:[#allocation40_spill] sm:$0xff] }
 0x853   :  { %4695 = vpow2.f32 %v4631_v59  ;;  %v1224_v59 = vadd.f32 %v6390_v56, %v6389_v39  ;;  %v1722_v56 = vadd.f32 %v5589_v14, %v5595_v45 }
 0x854   :  { %4697 = vrcp.f32 %v3570_v46  ;;  %v3583_v8 = vand.u32 2147483648, %v3570_v46  ;;  %v3581_v53 = vand.u32 2147483647, %v3570_v46  ;;  %vm3577_vm14 = vweird.f32 %v3570_v46 }
 0x856   :  { %v3584_v62 = vor.u32 1.1754944e-38, %v3583_v8  ;;  %vm3582_vm1 = vcmp.eq.f32.partialorder %v3581_v53, 8.507059e+37 }
 0x859   :  { %v4696_v36 = vpop.eup %4695 }
 0x85a   :  { %v4698_v15 = vpop.eup %4697  ;;  %v3571_v11 = vadd.f32 1.0, %v4696_v36 }
 0x85b   :  { %v3573_v34 = vmul.f32 %v4698_v15, %v3570_v46  ;;  %vm3578_vm13 = vweird.f32 %v4698_v15  ;;  %v6391_v46 = vld [vmem:[#allocation50_spill] sm:$0xff] }
 0x85c   :  { %4699 = vrcp.f32 %v3571_v11  ;;  %vm3579_vm15 = vmor %vm3577_vm14, %vm3578_vm13  ;;  %v3598_v21 = vand.u32 2147483648, %v3571_v11  ;;  %vm3592_vm3 = vweird.f32 %v3571_v11 }
 0x85d   :  { %v3574_v41 = vsub.f32 1.0, %v3573_v34  ;;  %v3596_v34 = vand.u32 2147483647, %v3571_v11 }
 0x85f   :  { %v3575_v55 = vmul.f32 %v4698_v15, %v3574_v41  ;;  %v1258_v41 = vadd.f32 %v6391_v46, %v1224_v59  ;;  %vm3597_vm5 = vcmp.eq.f32.partialorder %v3596_v34, 8.507059e+37 }
 0x861   :  { %v3576_v5 = vadd.f32 %v4698_v15, %v3575_v55 }
 0x862   :  { %v4700_v9 = vpop.eup %4699 }
 0x863   :  { %v3580_v33 = vsel %vm3579_vm15, %v4698_v15, %v3576_v5  ;;  %v3588_v49 = vmul.f32 %v4700_v9, %v3571_v11  ;;  %vm3593_vm2 = vweird.f32 %v4700_v9  ;;  %v3599_v15 = vor.u32 1.1754944e-38, %v3598_v21  ;;  %v6392_v5 = vld [vmem:[#allocation47_spill] sm:$0xff] }
 0x864   :  { %v5943_v26 = vsel %vm3582_vm1, %v3584_v62, %v3580_v33  ;;  %vm3594_vm4 = vmor %vm3592_vm3, %vm3593_vm2  ;;  %v1290_v62 = vadd.f32 %v6392_v5, %v1258_v41  ;;  %v6393_v33 = vld [vmem:[#allocation57_spill] sm:$0xff]  ;;  %v1757_v11 = vadd.f32 %v5591_v50, %v1722_v56 }
 0x865   :  { %3604 = vrot.lane.b32.xlu1 %v5943_v26, %s4813_s26  ;;  %v3589_v60 = vsub.f32 1.0, %v3588_v49 }
 0x866   :  { %v1329_v49 = vadd.f32 %v6393_v33, %v1290_v62 }
 0x867   :  { %v3590_v36 = vmul.f32 %v4700_v9, %v3589_v60  ;;  %v6394_v60 = vld [vmem:[#allocation54_spill] sm:$0xff] }
 0x868   :  { %v1358_v39 = vadd.f32 %v6394_v60, %v1329_v49 }
 0x869   :  { %v3591_v55 = vadd.f32 %v4700_v9, %v3590_v36 }
 0x86b   :  { %v3595_v8 = vsel %vm3594_vm4, %v4700_v9, %v3591_v55  ;;  %v1790_v9 = vadd.f32 %v5593_v1, %v1757_v11 }
 0x86c   :  { %v5950_v53 = vsel %vm3597_vm5, %v3599_v15, %v3595_v8 }
 0x86d   :  { %3606 = vrot.lane.b32.xlu2 %v5950_v53, %s4813_s26  ;;  %v1827_v21 = vadd.f32 %v5603_v54, %v1790_v9 }
 0x86f   :  { %v1856_v59 = vadd.f32 %v5601_v29, %v1827_v21 }
 0x875   :  { %1366 = vrot.lane.b32.xlu2 %v1358_v39, %s4814_s9 }
 0x87d   :  { %2848 = vrot.lane.b32.xlu2 %v5829_v58, %s4814_s9  ;;  %v6395_v58 = vand.u32 4294901760, %v5888_v63 }
 0x885   :  { %1862 = vrot.lane.b32.xlu2 %v1856_v59, %s4814_s9 }
 0x8c7   :  { %v3607_v36 = vpop.permute.xlu2 %3606 }
 0x8c8   :  { %v3611_v34 = vmul.f32 %v5750_v57, %v3607_v36 }
 0x8ca   :  { %v3616_v45 = vsel %vm63_vm0, %v3611_v34, 0 }
 0x8cb   :  { %v3646_v1 = vand.u32 4294901760, %v3616_v45 }
 0x8cd   :  { %v3647_v54 = vsub.f32 %v3616_v45, %v3646_v1 }
 0x8cf   :  { %v3648_v8 = vand.u32 4294901760, %v3647_v54 }
 0x8d1   :  { %v3649_v5 = vsub.f32 %v3647_v54, %v3648_v8 }
 0x8d3   :  { %v3650_v62 = vand.u32 4294901760, %v3649_v5 }
 0x8d7   :  { %v3605_v14 = vpop.permute.xlu1 %3604 }
 0x8d8   :  { %v3610_v46 = vmul.f32 %v5743_v22, %v3605_v14  ;;  %v6396_v22 = vand.u32 4294901760, %v5893_v38 }
 0x8da   :  { %v3613_v50 = vsel %vm63_vm0, %v3610_v46, 0 }
 0x8db   :  { %v3638_v41 = vand.u32 4294901760, %v3613_v50 }
 0x8dd   :  { %v3639_v55 = vsub.f32 %v3613_v50, %v3638_v41  ;;  %3692 = vmatmul.f32.vlgmr.msrb.gmra.mxu3 %v3638_v41 }
 0x8de   :  { %3984 = vmatpush.msrb.mxu3 %v5877_v7 }
 0x8df   :  { %v3640_v29 = vand.u32 4294901760, %v3639_v55  ;;  %3726 = vmatmul.f32.vlgmr.msrb.gmra.mxu0 %v3639_v55 }
 0x8e0   :  { %3986 = vmatpush.msrb.mxu3 %v5882_v12  ;;  %4017 = vmatpush.msrb.mxu0 %v6395_v58 }
 0x8e1   :  { %v3641_v57 = vsub.f32 %v3639_v55, %v3640_v29  ;;  %3758 = vmatmul.f32.vlgmr.msrb.gmra.mxu1 %v3640_v29 }
 0x8e2   :  { %4021 = vmatpush.msrb.mxu0 %v6396_v22  ;;  %4046 = vmatpush.msrb.mxu1 %v5877_v7 }
 0x8e3   :  { %v3642_v15 = vand.u32 4294901760, %v3641_v57 }
 0x8e4   :  { %4048 = vmatpush.msrb.mxu1 %v5882_v12 }
 0x8e5   :  { %3643 = vmatmul.f32.vlgmr.msrb.gmra.mxu2 %v3642_v15  ;;  %3696 = vmatmul.f32.gmra.mxu3 %v3646_v1 }
 0x8e6   :  { %3954 = vmatpush.msrb.mxu2 %v5888_v63 }
 0x8e7   :  { %3731 = vmatmul.f32.gmra.mxu0 %v3647_v54 }
 0x8e8   :  { %3957 = vmatpush.msrb.mxu2 %v5893_v38 }
 0x8e9   :  { %3764 = vmatmul.f32.gmra.mxu1 %v3648_v8  ;;  %v1718_v8 = vadd.f32 %v5581_v40, %v5587_v17  ;;  %v6398_v40 = vld [vmem:[#allocation12_spill] sm:$0xff]  ;;  %v6399_v17 = vld [vmem:[#allocation13_spill] sm:$0xff] }
 0x8ed   :  { %3651 = vmatmul.f32.gmra.mxu2 %v3650_v62  ;;  %3826 = vmatmul.f32.vlgmr.msra.gmra.mxu3 %v3638_v41 }
 0x8ee   :  { %4166 = vmatpush.msra.mxu3 %v5274_v19 }
 0x8ef   :  { %3891 = vmatmul.f32.vlgmr.msra.gmra.mxu0 %v5160_v51 }
 0x8f0   :  { %4172 = vmatpush.msra.mxu3 %v5326_v13  ;;  %4208 = vmatpush.msra.mxu0 %v5264_v6 }
 0x8f1   :  { %3930 = vmatmul.f32.vlgmr.msra.gmra.mxu1 %v5141_v16 }
 0x8f2   :  { %4178 = vmatpush.msra.mxu3 %v5336_v43  ;;  %4211 = vmatpush.msra.mxu0 %v5295_v24 }
 0x8f3   :  { %4242 = vmatpush.msra.mxu1 %v5259_v4 }
 0x8f4   :  { %4184 = vmatpush.msra.mxu3 %v5344_v27  ;;  %4214 = vmatpush.msra.mxu0 %v5308_v3 }
 0x8f5   :  { %3797 = vmatmul.f32.vlgmr.msra.gmra.mxu2 %v3638_v41  ;;  %3830 = vmatmul.f32.gmra.mxu3 %v3646_v1 }
 0x8f6   :  { %4244 = vmatpush.msra.mxu1 %v5289_v28  ;;  %4125 = vmatpush.msra.mxu2 %v5259_v4 }
 0x8f7   :  { %3899 = vmatmul.f32.gmra.mxu0 %v5170_v48 }
 0x8f8   :  { %4217 = vmatpush.msra.mxu0 %v5320_v52  ;;  %4246 = vmatpush.msra.mxu1 %v5297_v32 }
 0x8f9   :  { %3934 = vmatmul.f32.gmra.mxu1 %v5153_v31  ;;  %4127 = vmatpush.msra.mxu2 %v5289_v28 }
 0x8fa   :  { %4248 = vmatpush.msra.mxu1 %v5310_v25 }
 0x8fb   :  { %4129 = vmatpush.msra.mxu2 %v5297_v32 }
 0x8fd   :  { %3801 = vmatmul.f32.gmra.mxu2 %v3646_v1  ;;  %3990 = vmatmul.f32.vlgmr.msrb.gmra.mxu3 %v5151_v30 }
 0x8fe   :  { %4131 = vmatpush.msra.mxu2 %v5310_v25  ;;  %4312 = vmatpush.msrb.mxu3 %v5259_v4 }
 0x8ff   :  { %4023 = vmatmul.f32.vlgmr.msrb.gmra.mxu0 %v5141_v16 }
 0x900   :  { %4314 = vmatpush.msrb.mxu3 %v5289_v28 }
 0x901   :  { %4050 = vmatmul.f32.vlgmr.msrb.gmra.mxu1 %v5141_v16 }
 0x902   :  { %4316 = vmatpush.msrb.mxu3 %v5297_v32 }
 0x904   :  { %4318 = vmatpush.msrb.mxu3 %v5310_v25 }
 0x905   :  { %3960 = vmatmul.f32.vlgmr.msrb.gmra.mxu2 %v5147_v23  ;;  %3996 = vmatmul.f32.gmra.mxu3 %v5163_v47 }
 0x906   :  { %4277 = vmatpush.msrb.mxu2 %v5270_v0 }
 0x907   :  { %4027 = vmatmul.f32.gmra.mxu0 %v5153_v31 }
 0x908   :  { %4281 = vmatpush.msrb.mxu2 %v5305_v61 }
 0x909   :  { %4054 = vmatmul.f32.gmra.mxu1 %v5153_v31 }
 0x90a   :  { %4285 = vmatpush.msrb.mxu2 %v5317_v2 }
 0x90c   :  { %4289 = vmatpush.msrb.mxu2 %v5331_v20 }
 0x90d   :  { %3965 = vmatmul.f32.gmra.mxu2 %v5158_v44 }
 0x95c   :  { %v3727_v30 = vpop.f32.mrf.mxu0 }
 0x95e   :  { %v3759_v51 = vpop.f32.mrf.mxu1 }
 0x960   :  { %v3693_v16 = vpop.f32.mrf.mxu3 }
 0x964   :  { %v3732_v6 = vpop.f32.mrf.mxu0 }
 0x966   :  { %v3765_v19 = vpop.f32.mrf.mxu1 }
 0x968   :  { %v3644_v23 = vpop.f32.mrf.mxu2  ;;  %v3697_v47 = vpop.f32.mrf.mxu3 }
 0x969   :  { %v3694_v48 = vadd.f32 %v3693_v16, %v3644_v23 }
 0x96b   :  { %v3728_v4 = vadd.f32 %v3727_v30, %v3694_v48 }
 0x96c   :  { %v3892_v3 = vpop.f32.mrf.mxu0 }
 0x96d   :  { %v3760_v0 = vadd.f32 %v3759_v51, %v3728_v4  ;;  %v3893_v12 = vadd.f32 %v3892_v3, %v6319_v37  ;;  %v1752_v51 = vadd.f32 %v5583_v10, %v1718_v8  ;;  %v6417_v8 = vld [vmem:[#allocation42_spill] sm:$0xff] }
 0x96e   :  { %v3931_v25 = vpop.f32.mrf.mxu1 }
 0x96f   :  { %v3932_v33 = vadd.f32 %v3931_v25, %v3893_v12 }
 0x970   :  { %v3652_v28 = vpop.f32.mrf.mxu2  ;;  %v3827_v31 = vpop.f32.mrf.mxu3 }
 0x971   :  { %v3698_v24 = vadd.f32 %v3697_v47, %v3652_v28 }
 0x973   :  { %v3733_v32 = vadd.f32 %v3732_v6, %v3698_v24  ;;  %v2212_v24 = vadd.f32 %v6399_v17, %v6398_v40  ;;  %v6423_v40 = vld [vmem:[#allocation65_spill] sm:$0xff] }
 0x974   :  { %v3900_v20 = vpop.f32.mrf.mxu0 }
 0x975   :  { %v3766_v61 = vadd.f32 %v3765_v19, %v3733_v32  ;;  %v3901_v11 = vadd.f32 %v3900_v20, %v5250_v18  ;;  %v6397_v19 = vld [vmem:[#allocation68_spill] sm:$0xff] }
 0x976   :  { %v3935_v7 = vpop.f32.mrf.mxu1  ;;  %v1784_v28 = vadd.f32 %v6397_v19, %v1752_v51  ;;  %v6419_v51 = vld [vmem:[#allocation17_spill] sm:$0xff] }
 0x977   :  { %v3936_v59 = vadd.f32 %v3935_v7, %v3901_v11 }
 0x978   :  { %v3798_v2 = vpop.f32.mrf.mxu2  ;;  %v3831_v13 = vpop.f32.mrf.mxu3 }
 0x979   :  { %v3799_v52 = vadd.f32 %v3798_v2, %v3760_v0  ;;  %v6401_v2 = vld [vmem:[#allocation14_spill] sm:$0xff] }
 0x97b   :  { %v6017_v44 = vadd.f32 %v3827_v31, %v3799_v52  ;;  %v6400_v31 = vld [vmem:[#allocation70_spill] sm:$0xff]  ;;  %v2246_v52 = vadd.f32 %v6401_v2, %v2212_v24 }
 0x97c   :  { %v4024_v60 = vpop.f32.mrf.mxu0 }
 0x97e   :  { %v4051_v56 = vpop.f32.mrf.mxu1 }
 0x980   :  { %v3802_v43 = vpop.f32.mrf.mxu2  ;;  %v3991_v38 = vpop.f32.mrf.mxu3 }
 0x981   :  { %v3803_v27 = vadd.f32 %v3802_v43, %v3766_v61  ;;  %v1823_v61 = vadd.f32 %v6400_v31, %v1784_v28  ;;  %v6402_v43 = vld [vmem:[#allocation69_spill] sm:$0xff]  ;;  %v6079_v31 = vld [vmem:[#allocation6] sm:$0xff] }
 0x983   :  { %v6020_v63 = vadd.f32 %v3831_v13, %v3803_v27  ;;  %v1852_v27 = vadd.f32 %v6402_v43, %v1823_v61 }
 0x984   :  { %v4028_v46 = vpop.f32.mrf.mxu0 }
 0x986   :  { %v4055_v1 = vpop.f32.mrf.mxu1 }
 0x988   :  { %v3961_v49 = vpop.f32.mrf.mxu2  ;;  %v3997_v14 = vpop.f32.mrf.mxu3 }
 0x989   :  { %v3962_v39 = vadd.f32 %v3961_v49, %v3932_v33  ;;  %v6404_v49 = vld [vmem:[#allocation46_spill] sm:$0xff] }
 0x98b   :  { %v3992_v9 = vadd.f32 %v3991_v38, %v3962_v39  ;;  %v6403_v38 = vld [vmem:[#allocation11_spill] sm:$0xff] }
 0x98c   :  { %v2278_v33 = vadd.f32 %v6403_v38, %v2246_v52 }
 0x98d   :  { %v4025_v21 = vadd.f32 %v4024_v60, %v3992_v9  ;;  %v6405_v60 = vld [vmem:[#allocation44_spill] sm:$0xff]  ;;  %v6407_v9 = vld [vmem:[#allocation53_spill] sm:$0xff] }
 0x98e   :  { %v1228_v39 = vadd.f32 %v6405_v60, %v6404_v49 }
 0x98f   :  { %v6023_v36 = vadd.f32 %v4051_v56, %v4025_v21  ;;  %v6406_v56 = vld [vmem:[#allocation41_spill] sm:$0xff] }
 0x990   :  { %v3966_v34 = vpop.f32.mrf.mxu2  ;;  %v2317_v11 = vadd.f32 %v6406_v56, %v2278_v33  ;;  %v1263_v21 = vadd.f32 %v6407_v9, %v1228_v39 }
 0x991   :  { %v4633_v45 = vmul.f32 -1.442695, %v6023_v36  ;;  %v3967_v37 = vadd.f32 %v3966_v34, %v3936_v59  ;;  %v6408_v59 = vld [vmem:[#allocation45_spill] sm:$0xff] }
 0x992   :  { %v2346_v34 = vadd.f32 %v6408_v59, %v2317_v11 }
 0x993   :  { %4701 = vpow2.f32 %v4633_v45  ;;  %v3998_v50 = vadd.f32 %v3997_v14, %v3967_v37  ;;  %v6409_v14 = vld [vmem:[#allocation51_spill] sm:$0xff]  ;;  %v6410_v37 = vld [vmem:[#allocation24_spill] sm:$0xff] }
 0x994   :  { %v1296_v45 = vadd.f32 %v6409_v14, %v1263_v21 }
 0x995   :  { %v4029_v41 = vadd.f32 %v4028_v46, %v3998_v50  ;;  %v6411_v46 = vld [vmem:[#allocation25_spill] sm:$0xff] }
 0x996   :  { %v2216_v50 = vadd.f32 %v6411_v46, %v6410_v37 }
 0x997   :  { %v6026_v55 = vadd.f32 %v4055_v1, %v4029_v41  ;;  %v6412_v1 = vld [vmem:[#allocation27_spill] sm:$0xff]  ;;  %v6413_v41 = vld [vmem:[#allocation61_spill] sm:$0xff] }
 0x999   :  { %v4702_v54 = vpop.eup %4701  ;;  %v4634_v18 = vmul.f32 -1.442695, %v6026_v55 }
 0x99a   :  { %v4064_v29 = vadd.f32 1.0, %v4702_v54  ;;  %v1333_v54 = vadd.f32 %v6413_v41, %v1296_v45 }
 0x99b   :  { %4703 = vpow2.f32 %v4634_v18  ;;  %v6414_v18 = vld [vmem:[#allocation23_spill] sm:$0xff] }
 0x99c   :  { %4705 = vrcp.f32 %v4064_v29  ;;  %v4077_v62 = vand.u32 2147483648, %v4064_v29  ;;  %v4075_v30 = vand.u32 2147483647, %v4064_v29  ;;  %vm4071_vm7 = vweird.f32 %v4064_v29 }
 0x99e   :  { %v4078_v47 = vor.u32 1.1754944e-38, %v4077_v62  ;;  %vm4076_vm9 = vcmp.eq.f32.partialorder %v4075_v30, 8.507059e+37  ;;  %v6418_v62 = vld [vmem:[#allocation48_spill] sm:$0xff]  ;;  %v1367_v30 = vpop.permute.xlu2 %1366 }
 0x9a1   :  { %v4704_v58 = vpop.eup %4703 }
 0x9a2   :  { %v4706_v57 = vpop.eup %4705  ;;  %v4065_v22 = vadd.f32 1.0, %v4704_v58  ;;  %v6415_v58 = vld [vmem:[#allocation58_spill] sm:$0xff] }
 0x9a3   :  { %v4067_v15 = vmul.f32 %v4706_v57, %v4064_v29  ;;  %vm4072_vm6 = vweird.f32 %v4706_v57  ;;  %v2251_v29 = vadd.f32 %v6414_v18, %v2216_v50 }
 0x9a4   :  { %4707 = vrcp.f32 %v4065_v22  ;;  %vm4073_vm8 = vmor %vm4071_vm7, %vm4072_vm6  ;;  %v4092_v10 = vand.u32 2147483648, %v4065_v22  ;;  %v4090_v25 = vand.u32 2147483647, %v4065_v22  ;;  %vm4086_vm11 = vweird.f32 %v4065_v22 }
 0x9a5   :  { %v4068_v5 = vsub.f32 1.0, %v4067_v15 }
 0x9a6   :  { %v4093_v20 = vor.u32 1.1754944e-38, %v4092_v10  ;;  %vm4091_vm13 = vcmp.eq.f32.partialorder %v4090_v25, 8.507059e+37 }
 0x9a7   :  { %v4069_v16 = vmul.f32 %v4706_v57, %v4068_v5 }
 0x9a9   :  { %v4070_v23 = vadd.f32 %v4706_v57, %v4069_v16 }
 0x9aa   :  { %v4708_v48 = vpop.eup %4707 }
 0x9ab   :  { %v4074_v4 = vsel %vm4073_vm8, %v4706_v57, %v4070_v23  ;;  %v4082_v6 = vmul.f32 %v4708_v48, %v4065_v22  ;;  %vm4087_vm10 = vweird.f32 %v4708_v48  ;;  %v1362_v57 = vadd.f32 %v6415_v58, %v1333_v54  ;;  %v6416_v22 = vld [vmem:[#allocation26_spill] sm:$0xff]  ;;  %v6420_v23 = vld [vmem:[#allocation36_spill] sm:$0xff] }
 0x9ac   :  { %v6032_v0 = vsel %vm4076_vm9, %v4078_v47, %v4074_v4  ;;  %vm4088_vm12 = vmor %vm4086_vm11, %vm4087_vm10  ;;  %v2284_v15 = vadd.f32 %v6416_v22, %v2251_v29  ;;  %v2849_v47 = vpop.permute.xlu2 %2848  ;;  %v6421_v4 = vld [vmem:[#allocation30_spill] sm:$0xff] }
 0x9ad   :  { %4098 = vrot.lane.b32.xlu0 %v6032_v0, %s4813_s26  ;;  %v4083_v32 = vsub.f32 1.0, %v4082_v6 }
 0x9ae   :  { %v2321_v5 = vadd.f32 %v6417_v8, %v2284_v15 }
 0x9af   :  { %v4084_v3 = vmul.f32 %v4708_v48, %v4083_v32 }
 0x9b0   :  { %v2350_v16 = vadd.f32 %v6418_v62, %v2321_v5  ;;  %v6424_v62 = vld [vmem:[#allocation64_spill] sm:$0xff] }
 0x9b1   :  { %v4085_v13 = vadd.f32 %v4708_v48, %v4084_v3 }
 0x9b3   :  { %v4089_v7 = vsel %vm4088_vm12, %v4708_v48, %v4085_v13  ;;  %v1372_v48 = vadd.f32 %v1367_v30, %v6420_v23 }
 0x9b4   :  { %v6042_v12 = vsel %vm4091_vm13, %v4093_v20, %v4089_v7  ;;  %v1863_v28 = vpop.permute.xlu2 %1862  ;;  %v6083_v20 = vld [vmem:[#allocation6 + $0x8] sm:$0xff] }
 0x9b5   :  { %4100 = vrot.lane.b32.xlu1 %v6042_v12, %s4813_s26  ;;  %1860 = vrot.lane.b32.xlu0 %v1852_v27, %s4814_s9  ;;  %4709 = vtanh.f32 %v1372_v48  ;;  %v1867_v17 = vadd.f32 %v1863_v28, %v6423_v40  ;;  %v6427_v28 = vld [vmem:[#allocation37_spill] sm:$0xff] }
 0x9bb   :  { %v4710_v19 = vpop.eup %4709 }
 0x9bd   :  { %2354 = vrot.lane.b32.xlu1 %v2346_v34, %s4814_s9  ;;  %3342 = vrot.lane.b32.xlu0 %v6412_v1, %s4814_s9 }
 0x9c5   :  { %3836 = vrot.lane.b32.xlu0 %v6017_v44, %s4814_s9  ;;  %1368 = vrot.lane.b32.xlu1 %v1362_v57, %s4814_s9  ;;  %v6422_v44 = vld [vmem:[#allocation74_spill] sm:$0xff] }
 0x9c6   :  { %v2854_v6 = vadd.f32 %v2849_v47, %v6422_v44 }
 0x9c8   :  { %4711 = vtanh.f32 %v2854_v6  ;;  %v6426_v6 = vld [vmem:[#allocation18_spill] sm:$0xff] }
 0x9c9   :  { %4713 = vtanh.f32 %v1867_v17 }
 0x9cd   :  { %2850 = vrot.lane.b32.xlu0 %v6419_v51, %s4814_s9  ;;  %2356 = vrot.lane.b32.xlu1 %v2350_v16, %s4814_s9  ;;  %v6425_v51 = vld [vmem:[#allocation35_spill] sm:$0xff] }
 0x9ce   :  { %v4712_v24 = vpop.eup %4711 }
 0x9cf   :  { %v4714_v32 = vpop.eup %4713 }
 0x9d5   :  { %3344 = vrot.lane.b32.xlu1 %v6421_v4, %s4814_s9 }
 0x9dd   :  { %1382 = vrot.lane.b32.xlu1 %v4710_v19, %s4814_s9 }
 0x9e5   :  { %2864 = vrot.lane.b32.xlu1 %v4712_v24, %s4814_s9 }
 0x9ed   :  { %1878 = vrot.lane.b32.xlu1 %v4714_v32, %s4814_s9 }
 0xa1f   :  { %v4099_v10 = vpop.permute.xlu0 %4098 }
 0xa20   :  { %v4104_v61 = vmul.f32 %v6079_v31, %v4099_v10 }
 0xa22   :  { %v4107_v3 = vsel %vm63_vm0, %v4104_v61, 0 }
 0xa23   :  { %v4132_v25 = vand.u32 4294901760, %v4107_v3 }
 0xa25   :  { %v4133_v2 = vsub.f32 %v4107_v3, %v4132_v25  ;;  %4186 = vmatmul.f32.vlgmr.msra.gmra.mxu3 %v4132_v25  ;;  %v6428_v3 = vld [vmem:[#allocation71_spill] sm:$0xff] }
 0xa27   :  { %v4134_v52 = vand.u32 4294901760, %v4133_v2  ;;  %v4101_v13 = vpop.permute.xlu1 %4100  ;;  %4220 = vmatmul.f32.vlgmr.msra.gmra.mxu0 %v4133_v2  ;;  %v1861_v46 = vpop.permute.xlu0 %1860 }
 0xa28   :  { %v4105_v43 = vmul.f32 %v6083_v20, %v4101_v13  ;;  %v1866_v16 = vadd.f32 %v1861_v46, %v6424_v62 }
 0xa29   :  { %v4135_v27 = vsub.f32 %v4133_v2, %v4134_v52  ;;  %4252 = vmatmul.f32.vlgmr.msra.gmra.mxu1 %v4134_v52 }
 0xa2a   :  { %v4110_v7 = vsel %vm63_vm0, %v4105_v43, 0  ;;  %4715 = vtanh.f32 %v1866_v16  ;;  %v6429_v43 = vld [vmem:[#allocation75_spill] sm:$0xff] }
 0xa2b   :  { %v4136_v38 = vand.u32 4294901760, %v4135_v27  ;;  %v4140_v33 = vand.u32 4294901760, %v4110_v7 }
 0xa2d   :  { %v4141_v49 = vsub.f32 %v4110_v7, %v4140_v33  ;;  %4137 = vmatmul.f32.vlgmr.msra.gmra.mxu2 %v4136_v38  ;;  %4190 = vmatmul.f32.gmra.mxu3 %v4140_v33  ;;  %v6430_v7 = vld [vmem:[#allocation15_spill] sm:$0xff] }
 0xa2f   :  { %4225 = vmatmul.f32.gmra.mxu0 %v4141_v49  ;;  %v4142_v60 = vand.u32 4294901760, %v4141_v49  ;;  %v2355_v18 = vpop.permute.xlu1 %2354  ;;  %v3343_v48 = vpop.permute.xlu0 %3342 }
 0xa30   :  { %v2360_v23 = vadd.f32 %v2355_v18, %v6425_v51  ;;  %v3348_v19 = vadd.f32 %v3343_v48, %v6426_v6  ;;  %v4716_v17 = vpop.eup %4715  ;;  %v1393_v18 = vstv %s6109_s10  ;;  %v6434_v48 = vld [vmem:[#allocation16_spill] sm:$0xff] }
 0xa31   :  { %4258 = vmatmul.f32.gmra.mxu1 %v4142_v60  ;;  %v4143_v39 = vsub.f32 %v4141_v49, %v4142_v60 }
 0xa32   :  { %4717 = vtanh.f32 %v2360_v23 }
 0xa33   :  { %v4144_v56 = vand.u32 4294901760, %v4143_v39  ;;  %4719 = vtanh.f32 %v3348_v19 }
 0xa35   :  { %4145 = vmatmul.f32.gmra.mxu2 %v4144_v56  ;;  %4320 = vmatmul.f32.vlgmr.msrb.gmra.mxu3 %v4132_v25 }
 0xa37   :  { %v1369_v4 = vpop.permute.xlu1 %1368  ;;  %v3837_v32 = vpop.permute.xlu0 %3836 }
 0xa38   :  { %v1373_v40 = vadd.f32 %v1369_v4, %v6427_v28  ;;  %v4718_v24 = vpop.eup %4717  ;;  %v3842_v61 = vadd.f32 %v3837_v32, %v5937_v42  ;;  %v6435_v4 = vld [vmem:[#allocation72_spill] sm:$0xff] }
 0xa39   :  { %v2364_v6 = vmul.f32 %v6079_v31, %v6435_v4 }
 0xa3a   :  { %4721 = vtanh.f32 %v1373_v40 }
 0xa3b   :  { %4723 = vtanh.f32 %v3842_v61 }
 0xa3d   :  { %4291 = vmatmul.f32.vlgmr.msrb.gmra.mxu2 %v4132_v25  ;;  %4324 = vmatmul.f32.gmra.mxu3 %v4140_v33 }
 0xa3f   :  { %v2357_v10 = vpop.permute.xlu1 %2356  ;;  %v2851_v52 = vpop.permute.xlu0 %2850 }
 0xa40   :  { %v2361_v25 = vadd.f32 %v2357_v10, %v6428_v3  ;;  %v2855_v27 = vadd.f32 %v2851_v52, %v6429_v43  ;;  %v6436_v10 = vld [vmem:[#allocation67_spill] sm:$0xff]  ;;  %v2875_v43 = vstv %s6126_s13 }
 0xa41   :  { %v1873_v61 = vsub.f32 1.0, %v6436_v10 }
 0xa42   :  { %4725 = vtanh.f32 %v2361_v25  ;;  %v2381_v25 = vstv %s6124_s12 }
 0xa43   :  { %4727 = vtanh.f32 %v2855_v27  ;;  %v3846_v27 = vmul.f32 %v6079_v31, %v5943_v26 }
 0xa45   :  { %4295 = vmatmul.f32.gmra.mxu2 %v4140_v33 }
 0xa47   :  { %v3345_v13 = vpop.permute.xlu1 %3344 }
 0xa48   :  { %v3349_v38 = vadd.f32 %v3345_v13, %v6430_v7 }
 0xa4a   :  { %4729 = vtanh.f32 %v3349_v38 }
 0xaa4   :  { %v4221_v34 = vpop.f32.mrf.mxu0 }
 0xaa6   :  { %v4253_v37 = vpop.f32.mrf.mxu1 }
 0xaa8   :  { %v4187_v11 = vpop.f32.mrf.mxu3 }
 0xaac   :  { %v4226_v58 = vpop.f32.mrf.mxu0 }
 0xaae   :  { %v4259_v15 = vpop.f32.mrf.mxu1 }
 0xab0   :  { %v4138_v9 = vpop.f32.mrf.mxu2  ;;  %v4191_v21 = vpop.f32.mrf.mxu3 }
 0xab1   :  { %v4188_v59 = vadd.f32 %v4187_v11, %v4138_v9 }
 0xab3   :  { %v4222_v45 = vadd.f32 %v4221_v34, %v4188_v59  ;;  %v1383_v59 = vpop.permute.xlu1 %1382  ;;  %v6431_v34 = vld [vmem:[#allocation38_spill] sm:$0xff] }
 0xab5   :  { %v4254_v1 = vadd.f32 %v4253_v37, %v4222_v45  ;;  %v6432_v37 = vld [vmem:[#allocation66_spill] sm:$0xff] }
 0xab6   :  { %v1872_v46 = vsub.f32 1.0, %v6432_v37 }
 0xab8   :  { %v4146_v14 = vpop.f32.mrf.mxu2  ;;  %v4321_v41 = vpop.f32.mrf.mxu3 }
 0xab9   :  { %v4192_v50 = vadd.f32 %v4191_v21, %v4146_v14  ;;  %v1378_v14 = vsub.f32 1.0, %v6431_v34 }
 0xabb   :  { %v4227_v57 = vadd.f32 %v4226_v58, %v4192_v50  ;;  %v1388_v45 = vmul.f32 %v1383_v59, %v1378_v14  ;;  %v1887_v58 = vstv %s6113_s11  ;;  %v3863_v59 = vstv %s6135_s15 }
 0xabd   :  { %v4260_v8 = vadd.f32 %v4259_v15, %v4227_v57 }
 0xac0   :  { %v4292_v54 = vpop.f32.mrf.mxu2  ;;  %v4325_v47 = vpop.f32.mrf.mxu3 }
 0xac1   :  { %v4293_v29 = vadd.f32 %v4292_v54, %v4254_v1  ;;  %v1870_v1 = vmul.f32 %v6079_v31, %v6432_v37 }
 0xac3   :  { %v4322_v22 = vadd.f32 %v4321_v41, %v4293_v29 }
 0xac5   :  { %4330 = vrot.lane.b32.xlu2 %v4322_v22, %s4814_s9 }
 0xac8   :  { %v4296_v5 = vpop.f32.mrf.mxu2 }
 0xac9   :  { %v4297_v30 = vadd.f32 %v4296_v5, %v4260_v8  ;;  %v2865_v5 = vpop.permute.xlu1 %2864 }
 0xacb   :  { %v4326_v44 = vadd.f32 %v4325_v47, %v4297_v30  ;;  %v6433_v30 = vld [vmem:[#allocation76_spill] sm:$0xff]  ;;  %v3354_v47 = vsub.f32 1.0, %v6434_v48 }
 0xacc   :  { %v2860_v51 = vsub.f32 1.0, %v6433_v30  ;;  %v2858_v40 = vmul.f32 %v6079_v31, %v6433_v30 }
 0xacd   :  { %4332 = vrot.lane.b32.xlu0 %v4326_v44, %s4814_s9  ;;  %3838 = vrot.lane.b32.xlu2 %v6020_v63, %s4814_s9  ;;  %v4720_v63 = vpop.eup %4719  ;;  %v2366_v44 = vsub.f32 1.0, %v6435_v4 }
 0xace   :  { %v4722_v2 = vpop.eup %4721  ;;  %v2870_v23 = vmul.f32 %v2865_v5, %v2860_v51 }
 0xacf   :  { %v4724_v33 = vpop.eup %4723 }
 0xad0   :  { %v4726_v49 = vpop.eup %4725 }
 0xad1   :  { %v4728_v42 = vpop.eup %4727  ;;  %v1879_v3 = vpop.permute.xlu1 %1878 }
 0xad2   :  { %v4730_v60 = vpop.eup %4729  ;;  %v1883_v7 = vmul.f32 %v1879_v3, %v1873_v61  ;;  %v4366_v61 = vld [vmem:[%s6212_s4 + $0x58] sm:$0xff] }
 0xad5   :  { %2370 = vrot.lane.b32.xlu0 %v4718_v24, %s4814_s9  ;;  %1876 = vrot.lane.b32.xlu2 %v4716_v17, %s4814_s9  ;;  %v3848_v24 = vsub.f32 1.0, %v5943_v26 }
 0xadd   :  { %3358 = vrot.lane.b32.xlu2 %v4720_v63, %s4814_s9  ;;  %1384 = vrot.lane.b32.xlu0 %v4722_v2, %s4814_s9  ;;  %v3352_v63 = vmul.f32 %v6079_v31, %v6434_v48  ;;  %v2872_v2 = vadd.f32 %v2870_v23, %v2858_v40 }
 0xae5   :  { %3852 = vrot.lane.b32.xlu2 %v4724_v33, %s4814_s9  ;;  %2372 = vrot.lane.b32.xlu0 %v4726_v49, %s4814_s9  ;;  %v3369_v49 = vstv %s6129_s14 }
 0xaed   :  { %2866 = vrot.lane.b32.xlu2 %v4728_v42, %s4814_s9  ;;  %3360 = vrot.lane.b32.xlu0 %v4730_v60, %s4814_s9  ;;  %v6437_v42 = vld [vmem:[#allocation39_spill] sm:$0xff] }
 0xaee   :  { %v1379_v60 = vsub.f32 1.0, %v6437_v42 }
 0xb1f   :  { %v4331_v39 = vpop.permute.xlu2 %4330 }
 0xb20   :  { %v4336_v56 = vadd.f32 %v4331_v39, %v6023_v36  ;;  %v1376_v36 = vmul.f32 %v6079_v31, %v6431_v34  ;;  %v1871_v39 = vmul.f32 %v6083_v20, %v6436_v10 }
 0xb22   :  { %4731 = vtanh.f32 %v4336_v56  ;;  %v1390_v41 = vadd.f32 %v1388_v45, %v1376_v36  ;;  %v2876_v56 = vmul.f32 %v2875_v43, %v2872_v2  ;;  %v1885_v14 = vadd.f32 %v1883_v7, %v1871_v39 }
 0xb24   :  { %v1394_v57 = vmul.f32 %v1393_v18, %v1390_v41  ;;  %v6438_v41 = vld [vmem:[#allocation77_spill] sm:$0xff] }
 0xb25   :  { %v2859_v30 = vmul.f32 %v6083_v20, %v6438_v41 }
 0xb27   :  { %v3839_v11 = vpop.permute.xlu2 %3838 }
 0xb28   :  { %v4732_v9 = vpop.eup %4731  ;;  %v3843_v21 = vadd.f32 %v3839_v11, %v5940_v35 }
 0xb29   :  { %4346 = vrot.lane.b32.xlu1 %v4732_v9, %s4814_s9 }
 0xb2a   :  { %4733 = vtanh.f32 %v3843_v21  ;;  %v1377_v21 = vmul.f32 %v6083_v20, %v6437_v42 }
 0xb2f   :  { %v1877_v50 = vpop.permute.xlu2 %1876 }
 0xb30   :  { %v4734_v35 = vpop.eup %4733  ;;  %v1882_v54 = vmul.f32 %v1877_v50, %v1872_v46 }
 0xb31   :  { %3854 = vrot.lane.b32.xlu1 %v4734_v35, %s4814_s9 }
 0xb32   :  { %v1884_v29 = vadd.f32 %v1882_v54, %v1870_v1  ;;  %v1889_v1 = vmul.f32 %v1887_v58, %v1885_v14  ;;  %v2861_v54 = vsub.f32 1.0, %v6438_v41  ;;  %v4343_v41 = vsub.f32 1.0, %v6042_v12 }
 0xb34   :  { %v1888_v22 = vmul.f32 %v1887_v58, %v1884_v29 }
 0xb36   :  { %v1890_v15 = vadd.f32 %v1888_v22, %v1394_v57 }
 0xb37   :  { %v3359_v8 = vpop.permute.xlu2 %3358 }
 0xb38   :  { %v3364_v17 = vmul.f32 %v3359_v8, %v3354_v47  ;;  %v6439_v8 = vld [vmem:[#allocation73_spill] sm:$0xff] }
 0xb39   :  { %v2367_v5 = vsub.f32 1.0, %v6439_v8 }
 0xb3a   :  { %v3366_v38 = vadd.f32 %v3364_v17, %v3352_v63  ;;  %v4365_v63 = vld [vmem:[%s6212_s4 + $0x50] sm:$0xff] }
 0xb3c   :  { %v3370_v26 = vmul.f32 %v3369_v49, %v3366_v38 }
 0xb3f   :  { %v4333_v62 = vpop.permute.xlu0 %4332 }
 0xb40   :  { %v4337_v16 = vadd.f32 %v4333_v62, %v6026_v55  ;;  %v3853_v55 = vpop.permute.xlu2 %3852 }
 0xb41   :  { %v3858_v52 = vmul.f32 %v3853_v55, %v3848_v24 }
 0xb42   :  { %4735 = vtanh.f32 %v4337_v16  ;;  %v2365_v16 = vmul.f32 %v6083_v20, %v6439_v8  ;;  %v4341_v8 = vmul.f32 %v6083_v20, %v6042_v12 }
 0xb43   :  { %v3860_v11 = vadd.f32 %v3858_v52, %v3846_v27 }
 0xb45   :  { %v3864_v37 = vmul.f32 %v3863_v59, %v3860_v11 }
 0xb47   :  { %v2371_v19 = vpop.permute.xlu0 %2370 }
 0xb48   :  { %v4736_v28 = vpop.eup %4735  ;;  %v2376_v32 = vmul.f32 %v2371_v19, %v2366_v44  ;;  %v2867_v35 = vpop.permute.xlu2 %2866 }
 0xb49   :  { %4348 = vrot.lane.b32.xlu2 %v4736_v28, %s4814_s9  ;;  %v2871_v22 = vmul.f32 %v2867_v35, %v2861_v54  ;;  %v3849_v54 = vsub.f32 1.0, %v5950_v53 }
 0xb4a   :  { %v2378_v13 = vadd.f32 %v2376_v32, %v2364_v6  ;;  %v4367_v32 = vld [vmem:[%s6212_s4 + $0x60] sm:$0xff] }
 0xb4b   :  { %v2873_v23 = vadd.f32 %v2871_v22, %v2859_v30  ;;  %v4388_v10 = vand.u32 4294901760, %v4367_v32 }
 0xb4c   :  { %v2382_v33 = vmul.f32 %v2381_v25, %v2378_v13  ;;  %v4392_v13 = vand.u32 4294901760, %v4365_v63 }
 0xb4d   :  { %v2877_v47 = vmul.f32 %v2875_v43, %v2873_v23  ;;  %v4426_v3 = vsub.f32 %v4367_v32, %v4388_v10  ;;  %4506 = vmatpush.msra.mxu3 %v4388_v10  ;;  %4389 = vmatpush.msrb.mxu0 %v4388_v10  ;;  %v4364_v43 = vld [vmem:[%s6212_s4 + $0x48] sm:$0xff]  ;;  %s4635_s4 = sld [smem:[#allocation2 + $0x6]] }
 0xb4e   :  { %v2384_v9 = vadd.f32 %v2382_v33, %v1890_v15  ;;  %v4438_v38 = vsub.f32 %v4365_v63, %v4392_v13  ;;  %v4394_v33 = vand.u32 4294901760, %v4364_v43 }
 0xb4f   :  { %v1385_v34 = vpop.permute.xlu0 %1384  ;;  %v4427_v2 = vand.u32 4294901760, %v4426_v3  ;;  %4472 = vmatpush.msra.mxu2 %v4426_v3 }
 0xb50   :  { %v2878_v45 = vadd.f32 %v2876_v56, %v2384_v9  ;;  %v1389_v36 = vmul.f32 %v1385_v34, %v1379_v60  ;;  %v4439_v60 = vand.u32 4294901760, %v4438_v38  ;;  %v4444_v39 = vsub.f32 %v4364_v43, %v4394_v33 }
 0xb51   :  { %v4428_v27 = vsub.f32 %v4426_v3, %v4427_v2 }
 0xb52   :  { %v1391_v46 = vadd.f32 %v1389_v36, %v1377_v21  ;;  %v3372_v50 = vadd.f32 %v3370_v26, %v2878_v45  ;;  %v4440_v11 = vsub.f32 %v4438_v38, %v4439_v60  ;;  %v4445_v9 = vand.u32 4294901760, %v4444_v39 }
 0xb53   :  { %v4342_v26 = vsub.f32 1.0, %v6032_v0  ;;  %v4340_v36 = vmul.f32 %v6079_v31, %v6032_v0 }
 0xb54   :  { %v1395_v29 = vmul.f32 %v1393_v18, %v1391_v46  ;;  %v6158_v57 = vadd.f32 %v3864_v37, %v3372_v50  ;;  %v6440_v18 = vld [vmem:[#allocation29_spill] sm:$0xff]  ;;  %v4441_v21 = vand.u32 4294901760, %v4440_v11  ;;  %v4446_v34 = vsub.f32 %v4444_v39, %v4445_v9 }
 0xb55   :  { %v3355_v44 = vsub.f32 1.0, %v6440_v18  ;;  %v3353_v55 = vmul.f32 %v6083_v20, %v6440_v18  ;;  %v4357_v46 = vstv %s4635_s4 }
 0xb56   :  { %v1891_v15 = vadd.f32 %v1889_v1, %v1395_v29  ;;  %v4447_v14 = vand.u32 4294901760, %v4446_v34  ;;  %v3847_v29 = vmul.f32 %v6083_v20, %v5950_v53 }
 0xb57   :  { %v2373_v62 = vpop.permute.xlu0 %2372 }
 0xb58   :  { %v2377_v51 = vmul.f32 %v2373_v62, %v2367_v5 }
 0xb5a   :  { %v2379_v48 = vadd.f32 %v2377_v51, %v2365_v16 }
 0xb5c   :  { %v2383_v58 = vmul.f32 %v2381_v25, %v2379_v48  ;;  %v4390_v25 = vand.u32 4294901760, %v4366_v61 }
 0xb5e   :  { %v2385_v4 = vadd.f32 %v2383_v58, %v1891_v15  ;;  %v4432_v52 = vsub.f32 %v4366_v61, %v4390_v25  ;;  %4508 = vmatpush.msra.mxu3 %v4390_v25  ;;  %4391 = vmatpush.msrb.mxu0 %v4390_v25 }
 0xb5f   :  { %v3361_v6 = vpop.permute.xlu0 %3360 }
 0xb60   :  { %v2879_v19 = vadd.f32 %v2877_v47, %v2385_v4  ;;  %v3365_v28 = vmul.f32 %v3361_v6, %v3355_v44  ;;  %v4433_v7 = vand.u32 4294901760, %v4432_v52  ;;  %4475 = vmatpush.msra.mxu2 %v4432_v52  ;;  %4510 = vmatpush.msra.mxu3 %v4392_v13 }
 0xb61   :  { %4393 = vmatpush.msrb.mxu0 %v4392_v13 }
 0xb62   :  { %v3367_v40 = vadd.f32 %v3365_v28, %v3353_v55  ;;  %v4434_v42 = vsub.f32 %v4432_v52, %v4433_v7  ;;  %4478 = vmatpush.msra.mxu2 %v4438_v38  ;;  %4512 = vmatpush.msra.mxu3 %v4394_v33 }
 0xb63   :  { %4395 = vmatpush.msrb.mxu0 %v4394_v33 }
 0xb64   :  { %v3371_v17 = vmul.f32 %v3369_v49, %v3367_v40  ;;  %v4429_v49 = vand.u32 4294901760, %v4428_v27  ;;  %v4435_v56 = vand.u32 4294901760, %v4434_v42  ;;  %4481 = vmatpush.msra.mxu2 %v4444_v39  ;;  %v4652_v40 = vld [vmem:[%s6213_s5 + $0x1] ss:$0 sm:$0xff]  ;;  %s4815_s5 = smov [#allocation7]  }
 0xb65   :  { %4541 = vmatpush.msra.mxu0 %v4427_v2  ;;  %s4600_s1 = sshll.u32 %s4815_s5, 4  ;;  %s4601_s1 = int_to_ptr.vmem [resolvable:$true] %s4600_s1 }
 0xb66   :  { %v6168_v24 = vadd.f32 %v3371_v17, %v2879_v19  ;;  %4430 = vmatpush.msrb.mxu1 %v4429_v49 }
 0xb67   :  { %4545 = vmatpush.msra.mxu0 %v4433_v7 }
 0xb68   :  { %4436 = vmatpush.msrb.mxu1 %v4435_v56 }
 0xb69   :  { %4549 = vmatpush.msra.mxu0 %v4439_v60 }
 0xb6a   :  { %4442 = vmatpush.msrb.mxu1 %v4441_v21 }
 0xb6b   :  { %4553 = vmatpush.msra.mxu0 %v4445_v9 }
 0xb6c   :  { %4448 = vmatpush.msrb.mxu1 %v4447_v14 }
 0xb6e   :  { %4576 = vmatpush.msra.mxu1 %v4388_v10 }
 0xb70   :  { %4578 = vmatpush.msra.mxu1 %v4390_v25 }
 0xb72   :  { %4580 = vmatpush.msra.mxu1 %v4392_v13 }
 0xb74   :  { %4582 = vmatpush.msra.mxu1 %v4394_v33 }
 0xb9b   :  { %v4347_v45 = vpop.permute.xlu1 %4346 }
 0xb9c   :  { %v4352_v37 = vmul.f32 %v4347_v45, %v4342_v26 }
 0xb9e   :  { %v4354_v50 = vadd.f32 %v4352_v37, %v4340_v36 }
 0xba0   :  { %v4358_v35 = vmul.f32 %v4357_v46, %v4354_v50 }
 0xba2   :  { %v4360_v1 = vadd.f32 %v4358_v35, %v6158_v57 }
 0xba3   :  { %v4349_v22 = vpop.permute.xlu2 %4348  ;;  %v3855_v15 = vpop.permute.xlu1 %3854 }
 0xba4   :  { %v4362_v0 = vmax.f32 %v4360_v1, 0.0  ;;  %v4353_v31 = vmul.f32 %v4349_v22, %v4343_v41  ;;  %v3859_v5 = vmul.f32 %v3855_v15, %v3849_v54 }
 0xba6   :  { %v4371_v62 = vsel %vm63_vm0, %v4362_v0, 0  ;;  %v4355_v16 = vadd.f32 %v4353_v31, %v4341_v8  ;;  %v3861_v30 = vadd.f32 %v3859_v5, %v3847_v29 }
 0xba7   :  { %v4396_v57 = vand.u32 4294901760, %v4371_v62 }
 0xba8   :  { %v3865_v51 = vmul.f32 %v3863_v59, %v3861_v30  ;;  %v4359_v48 = vmul.f32 %v4357_v46, %v4355_v16 }
 0xba9   :  { %v4397_v23 = vsub.f32 %v4371_v62, %v4396_v57  ;;  %4450 = vmatmul.f32.vlgmr.msrb.gmra.mxu1 %v4396_v57 }
 0xbaa   :  { %v3867_v53 = vadd.f32 %v3865_v51, %v6168_v24 }
 0xbab   :  { %4484 = vmatmul.f32.vlgmr.msra.gmra.mxu2 %v4397_v23  ;;  %v4398_v58 = vand.u32 4294901760, %v4397_v23 }
 0xbac   :  { %v4361_v47 = vadd.f32 %v4359_v48, %v3867_v53 }
 0xbad   :  { %4516 = vmatmul.f32.vlgmr.msra.gmra.mxu3 %v4398_v58  ;;  %v4399_v12 = vsub.f32 %v4397_v23, %v4398_v58 }
 0xbae   :  { %v4363_v20 = vmax.f32 %v4361_v47, 0.0 }
 0xbaf   :  { %v4400_v4 = vand.u32 4294901760, %v4399_v12 }
 0xbb0   :  { %v4374_v18 = vsel %vm63_vm0, %v4363_v20, 0 }
 0xbb1   :  { %4401 = vmatmul.f32.vlgmr.msrb.gmra.mxu0 %v4400_v4  ;;  %v4404_v44 = vand.u32 4294901760, %v4374_v18 }
 0xbb3   :  { %4454 = vmatmul.f32.gmra.mxu1 %v4404_v44  ;;  %v4405_v6 = vsub.f32 %v4374_v18, %v4404_v44 }
 0xbb5   :  { %4489 = vmatmul.f32.gmra.mxu2 %v4405_v6  ;;  %v4406_v59 = vand.u32 4294901760, %v4405_v6 }
 0xbb7   :  { %4522 = vmatmul.f32.gmra.mxu3 %v4406_v59  ;;  %v4407_v55 = vsub.f32 %v4405_v6, %v4406_v59 }
 0xbb9   :  { %v4408_v19 = vand.u32 4294901760, %v4407_v55 }
 0xbbb   :  { %4409 = vmatmul.f32.gmra.mxu0 %v4408_v19  ;;  %4584 = vmatmul.f32.vlgmr.msra.gmra.mxu1 %v4396_v57 }
 0xbc3   :  { %4555 = vmatmul.f32.vlgmr.msra.gmra.mxu0 %v4396_v57  ;;  %4588 = vmatmul.f32.gmra.mxu1 %v4404_v44 }
 0xbcb   :  { %4559 = vmatmul.f32.gmra.mxu0 %v4404_v44 }
 0xc26   :  { %v4451_v28 = vpop.f32.mrf.mxu1 }
 0xc2e   :  { %v4402_v17 = vpop.f32.mrf.mxu0  ;;  %v4485_v3 = vpop.f32.mrf.mxu2 }
 0xc2f   :  { %v4403_v24 = vadd.f32 %v4652_v40, %v4402_v17 }
 0xc30   :  { %v4455_v32 = vpop.f32.mrf.mxu1  ;;  %v4517_v2 = vpop.f32.mrf.mxu3 }
 0xc31   :  { %v4452_v10 = vadd.f32 %v4451_v28, %v4403_v24 }
 0xc33   :  { %v4486_v25 = vadd.f32 %v4485_v3, %v4452_v10 }
 0xc35   :  { %v4518_v52 = vadd.f32 %v4517_v2, %v4486_v25 }
 0xc38   :  { %v4410_v61 = vpop.f32.mrf.mxu0  ;;  %v4585_v43 = vpop.f32.mrf.mxu1 }
 0xc39   :  { %v4411_v63 = vadd.f32 %v4652_v40, %v4410_v61  ;;  %v4490_v38 = vpop.f32.mrf.mxu2 }
 0xc3a   :  { %v4523_v42 = vpop.f32.mrf.mxu3 }
 0xc3b   :  { %v4456_v13 = vadd.f32 %v4455_v32, %v4411_v63 }
 0xc3d   :  { %v4491_v33 = vadd.f32 %v4490_v38, %v4456_v13 }
 0xc3f   :  { %v4524_v60 = vadd.f32 %v4523_v42, %v4491_v33 }
 0xc40   :  { %v4556_v27 = vpop.f32.mrf.mxu0  ;;  %v4589_v11 = vpop.f32.mrf.mxu1 }
 0xc41   :  { %v4557_v7 = vadd.f32 %v4556_v27, %v4518_v52 }
 0xc43   :  { %v4586_v49 = vadd.f32 %v4585_v43, %v4557_v7 }
 0xc45   :  { %4592 = vst [vmem:[#allocation7] sm:$0xff] %v4586_v49 }
 0xc46   :  { %4594 = vst.msk [vmem:[#allocation7] sm:$0xff] %vm63_vm0, %v4360_v1 }
 0xc48   :  { %v4560_v39 = vpop.f32.mrf.mxu0 }
 0xc49   :  { %v4561_v56 = vadd.f32 %v4560_v39, %v4524_v60 }
 0xc4b   :  { %v4590_v9 = vadd.f32 %v4589_v11, %v4561_v56 }
 0xc4d   :  { %4593 = vst [vmem:[#allocation7 + $0x8] sm:$0xff] %v4590_v9 }
 0xc4e   :  { %4595 = vst.msk [vmem:[#allocation7 + $0x8] sm:$0xff] %vm63_vm0, %v4361_v47 }
 0xc4f   :  { %4608 = dma.vmem_to_hbm [thread:$0]  %s4601_s1, 256, %s4603_s27, [#allocation4], %s4811_s30, %s4811_s30, %s4812_s7  }
 0xc50   :  { %4807 = dma.done.wait [#allocation4], 256  }
 0xc51   :  { %4808 = vsyncadd [#allocation4], 4294967040 }
 0xc52   :  { %4613 = vsyncpa [#allocation3], 1 }
 0xc53   :  { %4614 = vsyncpa [#allocation4], 1 }
 0xc54   :  { %4615 = vsyncpa [#allocation5], 1 }

</bundles_post_ra>
